<compile_context>
chip_gen: v6e
topology: v6e:2x2x1
jax: 0.10.0
libtpu: 0.0.40
codegen_flags: <defaults>
</compile_context>

<pallas_src>
import jax
import jax.numpy as jnp
from jax.experimental import pallas as pl
from jax.experimental.pallas import tpu as pltpu

# ---- small synthetic config (model_cfg) ----
TEXT_FEATURE_DIM = 32   # model_cfg.TEXT_FEATURE_DIM
IMG_FEATURE_DIM = 32    # model_cfg.IMG_FEATURE_DIM
N_HEAD = 4              # model_cfg.TEXT_TRANSFORMER_HEAD
N_LAYER = 2             # model_cfg.TEXT_TRANSFORMER_LAYER
FF_DIM = 64             # TransformerEncoderLayer dim_feedforward (shrunk for synthetic size)
SEQ = 8
BATCH = 2


def _layer_norm(v, g2d, b2d, eps=1e-5):
    # PyTorch LayerNorm (biased variance, eps=1e-5) with fused statistics:
    # one data pass, two independent lane reductions, rsqrt on the EUP.
    inv_d = 1.0 / v.shape[-1]
    s1 = jnp.sum(v, axis=-1, keepdims=True)
    s2 = jnp.sum(v * v, axis=-1, keepdims=True)
    mu = s1 * inv_d
    var = s2 * inv_d - mu * mu
    return (v - mu) * jax.lax.rsqrt(var + eps) * g2d + b2d


def _encoder_kernel(x_ref, maskk_ref, segqk_ref, segexp_ref,
                    wqT_ref, bq_ref, wkT_ref, bk_ref, wvT_ref, bv_ref,
                    woT_ref, bo_ref,
                    ln1g_ref, ln1b_ref,
                    ffw1T_ref, ffb1_ref, ffw2T_ref, ffb2_ref,
                    ln2g_ref, ln2b_ref,
                    fcw1T_ref, fcb1_ref, fcw2T_ref, fcb2_ref,
                    o_ref):
    B, S, D = x_ref.shape
    H = N_HEAD
    BS = B * S

    # --- textFea = F.normalize(backbone_features, p=2, dim=-1), packed to [B*S, D] rows ---
    xs = x_ref[...].reshape(BS, D)
    xs = xs * jax.lax.rsqrt(jnp.maximum(jnp.sum(xs * xs, axis=-1, keepdims=True), 1e-24))

    # --- key-padding bias, built once: [B, 1, S(keys on sublanes), 1] ---
    maskk = maskk_ref[...]                                        # [B, S, 1]; 1=token, 0=pad
    bias4 = jnp.where(maskk > 0.5, 0.0, -1e30)[:, None, :, :]     # [B, 1, Sk, 1]

    seg_qk = segqk_ref[...]    # [D, H] one-hot(head of lane d), pre-scaled by 1/sqrt(Dh)
    seg_exp = segexp_ref[...]  # [H, D] one-hot expander (head -> its Dh lanes)

    # --- nn.TransformerEncoder: post-norm layers, dropout = identity at inference ---
    for l in range(N_LAYER):
        q = jnp.dot(xs, wqT_ref[l], preferred_element_type=jnp.float32) + bq_ref[l:l + 1, :]
        k = jnp.dot(xs, wkT_ref[l], preferred_element_type=jnp.float32) + bk_ref[l:l + 1, :]
        v = jnp.dot(xs, wvT_ref[l], preferred_element_type=jnp.float32) + bv_ref[l:l + 1, :]
        q3 = q.reshape(B, S, D)
        k3 = k.reshape(B, S, D)
        v3 = v.reshape(B, S, D)

        # all-head scores s[b, q, k, h] = (1/sqrt(Dh)) * sum_{d in head h} q*k:
        # outer product on the VPU, head segmentation via one tiny MXU dot with seg_qk.
        prod = q3[:, :, None, :] * k3[:, None, :, :]              # [B, Sq, Sk, D]
        s4 = jnp.dot(prod.reshape(BS * S, D), seg_qk,
                     preferred_element_type=jnp.float32).reshape(B, S, S, H)
        s4 = s4 + bias4

        m = jnp.max(s4, axis=2, keepdims=True)                    # [B, Sq, 1, H]
        e = jnp.exp(s4 - m)
        p = e * pl.reciprocal(jnp.sum(e, axis=2, keepdims=True), approx=True)

        # ctx[b, q, d] = sum_k p[b, q, k, head(d)] * v[b, k, d]; heads land concatenated in
        # lane order h*Dh..(h+1)*Dh-1, matching PyTorch MHA's concat before out_proj.
        pfull = jnp.dot(p.reshape(BS * S, H), seg_exp,
                        preferred_element_type=jnp.float32).reshape(B, S, S, D)
        ctx = jnp.sum(pfull * v3[:, None, :, :], axis=2).reshape(BS, D)

        attn = jnp.dot(ctx, woT_ref[l], preferred_element_type=jnp.float32) + bo_ref[l:l + 1, :]
        xs = _layer_norm(xs + attn, ln1g_ref[l:l + 1, :], ln1b_ref[l:l + 1, :])

        hdn = jnp.maximum(
            jnp.dot(xs, ffw1T_ref[l], preferred_element_type=jnp.float32) + ffb1_ref[l:l + 1, :],
            0.0)
        ff = jnp.dot(hdn, ffw2T_ref[l], preferred_element_type=jnp.float32) + ffb2_ref[l:l + 1, :]
        xs = _layer_norm(xs + ff, ln2g_ref[l:l + 1, :], ln2b_ref[l:l + 1, :])

    # --- masked mean pooling: vectorized multiply + sublane reduce, exact divide ---
    x3 = xs.reshape(B, S, D)
    pooled = jnp.sum(x3 * maskk, axis=1)                          # [B, D]
    cnt = jnp.sum(maskk, axis=1)                                  # [B, 1]
    pooled = pooled / jnp.maximum(cnt, 1e-6)                      # all-pad rows guarded

    # --- FakeTransformer head: Linear(D, IMG) -> ReLU -> Linear(IMG, IMG) ---
    h1 = jnp.maximum(
        jnp.dot(pooled, fcw1T_ref[...], preferred_element_type=jnp.float32) + fcb1_ref[...],
        0.0)
    o_ref[...] = jnp.dot(h1, fcw2T_ref[...], preferred_element_type=jnp.float32) + fcb2_ref[...]


def text_learnable_encoder(x, mask, params):
    """x: [B, S, TEXT_FEATURE_DIM] float32 (backbone output), mask: [B, S] float32 of {0,1}."""
    B, S, D = x.shape
    H = N_HEAD
    Dh = D // H

    # ---- layout plumbing done once on the host/XLA side (never inside the kernel) ----
    wq = params["in_proj_w"][:, 0 * D:1 * D, :]
    wk = params["in_proj_w"][:, 1 * D:2 * D, :]
    wv = params["in_proj_w"][:, 2 * D:3 * D, :]
    bq = params["in_proj_b"][:, 0 * D:1 * D]
    bk = params["in_proj_b"][:, 1 * D:2 * D]
    bv = params["in_proj_b"][:, 2 * D:3 * D]

    # head segment matrices: seg[d, h] = 1 iff lane d belongs to head h (QK scale folded in)
    head_of_d = jnp.arange(D, dtype=jnp.int32) // Dh
    seg = (head_of_d[:, None] == jnp.arange(H, dtype=jnp.int32)[None, :]).astype(jnp.float32)
    seg_qk = seg * (1.0 / float(Dh) ** 0.5)      # [D, H]
    seg_exp = seg.T                              # [H, D]

    mask_k = mask[:, :, None]                    # [B, S, 1]: keys on sublanes, lane-broadcastable

    args = (
        x, mask_k, seg_qk, seg_exp,
        jnp.swapaxes(wq, -1, -2), bq,                              # [L, D, D], [L, D]
        jnp.swapaxes(wk, -1, -2), bk,
        jnp.swapaxes(wv, -1, -2), bv,
        jnp.swapaxes(params["out_proj_w"], -1, -2), params["out_proj_b"],
        params["ln1_g"], params["ln1_b"],
        jnp.swapaxes(params["ff_w1"], -1, -2), params["ff_b1"],
        jnp.swapaxes(params["ff_w2"], -1, -2), params["ff_b2"],
        params["ln2_g"], params["ln2_b"],
        params["fc_w1"].T, params["fc_b1"],
        params["fc_w2"].T, params["fc_b2"],
    )

    # Single grid-less invocation: all weights + activations (~70 KB) stay resident in VMEM.
    # At real BriVL sizes this is where a layer grid axis ('arbitrary', per-layer weight
    # BlockSpecs) and a parallel batch axis would be added (v7x: 64 MiB VMEM, 2 TCs).
    vmem_spec = pl.BlockSpec(memory_space=pltpu.MemorySpace.VMEM)
    return pl.pallas_call(
        _encoder_kernel,
        out_shape=jax.ShapeDtypeStruct((B, IMG_FEATURE_DIM), jnp.float32),
        in_specs=[vmem_spec] * len(args),
        out_specs=vmem_spec,
        compiler_params=pltpu.CompilerParams(vmem_limit_bytes=32 * 1024 * 1024),
    )(*args)


def init_params(key):
    D, FF, IMG, L = TEXT_FEATURE_DIM, FF_DIM, IMG_FEATURE_DIM, N_LAYER
    ks = jax.random.split(key, 10)

    def rnd(k, shape, scale=0.05):
        return scale * jax.random.normal(k, shape, dtype=jnp.float32)

    return dict(
        in_proj_w=rnd(ks[0], (L, 3 * D, D)),
        in_proj_b=rnd(ks[1], (L, 3 * D)),
        out_proj_w=rnd(ks[2], (L, D, D)),
        out_proj_b=rnd(ks[3], (L, D)),
        ln1_g=jnp.ones((L, D), jnp.float32),
        ln1_b=jnp.zeros((L, D), jnp.float32),
        ff_w1=rnd(ks[4], (L, FF, D)),
        ff_b1=rnd(ks[5], (L, FF)),
        ff_w2=rnd(ks[6], (L, D, FF)),
        ff_b2=rnd(ks[7], (L, D)),
        ln2_g=jnp.ones((L, D), jnp.float32),
        ln2_b=jnp.zeros((L, D), jnp.float32),
        fc_w1=rnd(ks[8], (IMG, D)),
        fc_b1=jnp.zeros((1, IMG), jnp.float32),
        fc_w2=rnd(ks[9], (IMG, IMG)),
        fc_b2=jnp.zeros((1, IMG), jnp.float32),
    )


if __name__ == "__main__":
    key = jax.random.PRNGKey(0)
    k_feat, k_param = jax.random.split(key)

    # synthetic Bert backbone output features [B, S, TEXT_FEATURE_DIM]
    text_fea = jax.random.normal(k_feat, (BATCH, SEQ, TEXT_FEATURE_DIM), dtype=jnp.float32)
    # maskTexts: 1 = real token, 0 = padding
    mask_texts = jnp.array([[1, 1, 1, 1, 1, 0, 0, 0],
                            [1, 1, 1, 1, 1, 1, 1, 0]], dtype=jnp.int32)
    mask_f = mask_texts.astype(jnp.float32)

    params = init_params(k_param)
    out = jax.jit(text_learnable_encoder)(text_fea, mask_f, params)
    jax.block_until_ready(out)

    assert out.shape == (BATCH, IMG_FEATURE_DIM)
    assert bool(jnp.all(jnp.isfinite(out)))
    print("KERNEL_OK")
</pallas_src>

<mosaic_0001>
module attributes {stable_mosaic.version = 11 : i64} {
  func.func @_encoder_kernel(%arg0: memref<2x8x32xf32, #tpu.memory_space<vmem>>, %arg1: memref<2x8x1xf32, #tpu.memory_space<vmem>>, %arg2: memref<32x4xf32, #tpu.memory_space<vmem>>, %arg3: memref<4x32xf32, #tpu.memory_space<vmem>>, %arg4: memref<2x32x32xf32, #tpu.memory_space<vmem>>, %arg5: memref<2x32xf32, #tpu.memory_space<vmem>>, %arg6: memref<2x32x32xf32, #tpu.memory_space<vmem>>, %arg7: memref<2x32xf32, #tpu.memory_space<vmem>>, %arg8: memref<2x32x32xf32, #tpu.memory_space<vmem>>, %arg9: memref<2x32xf32, #tpu.memory_space<vmem>>, %arg10: memref<2x32x32xf32, #tpu.memory_space<vmem>>, %arg11: memref<2x32xf32, #tpu.memory_space<vmem>>, %arg12: memref<2x32xf32, #tpu.memory_space<vmem>>, %arg13: memref<2x32xf32, #tpu.memory_space<vmem>>, %arg14: memref<2x32x64xf32, #tpu.memory_space<vmem>>, %arg15: memref<2x64xf32, #tpu.memory_space<vmem>>, %arg16: memref<2x64x32xf32, #tpu.memory_space<vmem>>, %arg17: memref<2x32xf32, #tpu.memory_space<vmem>>, %arg18: memref<2x32xf32, #tpu.memory_space<vmem>>, %arg19: memref<2x32xf32, #tpu.memory_space<vmem>>, %arg20: memref<32x32xf32, #tpu.memory_space<vmem>>, %arg21: memref<1x32xf32, #tpu.memory_space<vmem>>, %arg22: memref<32x32xf32, #tpu.memory_space<vmem>>, %arg23: memref<1x32xf32, #tpu.memory_space<vmem>>, %arg24: memref<2x32xf32, #tpu.memory_space<vmem>>) attributes {dimension_semantics = [], scalar_prefetch = 0 : i64, scratch_operands = 0 : i64, tpu.core_type = #tpu.core_type<tc>} {
    %c0 = arith.constant 0 : index
    %c0_0 = arith.constant 0 : index
    %c0_1 = arith.constant 0 : index
    %0 = vector.load %arg0[%c0, %c0_0, %c0_1] : memref<2x8x32xf32, #tpu.memory_space<vmem>>, vector<2x8x32xf32>
    %1 = vector.shape_cast %0 : vector<2x8x32xf32> to vector<16x32xf32>
    %2 = arith.mulf %1, %1 : vector<16x32xf32>
    %cst = arith.constant dense<0.000000e+00> : vector<16xf32>
    %3 = vector.multi_reduction <add>, %2, %cst [1] : vector<16x32xf32> to vector<16xf32>
    %4 = vector.shape_cast %3 : vector<16xf32> to vector<16x1xf32>
    %cst_2 = arith.constant 1.000000e-24 : f32
    %5 = vector.broadcast %cst_2 : f32 to vector<16x1xf32>
    %6 = arith.maximumf %4, %5 : vector<16x1xf32>
    %7 = math.rsqrt %6 : vector<16x1xf32>
    %8 = vector.broadcast %7 : vector<16x1xf32> to vector<16x32xf32>
    %9 = arith.mulf %1, %8 : vector<16x32xf32>
    %c0_3 = arith.constant 0 : index
    %c0_4 = arith.constant 0 : index
    %c0_5 = arith.constant 0 : index
    %10 = vector.load %arg1[%c0_3, %c0_4, %c0_5] : memref<2x8x1xf32, #tpu.memory_space<vmem>>, vector<2x8x1xf32>
    %cst_6 = arith.constant 5.000000e-01 : f32
    %11 = vector.broadcast %cst_6 : f32 to vector<2x8x1xf32>
    %12 = arith.cmpf ogt, %10, %11 : vector<2x8x1xf32>
    %cst_7 = arith.constant 0.000000e+00 : f32
    %cst_8 = arith.constant -1.000000e+30 : f32
    %13 = vector.broadcast %cst_7 : f32 to vector<2x8x1xf32>
    %14 = vector.broadcast %cst_8 : f32 to vector<2x8x1xf32>
    %15 = arith.select %12, %13, %14 : vector<2x8x1xi1>, vector<2x8x1xf32>
    %16 = vector.shape_cast %15 : vector<2x8x1xf32> to vector<2x1x8x1xf32>
    %c0_9 = arith.constant 0 : index
    %c0_10 = arith.constant 0 : index
    %17 = vector.load %arg2[%c0_9, %c0_10] : memref<32x4xf32, #tpu.memory_space<vmem>>, vector<32x4xf32>
    %c0_11 = arith.constant 0 : index
    %c0_12 = arith.constant 0 : index
    %18 = vector.load %arg3[%c0_11, %c0_12] : memref<4x32xf32, #tpu.memory_space<vmem>>, vector<4x32xf32>
    %c0_13 = arith.constant 0 : index
    %c0_14 = arith.constant 0 : index
    %c0_15 = arith.constant 0 : index
    %19 = vector.load %arg4[%c0_13, %c0_14, %c0_15] : memref<2x32x32xf32, #tpu.memory_space<vmem>>, vector<1x32x32xf32>
    %20 = vector.shape_cast %19 : vector<1x32x32xf32> to vector<32x32xf32>
    %cst_16 = arith.constant dense<0.000000e+00> : vector<16x32xf32>
    %21 = tpu.matmul %9, %20, %cst_16 {dimension_numbers = #tpu.dot_dimension_numbers<[1], [0], [0], [1], [0, 0, 1, 1], [], []>} : vector<16x32xf32>, vector<32x32xf32>, vector<16x32xf32> -> vector<16x32xf32>
    %c0_17 = arith.constant 0 : index
    %c0_18 = arith.constant 0 : index
    %22 = vector.load %arg5[%c0_17, %c0_18] : memref<2x32xf32, #tpu.memory_space<vmem>>, vector<1x32xf32>
    %23 = vector.broadcast %22 : vector<1x32xf32> to vector<16x32xf32>
    %24 = arith.addf %21, %23 : vector<16x32xf32>
    %c0_19 = arith.constant 0 : index
    %c0_20 = arith.constant 0 : index
    %c0_21 = arith.constant 0 : index
    %25 = vector.load %arg6[%c0_19, %c0_20, %c0_21] : memref<2x32x32xf32, #tpu.memory_space<vmem>>, vector<1x32x32xf32>
    %26 = vector.shape_cast %25 : vector<1x32x32xf32> to vector<32x32xf32>
    %cst_22 = arith.constant dense<0.000000e+00> : vector<16x32xf32>
    %27 = tpu.matmul %9, %26, %cst_22 {dimension_numbers = #tpu.dot_dimension_numbers<[1], [0], [0], [1], [0, 0, 1, 1], [], []>} : vector<16x32xf32>, vector<32x32xf32>, vector<16x32xf32> -> vector<16x32xf32>
    %c0_23 = arith.constant 0 : index
    %c0_24 = arith.constant 0 : index
    %28 = vector.load %arg7[%c0_23, %c0_24] : memref<2x32xf32, #tpu.memory_space<vmem>>, vector<1x32xf32>
    %29 = vector.broadcast %28 : vector<1x32xf32> to vector<16x32xf32>
    %30 = arith.addf %27, %29 : vector<16x32xf32>
    %c0_25 = arith.constant 0 : index
    %c0_26 = arith.constant 0 : index
    %c0_27 = arith.constant 0 : index
    %31 = vector.load %arg8[%c0_25, %c0_26, %c0_27] : memref<2x32x32xf32, #tpu.memory_space<vmem>>, vector<1x32x32xf32>
    %32 = vector.shape_cast %31 : vector<1x32x32xf32> to vector<32x32xf32>
    %cst_28 = arith.constant dense<0.000000e+00> : vector<16x32xf32>
    %33 = tpu.matmul %9, %32, %cst_28 {dimension_numbers = #tpu.dot_dimension_numbers<[1], [0], [0], [1], [0, 0, 1, 1], [], []>} : vector<16x32xf32>, vector<32x32xf32>, vector<16x32xf32> -> vector<16x32xf32>
    %c0_29 = arith.constant 0 : index
    %c0_30 = arith.constant 0 : index
    %34 = vector.load %arg9[%c0_29, %c0_30] : memref<2x32xf32, #tpu.memory_space<vmem>>, vector<1x32xf32>
    %35 = vector.broadcast %34 : vector<1x32xf32> to vector<16x32xf32>
    %36 = arith.addf %33, %35 : vector<16x32xf32>
    %37 = vector.shape_cast %24 : vector<16x32xf32> to vector<2x8x32xf32>
    %38 = vector.shape_cast %30 : vector<16x32xf32> to vector<2x8x32xf32>
    %39 = vector.shape_cast %36 : vector<16x32xf32> to vector<2x8x32xf32>
    %40 = vector.shape_cast %37 : vector<2x8x32xf32> to vector<2x8x1x32xf32>
    %41 = vector.shape_cast %38 : vector<2x8x32xf32> to vector<2x1x8x32xf32>
    %42 = vector.broadcast %40 : vector<2x8x1x32xf32> to vector<2x8x8x32xf32>
    %43 = vector.broadcast %41 : vector<2x1x8x32xf32> to vector<2x8x8x32xf32>
    %44 = arith.mulf %42, %43 : vector<2x8x8x32xf32>
    %45 = vector.shape_cast %44 : vector<2x8x8x32xf32> to vector<128x32xf32>
    %cst_31 = arith.constant dense<0.000000e+00> : vector<128x4xf32>
    %46 = tpu.matmul %45, %17, %cst_31 {dimension_numbers = #tpu.dot_dimension_numbers<[1], [0], [0], [1], [0, 0, 1, 1], [], []>} : vector<128x32xf32>, vector<32x4xf32>, vector<128x4xf32> -> vector<128x4xf32>
    %47 = vector.shape_cast %46 : vector<128x4xf32> to vector<2x8x8x4xf32>
    %48 = vector.broadcast %16 : vector<2x1x8x1xf32> to vector<2x8x8x4xf32>
    %49 = arith.addf %47, %48 : vector<2x8x8x4xf32>
    %cst_32 = arith.constant dense<0xFF800000> : vector<2x8x4xf32>
    %50 = vector.multi_reduction <maximumf>, %49, %cst_32 [2] : vector<2x8x8x4xf32> to vector<2x8x4xf32>
    %51 = vector.shape_cast %50 : vector<2x8x4xf32> to vector<2x8x1x4xf32>
    %52 = vector.broadcast %51 : vector<2x8x1x4xf32> to vector<2x8x8x4xf32>
    %53 = arith.subf %49, %52 : vector<2x8x8x4xf32>
    %54 = math.exp %53 : vector<2x8x8x4xf32>
    %cst_33 = arith.constant dense<0.000000e+00> : vector<2x8x4xf32>
    %55 = vector.multi_reduction <add>, %54, %cst_33 [2] : vector<2x8x8x4xf32> to vector<2x8x4xf32>
    %56 = vector.shape_cast %55 : vector<2x8x4xf32> to vector<2x8x1x4xf32>
    %57 = tpu.reciprocal %56 {approx = true} : vector<2x8x1x4xf32> -> vector<2x8x1x4xf32>
    %58 = vector.broadcast %57 : vector<2x8x1x4xf32> to vector<2x8x8x4xf32>
    %59 = arith.mulf %54, %58 : vector<2x8x8x4xf32>
    %60 = vector.shape_cast %59 : vector<2x8x8x4xf32> to vector<128x4xf32>
    %cst_34 = arith.constant dense<0.000000e+00> : vector<128x32xf32>
    %61 = tpu.matmul %60, %18, %cst_34 {dimension_numbers = #tpu.dot_dimension_numbers<[1], [0], [0], [1], [0, 0, 1, 1], [], []>} : vector<128x4xf32>, vector<4x32xf32>, vector<128x32xf32> -> vector<128x32xf32>
    %62 = vector.shape_cast %61 : vector<128x32xf32> to vector<2x8x8x32xf32>
    %63 = vector.shape_cast %39 : vector<2x8x32xf32> to vector<2x1x8x32xf32>
    %64 = vector.broadcast %63 : vector<2x1x8x32xf32> to vector<2x8x8x32xf32>
    %65 = arith.mulf %62, %64 : vector<2x8x8x32xf32>
    %cst_35 = arith.constant dense<0.000000e+00> : vector<2x8x32xf32>
    %66 = vector.multi_reduction <add>, %65, %cst_35 [2] : vector<2x8x8x32xf32> to vector<2x8x32xf32>
    %67 = vector.shape_cast %66 : vector<2x8x32xf32> to vector<16x32xf32>
    %c0_36 = arith.constant 0 : index
    %c0_37 = arith.constant 0 : index
    %c0_38 = arith.constant 0 : index
    %68 = vector.load %arg10[%c0_36, %c0_37, %c0_38] : memref<2x32x32xf32, #tpu.memory_space<vmem>>, vector<1x32x32xf32>
    %69 = vector.shape_cast %68 : vector<1x32x32xf32> to vector<32x32xf32>
    %cst_39 = arith.constant dense<0.000000e+00> : vector<16x32xf32>
    %70 = tpu.matmul %67, %69, %cst_39 {dimension_numbers = #tpu.dot_dimension_numbers<[1], [0], [0], [1], [0, 0, 1, 1], [], []>} : vector<16x32xf32>, vector<32x32xf32>, vector<16x32xf32> -> vector<16x32xf32>
    %c0_40 = arith.constant 0 : index
    %c0_41 = arith.constant 0 : index
    %71 = vector.load %arg11[%c0_40, %c0_41] : memref<2x32xf32, #tpu.memory_space<vmem>>, vector<1x32xf32>
    %72 = vector.broadcast %71 : vector<1x32xf32> to vector<16x32xf32>
    %73 = arith.addf %70, %72 : vector<16x32xf32>
    %74 = arith.addf %9, %73 : vector<16x32xf32>
    %c0_42 = arith.constant 0 : index
    %c0_43 = arith.constant 0 : index
    %75 = vector.load %arg12[%c0_42, %c0_43] : memref<2x32xf32, #tpu.memory_space<vmem>>, vector<1x32xf32>
    %c0_44 = arith.constant 0 : index
    %c0_45 = arith.constant 0 : index
    %76 = vector.load %arg13[%c0_44, %c0_45] : memref<2x32xf32, #tpu.memory_space<vmem>>, vector<1x32xf32>
    %cst_46 = arith.constant dense<0.000000e+00> : vector<16xf32>
    %77 = vector.multi_reduction <add>, %74, %cst_46 [1] : vector<16x32xf32> to vector<16xf32>
    %78 = vector.shape_cast %77 : vector<16xf32> to vector<16x1xf32>
    %79 = arith.mulf %74, %74 : vector<16x32xf32>
    %cst_47 = arith.constant dense<0.000000e+00> : vector<16xf32>
    %80 = vector.multi_reduction <add>, %79, %cst_47 [1] : vector<16x32xf32> to vector<16xf32>
    %81 = vector.shape_cast %80 : vector<16xf32> to vector<16x1xf32>
    %cst_48 = arith.constant 3.125000e-02 : f32
    %82 = vector.broadcast %cst_48 : f32 to vector<16x1xf32>
    %83 = arith.mulf %78, %82 : vector<16x1xf32>
    %cst_49 = arith.constant 3.125000e-02 : f32
    %84 = vector.broadcast %cst_49 : f32 to vector<16x1xf32>
    %85 = arith.mulf %81, %84 : vector<16x1xf32>
    %86 = arith.mulf %83, %83 : vector<16x1xf32>
    %87 = arith.subf %85, %86 : vector<16x1xf32>
    %88 = vector.broadcast %83 : vector<16x1xf32> to vector<16x32xf32>
    %89 = arith.subf %74, %88 : vector<16x32xf32>
    %cst_50 = arith.constant 9.99999974E-6 : f32
    %90 = vector.broadcast %cst_50 : f32 to vector<16x1xf32>
    %91 = arith.addf %87, %90 : vector<16x1xf32>
    %92 = math.rsqrt %91 : vector<16x1xf32>
    %93 = vector.broadcast %92 : vector<16x1xf32> to vector<16x32xf32>
    %94 = arith.mulf %89, %93 : vector<16x32xf32>
    %95 = vector.broadcast %75 : vector<1x32xf32> to vector<16x32xf32>
    %96 = arith.mulf %94, %95 : vector<16x32xf32>
    %97 = vector.broadcast %76 : vector<1x32xf32> to vector<16x32xf32>
    %98 = arith.addf %96, %97 : vector<16x32xf32>
    %c0_51 = arith.constant 0 : index
    %c0_52 = arith.constant 0 : index
    %c0_53 = arith.constant 0 : index
    %99 = vector.load %arg14[%c0_51, %c0_52, %c0_53] : memref<2x32x64xf32, #tpu.memory_space<vmem>>, vector<1x32x64xf32>
    %100 = vector.shape_cast %99 : vector<1x32x64xf32> to vector<32x64xf32>
    %cst_54 = arith.constant dense<0.000000e+00> : vector<16x64xf32>
    %101 = tpu.matmul %98, %100, %cst_54 {dimension_numbers = #tpu.dot_dimension_numbers<[1], [0], [0], [1], [0, 0, 1, 1], [], []>} : vector<16x32xf32>, vector<32x64xf32>, vector<16x64xf32> -> vector<16x64xf32>
    %c0_55 = arith.constant 0 : index
    %c0_56 = arith.constant 0 : index
    %102 = vector.load %arg15[%c0_55, %c0_56] : memref<2x64xf32, #tpu.memory_space<vmem>>, vector<1x64xf32>
    %103 = vector.broadcast %102 : vector<1x64xf32> to vector<16x64xf32>
    %104 = arith.addf %101, %103 : vector<16x64xf32>
    %cst_57 = arith.constant 0.000000e+00 : f32
    %105 = vector.broadcast %cst_57 : f32 to vector<16x64xf32>
    %106 = arith.maximumf %104, %105 : vector<16x64xf32>
    %c0_58 = arith.constant 0 : index
    %c0_59 = arith.constant 0 : index
    %c0_60 = arith.constant 0 : index
    %107 = vector.load %arg16[%c0_58, %c0_59, %c0_60] : memref<2x64x32xf32, #tpu.memory_space<vmem>>, vector<1x64x32xf32>
    %108 = vector.shape_cast %107 : vector<1x64x32xf32> to vector<64x32xf32>
    %cst_61 = arith.constant dense<0.000000e+00> : vector<16x32xf32>
    %109 = tpu.matmul %106, %108, %cst_61 {dimension_numbers = #tpu.dot_dimension_numbers<[1], [0], [0], [1], [0, 0, 1, 1], [], []>} : vector<16x64xf32>, vector<64x32xf32>, vector<16x32xf32> -> vector<16x32xf32>
    %c0_62 = arith.constant 0 : index
    %c0_63 = arith.constant 0 : index
    %110 = vector.load %arg17[%c0_62, %c0_63] : memref<2x32xf32, #tpu.memory_space<vmem>>, vector<1x32xf32>
    %111 = vector.broadcast %110 : vector<1x32xf32> to vector<16x32xf32>
    %112 = arith.addf %109, %111 : vector<16x32xf32>
    %113 = arith.addf %98, %112 : vector<16x32xf32>
    %c0_64 = arith.constant 0 : index
    %c0_65 = arith.constant 0 : index
    %114 = vector.load %arg18[%c0_64, %c0_65] : memref<2x32xf32, #tpu.memory_space<vmem>>, vector<1x32xf32>
    %c0_66 = arith.constant 0 : index
    %c0_67 = arith.constant 0 : index
    %115 = vector.load %arg19[%c0_66, %c0_67] : memref<2x32xf32, #tpu.memory_space<vmem>>, vector<1x32xf32>
    %cst_68 = arith.constant dense<0.000000e+00> : vector<16xf32>
    %116 = vector.multi_reduction <add>, %113, %cst_68 [1] : vector<16x32xf32> to vector<16xf32>
    %117 = vector.shape_cast %116 : vector<16xf32> to vector<16x1xf32>
    %118 = arith.mulf %113, %113 : vector<16x32xf32>
    %cst_69 = arith.constant dense<0.000000e+00> : vector<16xf32>
    %119 = vector.multi_reduction <add>, %118, %cst_69 [1] : vector<16x32xf32> to vector<16xf32>
    %120 = vector.shape_cast %119 : vector<16xf32> to vector<16x1xf32>
    %cst_70 = arith.constant 3.125000e-02 : f32
    %121 = vector.broadcast %cst_70 : f32 to vector<16x1xf32>
    %122 = arith.mulf %117, %121 : vector<16x1xf32>
    %cst_71 = arith.constant 3.125000e-02 : f32
    %123 = vector.broadcast %cst_71 : f32 to vector<16x1xf32>
    %124 = arith.mulf %120, %123 : vector<16x1xf32>
    %125 = arith.mulf %122, %122 : vector<16x1xf32>
    %126 = arith.subf %124, %125 : vector<16x1xf32>
    %127 = vector.broadcast %122 : vector<16x1xf32> to vector<16x32xf32>
    %128 = arith.subf %113, %127 : vector<16x32xf32>
    %cst_72 = arith.constant 9.99999974E-6 : f32
    %129 = vector.broadcast %cst_72 : f32 to vector<16x1xf32>
    %130 = arith.addf %126, %129 : vector<16x1xf32>
    %131 = math.rsqrt %130 : vector<16x1xf32>
    %132 = vector.broadcast %131 : vector<16x1xf32> to vector<16x32xf32>
    %133 = arith.mulf %128, %132 : vector<16x32xf32>
    %134 = vector.broadcast %114 : vector<1x32xf32> to vector<16x32xf32>
    %135 = arith.mulf %133, %134 : vector<16x32xf32>
    %136 = vector.broadcast %115 : vector<1x32xf32> to vector<16x32xf32>
    %137 = arith.addf %135, %136 : vector<16x32xf32>
    %c1 = arith.constant 1 : index
    %c0_73 = arith.constant 0 : index
    %c0_74 = arith.constant 0 : index
    %138 = vector.load %arg4[%c1, %c0_73, %c0_74] : memref<2x32x32xf32, #tpu.memory_space<vmem>>, vector<1x32x32xf32>
    %139 = vector.shape_cast %138 : vector<1x32x32xf32> to vector<32x32xf32>
    %cst_75 = arith.constant dense<0.000000e+00> : vector<16x32xf32>
    %140 = tpu.matmul %137, %139, %cst_75 {dimension_numbers = #tpu.dot_dimension_numbers<[1], [0], [0], [1], [0, 0, 1, 1], [], []>} : vector<16x32xf32>, vector<32x32xf32>, vector<16x32xf32> -> vector<16x32xf32>
    %c1_76 = arith.constant 1 : index
    %c0_77 = arith.constant 0 : index
    %141 = vector.load %arg5[%c1_76, %c0_77] : memref<2x32xf32, #tpu.memory_space<vmem>>, vector<1x32xf32>
    %142 = vector.broadcast %141 : vector<1x32xf32> to vector<16x32xf32>
    %143 = arith.addf %140, %142 : vector<16x32xf32>
    %c1_78 = arith.constant 1 : index
    %c0_79 = arith.constant 0 : index
    %c0_80 = arith.constant 0 : index
    %144 = vector.load %arg6[%c1_78, %c0_79, %c0_80] : memref<2x32x32xf32, #tpu.memory_space<vmem>>, vector<1x32x32xf32>
    %145 = vector.shape_cast %144 : vector<1x32x32xf32> to vector<32x32xf32>
    %cst_81 = arith.constant dense<0.000000e+00> : vector<16x32xf32>
    %146 = tpu.matmul %137, %145, %cst_81 {dimension_numbers = #tpu.dot_dimension_numbers<[1], [0], [0], [1], [0, 0, 1, 1], [], []>} : vector<16x32xf32>, vector<32x32xf32>, vector<16x32xf32> -> vector<16x32xf32>
    %c1_82 = arith.constant 1 : index
    %c0_83 = arith.constant 0 : index
    %147 = vector.load %arg7[%c1_82, %c0_83] : memref<2x32xf32, #tpu.memory_space<vmem>>, vector<1x32xf32>
    %148 = vector.broadcast %147 : vector<1x32xf32> to vector<16x32xf32>
    %149 = arith.addf %146, %148 : vector<16x32xf32>
    %c1_84 = arith.constant 1 : index
    %c0_85 = arith.constant 0 : index
    %c0_86 = arith.constant 0 : index
    %150 = vector.load %arg8[%c1_84, %c0_85, %c0_86] : memref<2x32x32xf32, #tpu.memory_space<vmem>>, vector<1x32x32xf32>
    %151 = vector.shape_cast %150 : vector<1x32x32xf32> to vector<32x32xf32>
    %cst_87 = arith.constant dense<0.000000e+00> : vector<16x32xf32>
    %152 = tpu.matmul %137, %151, %cst_87 {dimension_numbers = #tpu.dot_dimension_numbers<[1], [0], [0], [1], [0, 0, 1, 1], [], []>} : vector<16x32xf32>, vector<32x32xf32>, vector<16x32xf32> -> vector<16x32xf32>
    %c1_88 = arith.constant 1 : index
    %c0_89 = arith.constant 0 : index
    %153 = vector.load %arg9[%c1_88, %c0_89] : memref<2x32xf32, #tpu.memory_space<vmem>>, vector<1x32xf32>
    %154 = vector.broadcast %153 : vector<1x32xf32> to vector<16x32xf32>
    %155 = arith.addf %152, %154 : vector<16x32xf32>
    %156 = vector.shape_cast %143 : vector<16x32xf32> to vector<2x8x32xf32>
    %157 = vector.shape_cast %149 : vector<16x32xf32> to vector<2x8x32xf32>
    %158 = vector.shape_cast %155 : vector<16x32xf32> to vector<2x8x32xf32>
    %159 = vector.shape_cast %156 : vector<2x8x32xf32> to vector<2x8x1x32xf32>
    %160 = vector.shape_cast %157 : vector<2x8x32xf32> to vector<2x1x8x32xf32>
    %161 = vector.broadcast %159 : vector<2x8x1x32xf32> to vector<2x8x8x32xf32>
    %162 = vector.broadcast %160 : vector<2x1x8x32xf32> to vector<2x8x8x32xf32>
    %163 = arith.mulf %161, %162 : vector<2x8x8x32xf32>
    %164 = vector.shape_cast %163 : vector<2x8x8x32xf32> to vector<128x32xf32>
    %cst_90 = arith.constant dense<0.000000e+00> : vector<128x4xf32>
    %165 = tpu.matmul %164, %17, %cst_90 {dimension_numbers = #tpu.dot_dimension_numbers<[1], [0], [0], [1], [0, 0, 1, 1], [], []>} : vector<128x32xf32>, vector<32x4xf32>, vector<128x4xf32> -> vector<128x4xf32>
    %166 = vector.shape_cast %165 : vector<128x4xf32> to vector<2x8x8x4xf32>
    %167 = vector.broadcast %16 : vector<2x1x8x1xf32> to vector<2x8x8x4xf32>
    %168 = arith.addf %166, %167 : vector<2x8x8x4xf32>
    %cst_91 = arith.constant dense<0xFF800000> : vector<2x8x4xf32>
    %169 = vector.multi_reduction <maximumf>, %168, %cst_91 [2] : vector<2x8x8x4xf32> to vector<2x8x4xf32>
    %170 = vector.shape_cast %169 : vector<2x8x4xf32> to vector<2x8x1x4xf32>
    %171 = vector.broadcast %170 : vector<2x8x1x4xf32> to vector<2x8x8x4xf32>
    %172 = arith.subf %168, %171 : vector<2x8x8x4xf32>
    %173 = math.exp %172 : vector<2x8x8x4xf32>
    %cst_92 = arith.constant dense<0.000000e+00> : vector<2x8x4xf32>
    %174 = vector.multi_reduction <add>, %173, %cst_92 [2] : vector<2x8x8x4xf32> to vector<2x8x4xf32>
    %175 = vector.shape_cast %174 : vector<2x8x4xf32> to vector<2x8x1x4xf32>
    %176 = tpu.reciprocal %175 {approx = true} : vector<2x8x1x4xf32> -> vector<2x8x1x4xf32>
    %177 = vector.broadcast %176 : vector<2x8x1x4xf32> to vector<2x8x8x4xf32>
    %178 = arith.mulf %173, %177 : vector<2x8x8x4xf32>
    %179 = vector.shape_cast %178 : vector<2x8x8x4xf32> to vector<128x4xf32>
    %cst_93 = arith.constant dense<0.000000e+00> : vector<128x32xf32>
    %180 = tpu.matmul %179, %18, %cst_93 {dimension_numbers = #tpu.dot_dimension_numbers<[1], [0], [0], [1], [0, 0, 1, 1], [], []>} : vector<128x4xf32>, vector<4x32xf32>, vector<128x32xf32> -> vector<128x32xf32>
    %181 = vector.shape_cast %180 : vector<128x32xf32> to vector<2x8x8x32xf32>
    %182 = vector.shape_cast %158 : vector<2x8x32xf32> to vector<2x1x8x32xf32>
    %183 = vector.broadcast %182 : vector<2x1x8x32xf32> to vector<2x8x8x32xf32>
    %184 = arith.mulf %181, %183 : vector<2x8x8x32xf32>
    %cst_94 = arith.constant dense<0.000000e+00> : vector<2x8x32xf32>
    %185 = vector.multi_reduction <add>, %184, %cst_94 [2] : vector<2x8x8x32xf32> to vector<2x8x32xf32>
    %186 = vector.shape_cast %185 : vector<2x8x32xf32> to vector<16x32xf32>
    %c1_95 = arith.constant 1 : index
    %c0_96 = arith.constant 0 : index
    %c0_97 = arith.constant 0 : index
    %187 = vector.load %arg10[%c1_95, %c0_96, %c0_97] : memref<2x32x32xf32, #tpu.memory_space<vmem>>, vector<1x32x32xf32>
    %188 = vector.shape_cast %187 : vector<1x32x32xf32> to vector<32x32xf32>
    %cst_98 = arith.constant dense<0.000000e+00> : vector<16x32xf32>
    %189 = tpu.matmul %186, %188, %cst_98 {dimension_numbers = #tpu.dot_dimension_numbers<[1], [0], [0], [1], [0, 0, 1, 1], [], []>} : vector<16x32xf32>, vector<32x32xf32>, vector<16x32xf32> -> vector<16x32xf32>
    %c1_99 = arith.constant 1 : index
    %c0_100 = arith.constant 0 : index
    %190 = vector.load %arg11[%c1_99, %c0_100] : memref<2x32xf32, #tpu.memory_space<vmem>>, vector<1x32xf32>
    %191 = vector.broadcast %190 : vector<1x32xf32> to vector<16x32xf32>
    %192 = arith.addf %189, %191 : vector<16x32xf32>
    %193 = arith.addf %137, %192 : vector<16x32xf32>
    %c1_101 = arith.constant 1 : index
    %c0_102 = arith.constant 0 : index
    %194 = vector.load %arg12[%c1_101, %c0_102] : memref<2x32xf32, #tpu.memory_space<vmem>>, vector<1x32xf32>
    %c1_103 = arith.constant 1 : index
    %c0_104 = arith.constant 0 : index
    %195 = vector.load %arg13[%c1_103, %c0_104] : memref<2x32xf32, #tpu.memory_space<vmem>>, vector<1x32xf32>
    %cst_105 = arith.constant dense<0.000000e+00> : vector<16xf32>
    %196 = vector.multi_reduction <add>, %193, %cst_105 [1] : vector<16x32xf32> to vector<16xf32>
    %197 = vector.shape_cast %196 : vector<16xf32> to vector<16x1xf32>
    %198 = arith.mulf %193, %193 : vector<16x32xf32>
    %cst_106 = arith.constant dense<0.000000e+00> : vector<16xf32>
    %199 = vector.multi_reduction <add>, %198, %cst_106 [1] : vector<16x32xf32> to vector<16xf32>
    %200 = vector.shape_cast %199 : vector<16xf32> to vector<16x1xf32>
    %cst_107 = arith.constant 3.125000e-02 : f32
    %201 = vector.broadcast %cst_107 : f32 to vector<16x1xf32>
    %202 = arith.mulf %197, %201 : vector<16x1xf32>
    %cst_108 = arith.constant 3.125000e-02 : f32
    %203 = vector.broadcast %cst_108 : f32 to vector<16x1xf32>
    %204 = arith.mulf %200, %203 : vector<16x1xf32>
    %205 = arith.mulf %202, %202 : vector<16x1xf32>
    %206 = arith.subf %204, %205 : vector<16x1xf32>
    %207 = vector.broadcast %202 : vector<16x1xf32> to vector<16x32xf32>
    %208 = arith.subf %193, %207 : vector<16x32xf32>
    %cst_109 = arith.constant 9.99999974E-6 : f32
    %209 = vector.broadcast %cst_109 : f32 to vector<16x1xf32>
    %210 = arith.addf %206, %209 : vector<16x1xf32>
    %211 = math.rsqrt %210 : vector<16x1xf32>
    %212 = vector.broadcast %211 : vector<16x1xf32> to vector<16x32xf32>
    %213 = arith.mulf %208, %212 : vector<16x32xf32>
    %214 = vector.broadcast %194 : vector<1x32xf32> to vector<16x32xf32>
    %215 = arith.mulf %213, %214 : vector<16x32xf32>
    %216 = vector.broadcast %195 : vector<1x32xf32> to vector<16x32xf32>
    %217 = arith.addf %215, %216 : vector<16x32xf32>
    %c1_110 = arith.constant 1 : index
    %c0_111 = arith.constant 0 : index
    %c0_112 = arith.constant 0 : index
    %218 = vector.load %arg14[%c1_110, %c0_111, %c0_112] : memref<2x32x64xf32, #tpu.memory_space<vmem>>, vector<1x32x64xf32>
    %219 = vector.shape_cast %218 : vector<1x32x64xf32> to vector<32x64xf32>
    %cst_113 = arith.constant dense<0.000000e+00> : vector<16x64xf32>
    %220 = tpu.matmul %217, %219, %cst_113 {dimension_numbers = #tpu.dot_dimension_numbers<[1], [0], [0], [1], [0, 0, 1, 1], [], []>} : vector<16x32xf32>, vector<32x64xf32>, vector<16x64xf32> -> vector<16x64xf32>
    %c1_114 = arith.constant 1 : index
    %c0_115 = arith.constant 0 : index
    %221 = vector.load %arg15[%c1_114, %c0_115] : memref<2x64xf32, #tpu.memory_space<vmem>>, vector<1x64xf32>
    %222 = vector.broadcast %221 : vector<1x64xf32> to vector<16x64xf32>
    %223 = arith.addf %220, %222 : vector<16x64xf32>
    %cst_116 = arith.constant 0.000000e+00 : f32
    %224 = vector.broadcast %cst_116 : f32 to vector<16x64xf32>
    %225 = arith.maximumf %223, %224 : vector<16x64xf32>
    %c1_117 = arith.constant 1 : index
    %c0_118 = arith.constant 0 : index
    %c0_119 = arith.constant 0 : index
    %226 = vector.load %arg16[%c1_117, %c0_118, %c0_119] : memref<2x64x32xf32, #tpu.memory_space<vmem>>, vector<1x64x32xf32>
    %227 = vector.shape_cast %226 : vector<1x64x32xf32> to vector<64x32xf32>
    %cst_120 = arith.constant dense<0.000000e+00> : vector<16x32xf32>
    %228 = tpu.matmul %225, %227, %cst_120 {dimension_numbers = #tpu.dot_dimension_numbers<[1], [0], [0], [1], [0, 0, 1, 1], [], []>} : vector<16x64xf32>, vector<64x32xf32>, vector<16x32xf32> -> vector<16x32xf32>
    %c1_121 = arith.constant 1 : index
    %c0_122 = arith.constant 0 : index
    %229 = vector.load %arg17[%c1_121, %c0_122] : memref<2x32xf32, #tpu.memory_space<vmem>>, vector<1x32xf32>
    %230 = vector.broadcast %229 : vector<1x32xf32> to vector<16x32xf32>
    %231 = arith.addf %228, %230 : vector<16x32xf32>
    %232 = arith.addf %217, %231 : vector<16x32xf32>
    %c1_123 = arith.constant 1 : index
    %c0_124 = arith.constant 0 : index
    %233 = vector.load %arg18[%c1_123, %c0_124] : memref<2x32xf32, #tpu.memory_space<vmem>>, vector<1x32xf32>
    %c1_125 = arith.constant 1 : index
    %c0_126 = arith.constant 0 : index
    %234 = vector.load %arg19[%c1_125, %c0_126] : memref<2x32xf32, #tpu.memory_space<vmem>>, vector<1x32xf32>
    %cst_127 = arith.constant dense<0.000000e+00> : vector<16xf32>
    %235 = vector.multi_reduction <add>, %232, %cst_127 [1] : vector<16x32xf32> to vector<16xf32>
    %236 = vector.shape_cast %235 : vector<16xf32> to vector<16x1xf32>
    %237 = arith.mulf %232, %232 : vector<16x32xf32>
    %cst_128 = arith.constant dense<0.000000e+00> : vector<16xf32>
    %238 = vector.multi_reduction <add>, %237, %cst_128 [1] : vector<16x32xf32> to vector<16xf32>
    %239 = vector.shape_cast %238 : vector<16xf32> to vector<16x1xf32>
    %cst_129 = arith.constant 3.125000e-02 : f32
    %240 = vector.broadcast %cst_129 : f32 to vector<16x1xf32>
    %241 = arith.mulf %236, %240 : vector<16x1xf32>
    %cst_130 = arith.constant 3.125000e-02 : f32
    %242 = vector.broadcast %cst_130 : f32 to vector<16x1xf32>
    %243 = arith.mulf %239, %242 : vector<16x1xf32>
    %244 = arith.mulf %241, %241 : vector<16x1xf32>
    %245 = arith.subf %243, %244 : vector<16x1xf32>
    %246 = vector.broadcast %241 : vector<16x1xf32> to vector<16x32xf32>
    %247 = arith.subf %232, %246 : vector<16x32xf32>
    %cst_131 = arith.constant 9.99999974E-6 : f32
    %248 = vector.broadcast %cst_131 : f32 to vector<16x1xf32>
    %249 = arith.addf %245, %248 : vector<16x1xf32>
    %250 = math.rsqrt %249 : vector<16x1xf32>
    %251 = vector.broadcast %250 : vector<16x1xf32> to vector<16x32xf32>
    %252 = arith.mulf %247, %251 : vector<16x32xf32>
    %253 = vector.broadcast %233 : vector<1x32xf32> to vector<16x32xf32>
    %254 = arith.mulf %252, %253 : vector<16x32xf32>
    %255 = vector.broadcast %234 : vector<1x32xf32> to vector<16x32xf32>
    %256 = arith.addf %254, %255 : vector<16x32xf32>
    %257 = vector.shape_cast %256 : vector<16x32xf32> to vector<2x8x32xf32>
    %258 = vector.broadcast %10 : vector<2x8x1xf32> to vector<2x8x32xf32>
    %259 = arith.mulf %257, %258 : vector<2x8x32xf32>
    %cst_132 = arith.constant dense<0.000000e+00> : vector<2x32xf32>
    %260 = vector.multi_reduction <add>, %259, %cst_132 [1] : vector<2x8x32xf32> to vector<2x32xf32>
    %cst_133 = arith.constant dense<0.000000e+00> : vector<2x1xf32>
    %261 = vector.multi_reduction <add>, %10, %cst_133 [1] : vector<2x8x1xf32> to vector<2x1xf32>
    %cst_134 = arith.constant 9.99999997E-7 : f32
    %262 = vector.broadcast %cst_134 : f32 to vector<2x1xf32>
    %263 = arith.maximumf %261, %262 : vector<2x1xf32>
    %264 = vector.broadcast %263 : vector<2x1xf32> to vector<2x32xf32>
    %265 = arith.divf %260, %264 : vector<2x32xf32>
    %c0_135 = arith.constant 0 : index
    %c0_136 = arith.constant 0 : index
    %266 = vector.load %arg20[%c0_135, %c0_136] : memref<32x32xf32, #tpu.memory_space<vmem>>, vector<32x32xf32>
    %cst_137 = arith.constant dense<0.000000e+00> : vector<2x32xf32>
    %267 = tpu.matmul %265, %266, %cst_137 {dimension_numbers = #tpu.dot_dimension_numbers<[1], [0], [0], [1], [0, 0, 1, 1], [], []>} : vector<2x32xf32>, vector<32x32xf32>, vector<2x32xf32> -> vector<2x32xf32>
    %c0_138 = arith.constant 0 : index
    %c0_139 = arith.constant 0 : index
    %268 = vector.load %arg21[%c0_138, %c0_139] : memref<1x32xf32, #tpu.memory_space<vmem>>, vector<1x32xf32>
    %269 = vector.broadcast %268 : vector<1x32xf32> to vector<2x32xf32>
    %270 = arith.addf %267, %269 : vector<2x32xf32>
    %cst_140 = arith.constant 0.000000e+00 : f32
    %271 = vector.broadcast %cst_140 : f32 to vector<2x32xf32>
    %272 = arith.maximumf %270, %271 : vector<2x32xf32>
    %c0_141 = arith.constant 0 : index
    %c0_142 = arith.constant 0 : index
    %273 = vector.load %arg22[%c0_141, %c0_142] : memref<32x32xf32, #tpu.memory_space<vmem>>, vector<32x32xf32>
    %cst_143 = arith.constant dense<0.000000e+00> : vector<2x32xf32>
    %274 = tpu.matmul %272, %273, %cst_143 {dimension_numbers = #tpu.dot_dimension_numbers<[1], [0], [0], [1], [0, 0, 1, 1], [], []>} : vector<2x32xf32>, vector<32x32xf32>, vector<2x32xf32> -> vector<2x32xf32>
    %c0_144 = arith.constant 0 : index
    %c0_145 = arith.constant 0 : index
    %275 = vector.load %arg23[%c0_144, %c0_145] : memref<1x32xf32, #tpu.memory_space<vmem>>, vector<1x32xf32>
    %276 = vector.broadcast %275 : vector<1x32xf32> to vector<2x32xf32>
    %277 = arith.addf %274, %276 : vector<2x32xf32>
    %c0_146 = arith.constant 0 : index
    %c0_147 = arith.constant 0 : index
    %278 = vector.load %arg24[%c0_146, %c0_147] : memref<2x32xf32, #tpu.memory_space<vmem>>, vector<2x32xf32>
    tpu.vector_store %arg24[%c0_146, %c0_147], %277 {strides = array<i32>} : memref<2x32xf32, #tpu.memory_space<vmem>>, vector<2x32xf32>,
    return
  }
}

</mosaic_0001>

<bundles_post_ra>
// kernel: text_learnable_encoder.1
= control target key start
LH: loop header
LB: loop body
LE: loop exit
PB: predicated region body
PF: predicated region fallthrough
CT: control target
= control target key end

     0   :  { %s5637_s0 = inlined_call_operand.vmem [shape: f32[2,8,32], index: 0, kind: input, shape index: {}]   ;;  %s5638_s1 = inlined_call_operand.vmem [shape: f32[2,8,1], index: 1, kind: input, shape index: {}]   ;;  %s5639_s2 = inlined_call_operand.vmem [shape: f32[32,4], index: 2, kind: input, shape index: {}]   ;;  %s5640_s3 = inlined_call_operand.vmem [shape: f32[4,32], index: 3, kind: input, shape index: {}]   ;;  %s5641_s4 = inlined_call_operand.vmem [shape: f32[2,32,32], index: 4, kind: input, shape index: {}]   ;;  %s5642_s5 = inlined_call_operand.vmem [shape: f32[2,32], index: 5, kind: input, shape index: {}]   ;;  %s5643_s6 = inlined_call_operand.vmem [shape: f32[2,32,32], index: 6, kind: input, shape index: {}]   ;;  %s5644_s7 = inlined_call_operand.vmem [shape: f32[2,32], index: 7, kind: input, shape index: {}]   ;;  %s5645_s8 = inlined_call_operand.vmem [shape: f32[2,32,32], index: 8, kind: input, shape index: {}]   ;;  %s5646_s9 = inlined_call_operand.vmem [shape: f32[2,32], index: 9, kind: input, shape index: {}]   ;;  %s5647_s10 = inlined_call_operand.vmem [shape: f32[2,32,32], index: 10, kind: input, shape index: {}]   ;;  %s5648_s11 = inlined_call_operand.vmem [shape: f32[2,32], index: 11, kind: input, shape index: {}]   ;;  %s5649_s12 = inlined_call_operand.vmem [shape: f32[2,32], index: 12, kind: input, shape index: {}]   ;;  %s5650_s13 = inlined_call_operand.vmem [shape: f32[2,32], index: 13, kind: input, shape index: {}]   ;;  %s5651_s14 = inlined_call_operand.vmem [shape: f32[2,32,64], index: 14, kind: input, shape index: {}]   ;;  %s5652_s15 = inlined_call_operand.vmem [shape: f32[2,64], index: 15, kind: input, shape index: {}]   ;;  %s5653_s16 = inlined_call_operand.vmem [shape: f32[2,64,32], index: 16, kind: input, shape index: {}]   ;;  %s5654_s17 = inlined_call_operand.vmem [shape: f32[2,32], index: 17, kind: input, shape index: {}]   ;;  %s5655_s18 = inlined_call_operand.vmem [shape: f32[2,32], index: 18, kind: input, shape index: {}]   ;;  %s5656_s19 = inlined_call_operand.vmem [shape: f32[2,32], index: 19, kind: input, shape index: {}]   ;;  %s5657_s20 = inlined_call_operand.vmem [shape: f32[32,32], index: 20, kind: input, shape index: {}]   ;;  %s5658_s21 = inlined_call_operand.vmem [shape: f32[1,32], index: 21, kind: input, shape index: {}]   ;;  %s5659_s22 = inlined_call_operand.vmem [shape: f32[32,32], index: 22, kind: input, shape index: {}]   ;;  %s5660_s23 = inlined_call_operand.vmem [shape: f32[1,32], index: 23, kind: input, shape index: {}]   ;;  %s5661_s24 = inlined_call_operand.hbm [shape: f32[2,32], index: 24, kind: output, shape index: {}]  }
   0x1   :  { %5671 = sst [smem:[#allocation5_spill]] %s5637_s0 }
   0x2   :  { %5672 = sst [smem:[#allocation6_spill]] %s5638_s1 }
   0x3   :  { %5673 = sst [smem:[#allocation7_spill]] %s5639_s2 }
   0x4   :  { %5674 = sst [smem:[#allocation8_spill]] %s5640_s3 }
   0x5   :  { %5675 = sst [smem:[#allocation9_spill]] %s5641_s4 }
   0x6   :  { %5676 = sst [smem:[#allocation10_spill]] %s5642_s5 }
   0x7   :  { %5677 = sst [smem:[#allocation11_spill]] %s5643_s6 }
   0x8   :  { %5678 = sst [smem:[#allocation12_spill]] %s5644_s7 }
   0x9   :  { %5679 = sst [smem:[#allocation13_spill]] %s5645_s8 }
   0xa   :  { %5680 = sst [smem:[#allocation14_spill]] %s5658_s21 }
   0xb   :  { %5681 = sst [smem:[#allocation15_spill]] %s5660_s23 }
   0xc   :  { %5682 = sst [smem:[#allocation16_spill]] %s5661_s24 }
   0xd   :  { %s5683_s27 = sld [smem:[#allocation5_spill]]  ;;  %vm82_vm0 = vcmask 261120  }
  0x13   :  { %v78_v0 = vld [vmem:[%s5683_s27] sm:$0xff]  ;;  %v79_v1 = vld [vmem:[%s5683_s27 + $0x8] sm:$0xff] }
  0x14   :  { %29 = vsyncpa [#allocation3], 0  ;;  %v80_v2 = vmul.f32 %v78_v0, %v78_v0  ;;  %v81_v3 = vmul.f32 %v79_v1, %v79_v1  ;;  %s5684_s0 = sld [smem:[#allocation9_spill]]  ;;  %v4528_v32 = vmov 0   ;;  %v4529_v33 = vmov -1e+30  }
  0x15   :  { %s5685_s3 = sld [smem:[#allocation11_spill]]  ;;  %4345 = vset.pattern.permute.xlu1 %v4528_v32  ;;  %4346 = vset.pattern.permute.xlu0 %v4528_v32  ;;  %v4530_v36 = vmov 1966171168   ;;  %v370_v38 = vlaneseq  ;;  %vm1132_vm3 = vcmask 1043456   ;;  %vm779_vm4 = vcmask 31744  }
  0x16   :  { %v83_v4 = vsel %vm82_vm0, %v80_v2, 0.0  ;;  %v86_v5 = vsel %vm82_vm0, %v81_v3, 0.0  ;;  %s5686_s8 = sld [smem:[#allocation13_spill]]  ;;  %v368_v37 = vunpack.c.l.s4 %v4530_v36  ;;  %vm1434_vm5 = vcmask 1041409  }
  0x17   :  { %84 = vadd.xlane.f32.xlu0 %v83_v4  ;;  %s5687_s29 = sld [smem:[#allocation7_spill]]  ;;  %v371_v41 = vshrl.u32 %v370_v38, 7  ;;  %vm1436_vm6 = vcmask 1042434   ;;  %vm1438_vm7 = vcmask 1043459   ;;  %vm1440_vm8 = vcmask 1044484  }
  0x18   :  { %s5688_s28 = sld [smem:[#allocation6_spill]]  ;;  %v369_v40 = vunpack.c.0.s8 %v368_v37  ;;  %vm1442_vm9 = vcmask 1045509   ;;  %vm1444_vm10 = vcmask 1046534   ;;  %vm1446_vm11 = vcmask 1047559  }
  0x19   :  { %s5689_s25 = sld [smem:[#allocation10_spill]]  ;;  %v4745_v52 = vsub.s32 0, %v371_v41  ;;  %vm1685_vm12 = vcmask 523264   ;;  %vm3529_vm13 = vcmask 7168   ;;  %vm4532_vm14 = vmmov 0  }
  0x1a   :  { %v109_v6 = vld [vmem:[%s5684_s0 + $0x18] sm:$0xff]  ;;  %v108_v8 = vld [vmem:[%s5684_s0 + $0x10] sm:$0xff]  ;;  %v107_v10 = vld [vmem:[%s5684_s0 + $0x8] sm:$0xff]  ;;  %v4740_v45 = vsub.s32 %v369_v40, %v371_v41  ;;  %s5690_s5 = sld [smem:[#allocation12_spill]]  ;;  %vm3731_vm15 = vcmask 254976  }
  0x1b   :  { %87 = vadd.xlane.f32.xlu0 %v86_v5  ;;  %v199_v7 = vld [vmem:[%s5685_s3 + $0x18] sm:$0xff]  ;;  %4053 = vmatprep.subr.mxu0 %v109_v6  ;;  %v198_v9 = vld [vmem:[%s5685_s3 + $0x10] sm:$0xff]  ;;  %v197_v11 = vld [vmem:[%s5685_s3 + $0x8] sm:$0xff]  ;;  %s5691_s6 = sld [smem:[#allocation8_spill]] }
  0x1c   :  { %4064 = vmatprep.subr.mxu1 %v199_v7  ;;  %4054 = vmatpush3.msra.mxu0 %v109_v6  ;;  %v106_v12 = vld [vmem:[%s5684_s0] sm:$0xff]  ;;  %v283_v14 = vld [vmem:[%s5686_s8 + $0x18] sm:$0xff]  ;;  %v282_v23 = vld [vmem:[%s5686_s8 + $0x10] sm:$0xff]  ;;  %s5692_s26 = sld [smem:[#allocation14_spill]] }
  0x1d   :  { %4065 = vmatpush3.msra.mxu1 %v199_v7  ;;  %4055 = vmatprep.subr.mxu0 %v108_v8  ;;  %v196_v13 = vld [vmem:[%s5685_s3] sm:$0xff]  ;;  %v281_v24 = vld [vmem:[%s5686_s8 + $0x8] sm:$0xff]  ;;  %v104_v26 = vld [vmem:[%s5687_s29 + $0x18] sm:$0xff] }
  0x1e   :  { %4066 = vmatprep.subr.mxu1 %v198_v9  ;;  %4056 = vmatpush3.msra.mxu0 %v108_v8  ;;  %v280_v25 = vld [vmem:[%s5686_s8] sm:$0xff]  ;;  %v103_v27 = vld [vmem:[%s5687_s29 + $0x10] sm:$0xff]  ;;  %v102_v28 = vld [vmem:[%s5687_s29 + $0x8] sm:$0xff] }
  0x1f   :  { %4067 = vmatpush3.msra.mxu1 %v198_v9  ;;  %4057 = vmatprep.subr.mxu0 %v107_v10  ;;  %v101_v29 = vld [vmem:[%s5687_s29] sm:$0xff]  ;;  %v96_v31 = vld [vmem:[%s5688_s28 + $0x8] sm:$0xff] }
  0x20   :  { %4058 = vmatpush3.msra.mxu0 %v107_v10  ;;  %4068 = vmatprep.subr.mxu1 %v197_v11  ;;  %v95_v30 = vld [vmem:[%s5688_s28] sm:$0xff]  ;;  %vm98_vm2 = vcmp.gt.f32.partialorder %v96_v31, 0.5 }
  0x21   :  { %4059 = vmatprep.subr.mxu0 %v106_v12  ;;  %4069 = vmatpush3.msra.mxu1 %v197_v11  ;;  %vm97_vm1 = vcmp.gt.f32.partialorder %v95_v30, 0.5  ;;  %v100_v35 = vsel %vm98_vm2, 0.0, %v4529_v33  ;;  %v3747_v42 = vld [vmem:[%s5689_s25] ss:$0 sm:$0xff] }
  0x22   :  { %4060 = vmatpush3.msra.mxu0 %v106_v12  ;;  %4070 = vmatprep.subr.mxu1 %v196_v13  ;;  %v99_v34 = vsel %vm97_vm1, 0.0, %v4529_v33  ;;  %v3750_v55 = vld [vmem:[%s5690_s5] ss:$0 sm:$0xff] }
  0x23   :  { %4071 = vmatpush3.msra.mxu1 %v196_v13  ;;  %4075 = vmatprep.subr.mxu0 %v283_v14 }
  0x24   :  { %4086 = vmatprep.subr.mxu1 %v104_v26  ;;  %755 = vperm.xlu1 %4345, %v99_v34  }
  0x28   :  { %760 = vperm.xlu1 %4345, %v100_v35  }
  0xa0   :  { %v85_v15 = vpop.xlane.xlu0 %84 }
  0xa1   :  { %v89_v16 = vmax.f32 %v85_v15, 1e-24 }
  0xa3   :  { %4347 = vrsqrt.f32 %v89_v16 }
  0xa4   :  { %v88_v17 = vpop.xlane.xlu0 %87 }
  0xa5   :  { %v90_v18 = vmax.f32 %v88_v17, 1e-24 }
  0xa7   :  { %4349 = vrsqrt.f32 %v90_v18 }
  0xb0   :  { %v4348_v19 = vpop.eup %4347 }
  0xb1   :  { %v4694_v20 = vmul.f32 %v4348_v19, %v78_v0 }
  0xb3   :  { %4061 = vmatprep.mubr.msk.f32.mxu0 %vm82_vm0, %v4694_v20  ;;  %4072 = vmatprep.mubr.msk.f32.mxu1 %vm82_vm0, %v4694_v20 }
  0xb4   :  { %v4350_v21 = vpop.eup %4349 }
  0xb5   :  { %v4700_v22 = vmul.f32 %v4350_v21, %v79_v1 }
  0xb7   :  { %4062 = vmatmul.mubr.msk.f32.vlgmr.msra.gmra.mxu0 %vm82_vm0, %v4700_v22  ;;  %4073 = vmatmul.mubr.msk.f32.vlgmr.msra.gmra.mxu1 %vm82_vm0, %v4700_v22 }
  0xb8   :  { %4076 = vmatpush3.msra.mxu0 %v283_v14  ;;  %4083 = vmatprep.mubr.msk.f32.mxu0 %vm82_vm0, %v4694_v20 }
  0xb9   :  { %4077 = vmatprep.subr.mxu0 %v282_v23  ;;  %4087 = vmatpush3.msra.mxu1 %v104_v26 }
  0xba   :  { %4078 = vmatpush3.msra.mxu0 %v282_v23  ;;  %4088 = vmatprep.subr.mxu1 %v103_v27 }
  0xbb   :  { %4079 = vmatprep.subr.mxu0 %v281_v24  ;;  %4089 = vmatpush3.msra.mxu1 %v103_v27 }
  0xbc   :  { %4080 = vmatpush3.msra.mxu0 %v281_v24  ;;  %4090 = vmatprep.subr.mxu1 %v102_v28 }
  0xbd   :  { %4081 = vmatprep.subr.mxu0 %v280_v25  ;;  %4091 = vmatpush3.msra.mxu1 %v102_v28 }
  0xbe   :  { %4082 = vmatpush3.msra.mxu0 %v280_v25  ;;  %4092 = vmatprep.subr.mxu1 %v101_v29 }
  0xbf   :  { %4084 = vmatmul.mubr.msk.f32.vlgmr.msra.gmra.mxu0 %vm82_vm0, %v4700_v22  ;;  %4093 = vmatpush3.msra.mxu1 %v101_v29 }
 0x177   :  { %v4063_v39 = vpop.f32.mrf.mxu0  ;;  %v4074_v46 = vpop.f32.mrf.mxu1 }
 0x178   :  { %v193_v54 = vadd.f32 %v4063_v39, %v3747_v42  ;;  %v277_v26 = vadd.f32 %v4074_v46, %v3750_v55 }
 0x179   :  { %v187_v43 = vpop.f32.mrf.mxu0  ;;  %v271_v53 = vpop.f32.mrf.mxu1 }
 0x17a   :  { %v188_v44 = vadd.f32 %v3747_v42, %v187_v43  ;;  %v272_v61 = vadd.f32 %v3750_v55, %v271_v53  ;;  %v422_v1 = vrot.slane %v193_v54, %v4740_v45  ;;  %v415_v9 = vcombine.high %v193_v54, %v193_v54 }
 0x17c   :  { %v366_v47 = vcombine.high %v188_v44, %v188_v44  ;;  %v373_v48 = vrot.slane %v188_v44, %v4740_v45  ;;  %v430_v10 = vcombine.high %v422_v1, %v422_v1  ;;  %v438_v14 = vrot.slane %v422_v1, %v4740_v45 }
 0x17d   :  { %v429_v17 = vrot.slane %v415_v9, %v4740_v45 }
 0x17e   :  { %v380_v49 = vrot.slane %v366_v47, %v4740_v45  ;;  %v381_v50 = vcombine.high %v373_v48, %v373_v48  ;;  %v389_v51 = vrot.slane %v373_v48, %v4740_v45  ;;  %v452_v18 = vrot.slane %v430_v10, %v4740_v45 }
 0x17f   :  { %v460_v23 = vcombine.high %v438_v14, %v438_v14  ;;  %v499_v24 = vrot.slane %v438_v14, %v4745_v52  ;;  %v431_v27 = vcombine.high %v429_v17, %v429_v17  ;;  %v445_v31 = vrot.slane %v429_v17, %v4740_v45 }
 0x180   :  { %v382_v56 = vcombine.high %v380_v49, %v380_v49  ;;  %v403_v57 = vrot.slane %v381_v50, %v4740_v45  ;;  %v411_v58 = vcombine.high %v389_v51, %v389_v51  ;;  %v467_v59 = vrot.slane %v389_v51, %v4745_v52  ;;  %v105_v50 = vld [vmem:[%s5691_s6] sm:$0xf]  ;;  %v4796_v51 = vpop.permute.xlu1 %755 }
 0x181   :  { %v396_v60 = vrot.slane %v380_v49, %v4740_v45  ;;  %v462_v28 = vcombine.high %v452_v18, %v452_v18  ;;  %v503_v29 = vrot.slane %v452_v18, %v4745_v52  ;;  %v507_v32 = vrot.slane %v460_v23, %v4745_v52  ;;  %4118 = vmatprep.subr.msk.mxu0 %vm1132_vm3, %v105_v50 }
 0x182   :  { %v413_v62 = vcombine.high %v403_v57, %v403_v57  ;;  %v471_v63 = vrot.slane %v403_v57, %v4745_v52  ;;  %v475_v0 = vrot.slane %v411_v58, %v4745_v52  ;;  %v544_v2 = vmul.f32 %v467_v59, %v272_v61  ;;  %4119 = vmatpush3.msk.msra.mxu0 %vm1132_vm3, %v105_v50 }
 0x183   :  { %v410_v3 = vrot.slane %v382_v56, %v4740_v45  ;;  %v412_v7 = vcombine.high %v396_v60, %v396_v60  ;;  %v483_v8 = vrot.slane %v396_v60, %v4745_v52  ;;  %v552_v33 = vmul.f32 %v499_v24, %v277_v26 }
 0x184   :  { %v545_v4 = vmul.f32 %v471_v63, %v272_v61  ;;  %v546_v5 = vmul.f32 %v475_v0, %v272_v61  ;;  %v479_v6 = vrot.slane %v413_v62, %v4745_v52  ;;  %4094 = vmatprep.mubr.msk.f32.mxu1 %vm82_vm0, %v544_v2  ;;  %v459_v34 = vrot.slane %v431_v27, %v4740_v45 }
 0x185   :  { %v414_v11 = vcombine.high %v410_v3, %v410_v3  ;;  %v487_v13 = vrot.slane %v410_v3, %v4745_v52  ;;  %v548_v15 = vmul.f32 %v483_v8, %v272_v61  ;;  %v491_v16 = vrot.slane %v412_v7, %v4745_v52 }
 0x186   :  { %4095 = vmatmul.mubr.msk.f32.vlgmr.msra.gmra.mxu1 %vm82_vm0, %v545_v4  ;;  %v547_v12 = vmul.f32 %v479_v6, %v272_v61  ;;  %v553_v35 = vmul.f32 %v503_v29, %v277_v26  ;;  %v511_v36 = vrot.slane %v462_v28, %v4745_v52  ;;  %v461_v37 = vcombine.high %v445_v31, %v445_v31 }
 0x187   :  { %4097 = vmatprep.mubr.msk.f32.mxu1 %vm82_vm0, %v546_v5  ;;  %v549_v19 = vmul.f32 %v487_v13, %v272_v61  ;;  %v495_v21 = vrot.slane %v414_v11, %v4745_v52  ;;  %v550_v25 = vmul.f32 %v491_v16, %v272_v61  ;;  %v515_v38 = vrot.slane %v445_v31, %v4745_v52 }
 0x188   :  { %v554_v39 = vmul.f32 %v507_v32, %v277_v26  ;;  %v463_v40 = vcombine.high %v459_v34, %v459_v34  ;;  %v555_v41 = vmul.f32 %v511_v36, %v277_v26  ;;  %v519_v42 = vrot.slane %v459_v34, %v4745_v52 }
 0x189   :  { %v551_v30 = vmul.f32 %v495_v21, %v272_v61  ;;  %v556_v43 = vmul.f32 %v515_v38, %v277_v26  ;;  %v523_v44 = vrot.slane %v461_v37, %v4745_v52 }
 0x18a   :  { %4098 = vmatmul.mubr.msk.f32.gmra.mxu1 %vm82_vm0, %v547_v12  ;;  %v557_v46 = vmul.f32 %v519_v42, %v277_v26  ;;  %v527_v47 = vrot.slane %v463_v40, %v4745_v52 }
 0x18b   :  { %4100 = vmatprep.mubr.msk.f32.mxu1 %vm82_vm0, %v548_v15  ;;  %v558_v48 = vmul.f32 %v523_v44, %v277_v26 }
 0x18c   :  { %v559_v49 = vmul.f32 %v527_v47, %v277_v26 }
 0x18e   :  { %4101 = vmatmul.mubr.msk.f32.gmra.mxu1 %vm82_vm0, %v549_v19 }
 0x18f   :  { %4103 = vmatprep.mubr.msk.f32.mxu1 %vm82_vm0, %v550_v25 }
 0x192   :  { %4104 = vmatmul.mubr.msk.f32.gmra.mxu1 %vm82_vm0, %v551_v30 }
 0x193   :  { %4106 = vmatprep.mubr.msk.f32.mxu1 %vm82_vm0, %v552_v33 }
 0x196   :  { %4107 = vmatmul.mubr.msk.f32.gmra.mxu1 %vm82_vm0, %v553_v35 }
 0x197   :  { %4109 = vmatprep.mubr.msk.f32.mxu1 %vm82_vm0, %v554_v39 }
 0x19a   :  { %4110 = vmatmul.mubr.msk.f32.gmra.mxu1 %vm82_vm0, %v555_v41 }
 0x19b   :  { %4112 = vmatprep.mubr.msk.f32.mxu1 %vm82_vm0, %v556_v43 }
 0x19e   :  { %4113 = vmatmul.mubr.msk.f32.gmra.mxu1 %vm82_vm0, %v557_v46 }
 0x19f   :  { %4115 = vmatprep.mubr.msk.f32.mxu1 %vm82_vm0, %v558_v48 }
 0x1a2   :  { %4116 = vmatmul.mubr.msk.f32.gmra.mxu1 %vm82_vm0, %v559_v49 }
 0x246   :  { %v4096_v53 = vpop.f32.mrf.mxu1 }
 0x247   :  { %v764_v54 = vadd.f32 %v4096_v53, %v4796_v51 }
 0x248   :  { %v674_v55 = vpop.f32.mrf.mxu1 }
 0x249   :  { %v787_v56 = vsel %vm779_vm4, %v764_v54, -inf  ;;  %v763_v57 = vadd.f32 %v4796_v51, %v674_v55 }
 0x24a   :  { %v788_v58 = vrot.slane %v787_v56, 4  ;;  %v4099_v59 = vpop.f32.mrf.mxu1 }
 0x24b   :  { %v780_v60 = vsel %vm779_vm4, %v763_v57, -inf  ;;  %v4803_v61 = vadd.f32 %v4099_v59, %v4796_v51 }
 0x24c   :  { %v789_v62 = vmax.f32 %v787_v56, %v788_v58  ;;  %v781_v63 = vrot.slane %v780_v60, 4  ;;  %v684_v0 = vpop.f32.mrf.mxu1 }
 0x24d   :  { %v801_v1 = vsel %vm779_vm4, %v4803_v61, -inf  ;;  %v4808_v2 = vadd.f32 %v4796_v51, %v684_v0 }
 0x24e   :  { %v790_v3 = vrot.slane %v789_v62, 2  ;;  %v782_v4 = vmax.f32 %v780_v60, %v781_v63  ;;  %v802_v5 = vrot.slane %v801_v1, 4  ;;  %v4102_v6 = vpop.f32.mrf.mxu1  ;;  %v4833_v60 = vpop.permute.xlu1 %760 }
 0x24f   :  { %v794_v7 = vsel %vm779_vm4, %v4808_v2, -inf  ;;  %v4813_v8 = vadd.f32 %v4102_v6, %v4796_v51 }
 0x250   :  { %v791_v9 = vmax.f32 %v789_v62, %v790_v3  ;;  %v783_v10 = vrot.slane %v782_v4, 2  ;;  %v803_v11 = vmax.f32 %v801_v1, %v802_v5  ;;  %v795_v12 = vrot.slane %v794_v7, 4  ;;  %v694_v13 = vpop.f32.mrf.mxu1 }
 0x251   :  { %v815_v14 = vsel %vm779_vm4, %v4813_v8, -inf  ;;  %v4818_v15 = vadd.f32 %v4796_v51, %v694_v13 }
 0x252   :  { %v792_v16 = vrot.slane %v791_v9, 1  ;;  %v784_v17 = vmax.f32 %v782_v4, %v783_v10  ;;  %v804_v18 = vrot.slane %v803_v11, 2  ;;  %v796_v19 = vmax.f32 %v794_v7, %v795_v12  ;;  %v4105_v21 = vpop.f32.mrf.mxu1 }
 0x253   :  { %v816_v23 = vrot.slane %v815_v14, 4  ;;  %v808_v24 = vsel %vm779_vm4, %v4818_v15, -inf  ;;  %v4823_v25 = vadd.f32 %v4105_v21, %v4796_v51 }
 0x254   :  { %v793_v26 = vmax.f32 %v791_v9, %v792_v16  ;;  %v785_v27 = vrot.slane %v784_v17, 1  ;;  %v805_v28 = vmax.f32 %v803_v11, %v804_v18  ;;  %v797_v29 = vrot.slane %v796_v19, 2  ;;  %v704_v30 = vpop.f32.mrf.mxu1 }
 0x255   :  { %v817_v31 = vmax.f32 %v815_v14, %v816_v23  ;;  %v809_v32 = vrot.slane %v808_v24, 4  ;;  %v829_v33 = vsel %vm779_vm4, %v4823_v25, -inf  ;;  %v4828_v34 = vadd.f32 %v4796_v51, %v704_v30 }
 0x256   :  { %v893_v35 = vsub.f32 %v764_v54, %v793_v26  ;;  %v786_v36 = vmax.f32 %v784_v17, %v785_v27  ;;  %v806_v37 = vrot.slane %v805_v28, 1  ;;  %v798_v38 = vmax.f32 %v796_v19, %v797_v29  ;;  %v4108_v39 = vpop.f32.mrf.mxu1 }
 0x257   :  { %v818_v40 = vrot.slane %v817_v31, 2  ;;  %v810_v41 = vmax.f32 %v808_v24, %v809_v32  ;;  %v830_v42 = vrot.slane %v829_v33, 4  ;;  %v822_v43 = vsel %vm779_vm4, %v4828_v34, -inf }
 0x258   :  { %v910_v44 = vmul.f32 1.442695, %v893_v35  ;;  %v892_v46 = vsub.f32 %v763_v57, %v786_v36  ;;  %v807_v47 = vmax.f32 %v805_v28, %v806_v37  ;;  %v799_v48 = vrot.slane %v798_v38, 1  ;;  %v714_v49 = vpop.f32.mrf.mxu1 }
 0x259   :  { %v819_v50 = vmax.f32 %v817_v31, %v818_v40  ;;  %v811_v53 = vrot.slane %v810_v41, 2  ;;  %v831_v55 = vmax.f32 %v829_v33, %v830_v42  ;;  %v823_v56 = vrot.slane %v822_v43, 4 }
 0x25a   :  { %4351 = vpow2.f32 %v910_v44  ;;  %v908_v54 = vmul.f32 1.442695, %v892_v46  ;;  %v895_v58 = vsub.f32 %v4803_v61, %v807_v47  ;;  %v800_v59 = vmax.f32 %v798_v38, %v799_v48  ;;  %v4111_v3 = vpop.f32.mrf.mxu1 }
 0x25b   :  { %v820_v62 = vrot.slane %v819_v50, 1  ;;  %v812_v63 = vmax.f32 %v810_v41, %v811_v53  ;;  %v832_v0 = vrot.slane %v831_v55, 2  ;;  %v824_v1 = vmax.f32 %v822_v43, %v823_v56 }
 0x25c   :  { %4353 = vpow2.f32 %v908_v54  ;;  %v914_v57 = vmul.f32 1.442695, %v895_v58  ;;  %v894_v4 = vsub.f32 %v4808_v2, %v800_v59  ;;  %v4837_v5 = vadd.f32 %v4108_v39, %v4833_v60  ;;  %v724_v17 = vpop.f32.mrf.mxu1 }
 0x25d   :  { %v821_v6 = vmax.f32 %v819_v50, %v820_v62  ;;  %v813_v7 = vrot.slane %v812_v63, 1  ;;  %v833_v9 = vmax.f32 %v831_v55, %v832_v0  ;;  %v825_v10 = vrot.slane %v824_v1, 2 }
 0x25e   :  { %4355 = vpow2.f32 %v914_v57  ;;  %v912_v61 = vmul.f32 1.442695, %v894_v4  ;;  %v843_v11 = vsel %vm779_vm4, %v4837_v5, -inf  ;;  %v4842_v12 = vadd.f32 %v4833_v60, %v714_v49  ;;  %v4114_v38 = vpop.f32.mrf.mxu1 }
 0x25f   :  { %v897_v13 = vsub.f32 %v4813_v8, %v821_v6  ;;  %v814_v14 = vmax.f32 %v812_v63, %v813_v7  ;;  %v834_v16 = vrot.slane %v833_v9, 1  ;;  %v826_v2 = vmax.f32 %v824_v1, %v825_v10 }
 0x260   :  { %4357 = vpow2.f32 %v912_v61  ;;  %v844_v18 = vrot.slane %v843_v11, 4  ;;  %v836_v19 = vsel %vm779_vm4, %v4842_v12, -inf  ;;  %v4848_v21 = vadd.f32 %v4111_v3, %v4833_v60 }
 0x261   :  { %v918_v23 = vmul.f32 1.442695, %v897_v13  ;;  %v896_v24 = vsub.f32 %v4818_v15, %v814_v14  ;;  %v835_v26 = vmax.f32 %v833_v9, %v834_v16  ;;  %v827_v27 = vrot.slane %v826_v2, 1 }
 0x262   :  { %v845_v28 = vmax.f32 %v843_v11, %v844_v18  ;;  %v837_v29 = vrot.slane %v836_v19, 4  ;;  %v857_v8 = vsel %vm779_vm4, %v4848_v21, -inf  ;;  %v4854_v30 = vadd.f32 %v4833_v60, %v724_v17 }
 0x263   :  { %4359 = vpow2.f32 %v918_v23  ;;  %v916_v31 = vmul.f32 1.442695, %v896_v24  ;;  %v899_v32 = vsub.f32 %v4823_v25, %v835_v26  ;;  %v828_v33 = vmax.f32 %v826_v2, %v827_v27 }
 0x264   :  { %v846_v35 = vrot.slane %v845_v28, 2  ;;  %v838_v36 = vmax.f32 %v836_v19, %v837_v29  ;;  %v858_v37 = vrot.slane %v857_v8, 4  ;;  %v850_v15 = vsel %vm779_vm4, %v4854_v30, -inf }
 0x265   :  { %4361 = vpow2.f32 %v916_v31  ;;  %v922_v39 = vmul.f32 1.442695, %v899_v32  ;;  %v898_v40 = vsub.f32 %v4828_v34, %v828_v33  ;;  %v851_v41 = vrot.slane %v850_v15, 4 }
 0x266   :  { %v847_v42 = vmax.f32 %v845_v28, %v846_v35  ;;  %v839_v43 = vrot.slane %v838_v36, 2  ;;  %v859_v44 = vmax.f32 %v857_v8, %v858_v37  ;;  %v4863_v48 = vadd.f32 %v4114_v38, %v4833_v60 }
 0x267   :  { %v4860_v46 = vpop.eup %4351  ;;  %4363 = vpow2.f32 %v922_v39  ;;  %v920_v25 = vmul.f32 1.442695, %v898_v40  ;;  %v852_v47 = vmax.f32 %v850_v15, %v851_v41 }
 0x268   :  { %v947_v49 = vsel %vm779_vm4, %v4860_v46, 0.0  ;;  %v848_v50 = vrot.slane %v847_v42, 1  ;;  %v840_v53 = vmax.f32 %v838_v36, %v839_v43  ;;  %v860_v55 = vrot.slane %v859_v44, 2 }
 0x269   :  { %v4867_v56 = vpop.eup %4353  ;;  %v948_v34 = vrot.slane %v947_v49, 4  ;;  %4365 = vpow2.f32 %v920_v25  ;;  %v853_v54 = vrot.slane %v852_v47, 2  ;;  %v871_v4 = vsel %vm779_vm4, %v4863_v48, -inf }
 0x26a   :  { %v940_v58 = vsel %vm779_vm4, %v4867_v56, 0.0  ;;  %v849_v59 = vmax.f32 %v847_v42, %v848_v50  ;;  %v841_v62 = vrot.slane %v840_v53, 1  ;;  %v861_v63 = vmax.f32 %v859_v44, %v860_v55 }
 0x26b   :  { %v4871_v0 = vpop.eup %4355  ;;  %v949_v1 = vadd.f32 %v948_v34, %v947_v49  ;;  %v941_v3 = vrot.slane %v940_v58, 4  ;;  %v854_v57 = vmax.f32 %v852_v47, %v853_v54  ;;  %v872_v27 = vrot.slane %v871_v4, 4 }
 0x26c   :  { %v961_v6 = vsel %vm779_vm4, %v4871_v0, 0.0  ;;  %v901_v7 = vsub.f32 %v4837_v5, %v849_v59  ;;  %v842_v9 = vmax.f32 %v840_v53, %v841_v62  ;;  %v862_v10 = vrot.slane %v861_v63, 1  ;;  %v734_v5 = vpop.f32.mrf.mxu1 }
 0x26d   :  { %v4878_v61 = vpop.eup %4357  ;;  %v950_v11 = vrot.slane %v949_v1, 2  ;;  %v942_v13 = vadd.f32 %v941_v3, %v940_v58  ;;  %v962_v14 = vrot.slane %v961_v6, 4  ;;  %v855_v16 = vrot.slane %v854_v57, 1 }
 0x26e   :  { %v954_v2 = vsel %vm779_vm4, %v4878_v61, 0.0  ;;  %v926_v17 = vmul.f32 1.442695, %v901_v7  ;;  %v900_v18 = vsub.f32 %v4842_v12, %v842_v9  ;;  %v863_v19 = vmax.f32 %v861_v63, %v862_v10  ;;  %v4117_v41 = vpop.f32.mrf.mxu1 }
 0x26f   :  { %v951_v23 = vadd.f32 %v950_v11, %v949_v1  ;;  %v963_v24 = vadd.f32 %v962_v14, %v961_v6  ;;  %v955_v26 = vrot.slane %v954_v2, 4  ;;  %v856_v31 = vmax.f32 %v854_v57, %v855_v16 }
 0x270   :  { %v4883_v28 = vpop.eup %4359  ;;  %4367 = vpow2.f32 %v926_v17  ;;  %v924_v29 = vmul.f32 1.442695, %v900_v18  ;;  %v903_v8 = vsub.f32 %v4848_v21, %v863_v19  ;;  %v943_v33 = vrot.slane %v942_v13, 2  ;;  %v744_v63 = vpop.f32.mrf.mxu1 }
 0x271   :  { %v952_v32 = vrot.slane %v951_v23, 1  ;;  %v964_v35 = vrot.slane %v963_v24, 2  ;;  %v956_v36 = vadd.f32 %v955_v26, %v954_v2  ;;  %v975_v12 = vsel %vm779_vm4, %v4883_v28, 0.0 }
 0x272   :  { %v4886_v37 = vpop.eup %4361  ;;  %4369 = vpow2.f32 %v924_v29  ;;  %v930_v15 = vmul.f32 1.442695, %v903_v8  ;;  %v902_v38 = vsub.f32 %v4854_v30, %v856_v31  ;;  %v4892_v40 = vadd.f32 %v4833_v60, %v734_v5 }
 0x273   :  { %v957_v39 = vrot.slane %v956_v36, 2  ;;  %v976_v42 = vrot.slane %v975_v12, 4  ;;  %v968_v43 = vsel %vm779_vm4, %v4886_v37, 0.0  ;;  %v953_v25 = vadd.f32 %v952_v32, %v951_v23 }
 0x274   :  { %v4894_v21 = vpop.eup %4363  ;;  %4371 = vpow2.f32 %v930_v15  ;;  %v928_v44 = vmul.f32 1.442695, %v902_v38  ;;  %v944_v47 = vadd.f32 %v943_v33, %v942_v13  ;;  %v4898_v49 = vadd.f32 %v964_v35, %v963_v24 }
 0x275   :  { %v969_v50 = vrot.slane %v968_v43, 4  ;;  %v977_v30 = vadd.f32 %v976_v42, %v975_v12  ;;  %v989_v55 = vsel %vm779_vm4, %v4894_v21, 0.0  ;;  %v873_v34 = vmax.f32 %v871_v4, %v872_v27 }
 0x276   :  { %v4900_v53 = vpop.eup %4365  ;;  %4373 = vpow2.f32 %v928_v44  ;;  %v4904_v54 = vadd.f32 %v957_v39, %v956_v36  ;;  %v990_v59 = vrot.slane %v989_v55, 4  ;;  %v864_v6 = vsel %vm779_vm4, %v4892_v40, -inf }
 0x277   :  { %v970_v58 = vadd.f32 %v969_v50, %v968_v43  ;;  %v982_v62 = vsel %vm779_vm4, %v4900_v53, 0.0  ;;  %v978_v1 = vrot.slane %v977_v30, 2  ;;  %v874_v57 = vrot.slane %v873_v34, 2 }
 0x278   :  { %v983_v3 = vrot.slane %v982_v62, 4  ;;  %v991_v9 = vadd.f32 %v990_v59, %v989_v55  ;;  %v865_v10 = vrot.slane %v864_v6, 4  ;;  %v4911_v11 = vadd.f32 %v4117_v41, %v4833_v60 }
 0x279   :  { %v971_v7 = vrot.slane %v970_v58, 2  ;;  %v945_v4 = vrot.slane %v944_v47, 1  ;;  %v4913_v13 = vadd.f32 %v978_v1, %v977_v30  ;;  %v875_v14 = vmax.f32 %v873_v34, %v874_v57 }
 0x27a   :  { %v4916_v16 = vadd.f32 %v4833_v60, %v744_v63  ;;  %4375 = vrcp.f32 %v953_v25  ;;  %v984_v2 = vadd.f32 %v983_v3, %v982_v62  ;;  %v866_v17 = vmax.f32 %v864_v6, %v865_v10 }
 0x27b   :  { %v885_v18 = vsel %vm779_vm4, %v4911_v11, -inf  ;;  %v966_v19 = vrot.slane %v4898_v49, 1  ;;  %v992_v23 = vrot.slane %v991_v9, 2  ;;  %v876_v24 = vrot.slane %v875_v14, 1 }
 0x27c   :  { %v886_v26 = vrot.slane %v885_v18, 4  ;;  %v959_v5 = vrot.slane %v4904_v54, 1  ;;  %v972_v29 = vadd.f32 %v971_v7, %v970_v58  ;;  %v867_v8 = vrot.slane %v866_v17, 2 }
 0x27d   :  { %v4921_v27 = vpop.eup %4367  ;;  %v878_v31 = vsel %vm779_vm4, %v4916_v16, -inf  ;;  %v980_v32 = vrot.slane %v4913_v13, 1  ;;  %v877_v35 = vmax.f32 %v875_v14, %v876_v24  ;;  %v985_v15 = vrot.slane %v984_v2, 2 }
 0x27e   :  { %v1003_v33 = vsel %vm779_vm4, %v4921_v27, 0.0  ;;  %v887_v36 = vmax.f32 %v885_v18, %v886_v26  ;;  %v868_v39 = vmax.f32 %v866_v17, %v867_v8  ;;  %v879_v41 = vrot.slane %v878_v31, 4 }
 0x27f   :  { %v4929_v12 = vpop.eup %4369  ;;  %v1004_v38 = vrot.slane %v1003_v33, 4  ;;  %v993_v42 = vadd.f32 %v992_v23, %v991_v9  ;;  %v905_v44 = vsub.f32 %v4863_v48, %v877_v35  ;;  %v946_v1 = vadd.f32 %v945_v4, %v944_v47 }
 0x280   :  { %v996_v43 = vsel %vm779_vm4, %v4929_v12, 0.0  ;;  %v888_v25 = vrot.slane %v887_v36, 2  ;;  %v869_v34 = vrot.slane %v868_v39, 1  ;;  %v880_v58 = vmax.f32 %v878_v31, %v879_v41 }
 0x281   :  { %v4934_v50 = vpop.eup %4371  ;;  %v1005_v30 = vadd.f32 %v1004_v38, %v1003_v33  ;;  %v997_v55 = vrot.slane %v996_v43, 4  ;;  %v934_v62 = vmul.f32 1.442695, %v905_v44  ;;  %v986_v57 = vadd.f32 %v985_v15, %v984_v2 }
 0x282   :  { %v1017_v59 = vsel %vm779_vm4, %v4934_v50, 0.0  ;;  %v889_v63 = vmax.f32 %v887_v36, %v888_v25  ;;  %v870_v9 = vmax.f32 %v868_v39, %v869_v34  ;;  %v881_v14 = vrot.slane %v880_v58, 2 }
 0x283   :  { %v4938_v3 = vpop.eup %4373  ;;  %v998_v6 = vadd.f32 %v997_v55, %v996_v43  ;;  %v1018_v7 = vrot.slane %v1017_v59, 4  ;;  %4377 = vpow2.f32 %v934_v62  ;;  %v1006_v17 = vrot.slane %v1005_v30, 2 }
 0x284   :  { %v1010_v48 = vsel %vm779_vm4, %v4938_v3, 0.0  ;;  %v890_v10 = vrot.slane %v889_v63, 1  ;;  %v904_v26 = vsub.f32 %v4892_v40, %v870_v9  ;;  %v882_v47 = vmax.f32 %v880_v58, %v881_v14 }
 0x285   :  { %v999_v18 = vrot.slane %v998_v6, 2  ;;  %v1019_v23 = vadd.f32 %v1018_v7, %v1017_v59  ;;  %v1011_v24 = vrot.slane %v1010_v48, 4  ;;  %4379 = vrcp.f32 %v946_v1 }
 0x286   :  { %v891_v8 = vmax.f32 %v889_v63, %v890_v10  ;;  %v973_v4 = vrot.slane %v972_v29, 1  ;;  %v994_v2 = vrot.slane %v993_v42, 1  ;;  %v987_v36 = vrot.slane %v986_v57, 1 }
 0x287   :  { %v1000_v31 = vadd.f32 %v999_v18, %v998_v6  ;;  %v1012_v33 = vadd.f32 %v1011_v24, %v1010_v48  ;;  %v4376_v35 = vpop.eup %4375  ;;  %v932_v15 = vmul.f32 1.442695, %v904_v26  ;;  %v883_v39 = vrot.slane %v882_v47, 1 }
 0x288   :  { %v907_v38 = vsub.f32 %v4911_v11, %v891_v8  ;;  %v1007_v41 = vadd.f32 %v1006_v17, %v1005_v30  ;;  %v1020_v43 = vrot.slane %v1019_v23, 2  ;;  %v960_v25 = vadd.f32 %v959_v5, %v4904_v54 }
 0x289   :  { %v1013_v44 = vrot.slane %v1012_v33, 2  ;;  %4381 = vpow2.f32 %v932_v15  ;;  %v884_v55 = vmax.f32 %v882_v47, %v883_v39  ;;  %v967_v34 = vadd.f32 %v966_v19, %v4898_v49 }
 0x28a   :  { %v938_v40 = vmul.f32 1.442695, %v907_v38  ;;  %v1001_v58 = vrot.slane %v1000_v31, 1  ;;  %4383 = vrcp.f32 %v960_v25  ;;  %v974_v62 = vadd.f32 %v973_v4, %v972_v29 }
 0x28b   :  { %v1014_v59 = vadd.f32 %v1013_v44, %v1012_v33  ;;  %v906_v11 = vsub.f32 %v4916_v16, %v884_v55  ;;  %v981_v30 = vadd.f32 %v980_v32, %v4913_v13  ;;  %v988_v63 = vadd.f32 %v987_v36, %v986_v57 }
 0x28c   :  { %4385 = vpow2.f32 %v938_v40  ;;  %v995_v5 = vadd.f32 %v994_v2, %v993_v42  ;;  %v1008_v6 = vrot.slane %v1007_v41, 1  ;;  %v1021_v7 = vadd.f32 %v1020_v43, %v1019_v23 }
 0x28d   :  { %4387 = vrcp.f32 %v967_v34  ;;  %v1015_v1 = vrot.slane %v1014_v59, 1  ;;  %v936_v54 = vmul.f32 1.442695, %v906_v11  ;;  %v1002_v9 = vadd.f32 %v1001_v58, %v1000_v31 }
 0x28e   :  { %4389 = vrcp.f32 %v974_v62  ;;  %v1022_v29 = vrot.slane %v1021_v7, 1  ;;  %v1009_v57 = vadd.f32 %v1008_v6, %v1007_v41  ;;  %v1069_v10 = vmul.f32 %v4376_v35, %v4860_v46 }
 0x28f   :  { %4391 = vrcp.f32 %v981_v30  ;;  %v1016_v16 = vadd.f32 %v1015_v1, %v1014_v59 }
 0x290   :  { %4393 = vpow2.f32 %v936_v54  ;;  %v4950_v49 = vpop.eup %4377  ;;  %v1023_v18 = vadd.f32 %v1022_v29, %v1021_v7 }
 0x291   :  { %4395 = vrcp.f32 %v988_v63  ;;  %v1031_v19 = vsel %vm779_vm4, %v4950_v49, 0.0 }
 0x292   :  { %4397 = vrcp.f32 %v995_v5  ;;  %v4380_v13 = vpop.eup %4379  ;;  %v1032_v32 = vrot.slane %v1031_v19, 4 }
 0x293   :  { %4399 = vrcp.f32 %v1002_v9  ;;  %v1068_v42 = vmul.f32 %v4380_v13, %v4867_v56 }
 0x294   :  { %v1033_v48 = vadd.f32 %v1032_v32, %v1031_v19  ;;  %4401 = vrcp.f32 %v1016_v16 }
 0x295   :  { %4120 = vmatprep.mubr.msk.f32.mxu0 %vm779_vm4, %v1068_v42  ;;  %4403 = vrcp.f32 %v1009_v57 }
 0x296   :  { %v4957_v14 = vpop.eup %4381  ;;  %v1034_v17 = vrot.slane %v1033_v48, 2  ;;  %4121 = vmatmul.mubr.msk.f32.vlgmr.msra.gmra.mxu0 %vm779_vm4, %v1069_v10  ;;  %4405 = vrcp.f32 %v1023_v18  ;;  %v1409_v18 = vld [vmem:[%s5647_s10] sm:$0xff] }
 0x297   :  { %v4384_v23 = vpop.eup %4383  ;;  %v1024_v24 = vsel %vm779_vm4, %v4957_v14, 0.0 }
 0x298   :  { %v1035_v56 = vadd.f32 %v1034_v17, %v1033_v48  ;;  %v1025_v8 = vrot.slane %v1024_v24, 4  ;;  %v1070_v46 = vmul.f32 %v4384_v23, %v4878_v61  ;;  %v4085_v23 = vpop.f32.mrf.mxu0 }
 0x299   :  { %v4962_v26 = vpop.eup %4385 }
 0x29a   :  { %v4388_v47 = vpop.eup %4387  ;;  %v1045_v4 = vsel %vm779_vm4, %v4962_v26, 0.0  ;;  %v1026_v31 = vadd.f32 %v1025_v8, %v1024_v24  ;;  %4123 = vmatprep.mubr.msk.f32.mxu0 %vm779_vm4, %v1070_v46  ;;  %v1036_v15 = vrot.slane %v1035_v56, 1  ;;  %v355_v24 = vpop.f32.mrf.mxu0 }
 0x29b   :  { %v4390_v2 = vpop.eup %4389  ;;  %v1046_v33 = vrot.slane %v1045_v4, 4  ;;  %v1071_v35 = vmul.f32 %v4388_v47, %v4871_v0 }
 0x29c   :  { %v4392_v36 = vpop.eup %4391  ;;  %v1072_v38 = vmul.f32 %v4390_v2, %v4886_v37  ;;  %v1027_v41 = vrot.slane %v1026_v31, 2  ;;  %v1037_v37 = vadd.f32 %v1036_v15, %v1035_v56 }
 0x29d   :  { %v4394_v39 = vpop.eup %4393  ;;  %v1047_v43 = vadd.f32 %v1046_v33, %v1045_v4  ;;  %4124 = vmatmul.mubr.msk.f32.gmra.mxu0 %vm779_vm4, %v1071_v35  ;;  %v1073_v25 = vmul.f32 %v4392_v36, %v4883_v28 }
 0x29e   :  { %v4396_v61 = vpop.eup %4395  ;;  %v1038_v44 = vsel %vm779_vm4, %v4394_v39, 0.0  ;;  %4126 = vmatprep.mubr.msk.f32.mxu0 %vm779_vm4, %v1072_v38  ;;  %v1028_v55 = vadd.f32 %v1027_v41, %v1026_v31  ;;  %4407 = vrcp.f32 %v1037_v37 }
 0x29f   :  { %v4398_v40 = vpop.eup %4397  ;;  %v1048_v0 = vrot.slane %v1047_v43, 2  ;;  %v1039_v34 = vrot.slane %v1038_v44, 4  ;;  %v1074_v58 = vmul.f32 %v4396_v61, %v4900_v53 }
 0x2a0   :  { %v4400_v59 = vpop.eup %4399  ;;  %v1029_v62 = vrot.slane %v1028_v55, 1  ;;  %v1075_v5 = vmul.f32 %v4398_v40, %v4894_v21 }
 0x2a1   :  { %v1049_v11 = vadd.f32 %v1048_v0, %v1047_v43  ;;  %v1040_v30 = vadd.f32 %v1039_v34, %v1038_v44  ;;  %4127 = vmatmul.mubr.msk.f32.gmra.mxu0 %vm779_vm4, %v1073_v25  ;;  %v1076_v63 = vmul.f32 %v4400_v59, %v4929_v12  ;;  %v4402_v1 = vpop.eup %4401 }
 0x2a2   :  { %4129 = vmatprep.mubr.msk.f32.mxu0 %vm779_vm4, %v1074_v58  ;;  %v1030_v6 = vadd.f32 %v1029_v62, %v1028_v55  ;;  %v4404_v7 = vpop.eup %4403  ;;  %v1078_v9 = vmul.f32 %v4402_v1, %v4938_v3 }
 0x2a3   :  { %v1050_v54 = vrot.slane %v1049_v11, 1  ;;  %v1041_v28 = vrot.slane %v1040_v30, 2  ;;  %v1077_v12 = vmul.f32 %v4404_v7, %v4921_v27  ;;  %v4406_v13 = vpop.eup %4405 }
 0x2a4   :  { %4409 = vrcp.f32 %v1030_v6  ;;  %v1079_v21 = vmul.f32 %v4406_v13, %v4934_v50  ;;  %v1412_v50 = vld [vmem:[%s5647_s10 + $0x18] sm:$0xff] }
 0x2a5   :  { %v1042_v53 = vadd.f32 %v1041_v28, %v1040_v30  ;;  %4130 = vmatmul.mubr.msk.f32.gmra.mxu0 %vm779_vm4, %v1075_v5  ;;  %v1051_v19 = vadd.f32 %v1050_v54, %v1049_v11  ;;  %4144 = vmatprep.subr.mxu1 %v1412_v50 }
 0x2a6   :  { %4132 = vmatprep.mubr.msk.f32.mxu0 %vm779_vm4, %v1076_v63  ;;  %4145 = vmatpush3.msra.mxu1 %v1412_v50 }
 0x2a7   :  { %v1043_v16 = vrot.slane %v1042_v53, 1  ;;  %4411 = vrcp.f32 %v1051_v19 }
 0x2a9   :  { %4133 = vmatmul.mubr.msk.f32.gmra.mxu0 %vm779_vm4, %v1077_v12  ;;  %v1044_v29 = vadd.f32 %v1043_v16, %v1042_v53 }
 0x2aa   :  { %4135 = vmatprep.mubr.msk.f32.mxu0 %vm779_vm4, %v1078_v9 }
 0x2ab   :  { %4413 = vrcp.f32 %v1044_v29  ;;  %v4408_v32 = vpop.eup %4407 }
 0x2ac   :  { %v1081_v42 = vmul.f32 %v4408_v32, %v4950_v49  ;;  %v1411_v49 = vld [vmem:[%s5647_s10 + $0x10] sm:$0xff] }
 0x2ad   :  { %4136 = vmatmul.mubr.msk.f32.gmra.mxu0 %vm779_vm4, %v1079_v21  ;;  %4146 = vmatprep.subr.mxu1 %v1411_v49 }
 0x2ae   :  { %4147 = vmatpush3.msra.mxu1 %v1411_v49 }
 0x2b1   :  { %v4410_v57 = vpop.eup %4409 }
 0x2b2   :  { %v1080_v3 = vmul.f32 %v4410_v57, %v4957_v14  ;;  %v1410_v14 = vld [vmem:[%s5647_s10 + $0x8] sm:$0xff] }
 0x2b3   :  { %4148 = vmatprep.subr.mxu1 %v1410_v14 }
 0x2b4   :  { %4138 = vmatprep.mubr.msk.f32.mxu0 %vm779_vm4, %v1080_v3  ;;  %v4412_v27 = vpop.eup %4411  ;;  %4149 = vmatpush3.msra.mxu1 %v1410_v14 }
 0x2b5   :  { %4139 = vmatmul.mubr.msk.f32.gmra.mxu0 %vm779_vm4, %v1081_v42  ;;  %v1083_v17 = vmul.f32 %v4412_v27, %v4962_v26  ;;  %4150 = vmatprep.subr.mxu1 %v1409_v18  ;;  %v3753_v26 = vld [vmem:[%s5646_s9] ss:$0 sm:$0xff] }
 0x2b6   :  { %4151 = vmatpush3.msra.mxu1 %v1409_v18  ;;  %v356_v56 = vadd.f32 %v3753_v26, %v355_v24  ;;  %v5014_v1 = vadd.f32 %v4085_v23, %v3753_v26 }
 0x2b8   :  { %v4414_v48 = vpop.eup %4413 }
 0x2b9   :  { %v1082_v10 = vmul.f32 %v4414_v48, %v4394_v39 }
 0x2bb   :  { %4141 = vmatprep.mubr.msk.f32.mxu0 %vm779_vm4, %v1082_v10 }
 0x2bc   :  { %4142 = vmatmul.mubr.msk.f32.gmra.mxu0 %vm779_vm4, %v1083_v17 }
 0x356   :  { %v4122_v8 = vpop.f32.mrf.mxu0 }
 0x357   :  { %v1282_v46 = vmul.f32 %v4122_v8, %v356_v56 }
 0x358   :  { %v1202_v47 = vpop.f32.mrf.mxu0 }
 0x359   :  { %v1304_v4 = vsel %vm82_vm0, %v1282_v46, 0.0  ;;  %v1281_v2 = vmul.f32 %v1202_v47, %v356_v56 }
 0x35a   :  { %v1305_v31 = vrot.slane %v1304_v4, 4 }
 0x35b   :  { %v1297_v33 = vsel %vm82_vm0, %v1281_v2, 0.0 }
 0x35c   :  { %v1306_v35 = vadd.f32 %v1305_v31, %v1304_v4  ;;  %v1298_v36 = vrot.slane %v1297_v33, 4 }
 0x35d   :  { %v4125_v15 = vpop.f32.mrf.mxu0 }
 0x35e   :  { %v1284_v38 = vmul.f32 %v4125_v15, %v356_v56  ;;  %v1307_v39 = vrot.slane %v1306_v35, 2  ;;  %v1299_v41 = vadd.f32 %v1298_v36, %v1297_v33 }
 0x35f   :  { %v1212_v43 = vpop.f32.mrf.mxu0 }
 0x360   :  { %v1318_v61 = vsel %vm82_vm0, %v1284_v38, 0.0  ;;  %v1283_v44 = vmul.f32 %v1212_v43, %v356_v56  ;;  %v1308_v25 = vadd.f32 %v1307_v39, %v1306_v35  ;;  %v1300_v40 = vrot.slane %v1299_v41, 2 }
 0x361   :  { %v1319_v55 = vrot.slane %v1318_v61, 4  ;;  %v4128_v0 = vpop.f32.mrf.mxu0 }
 0x362   :  { %v1311_v34 = vsel %vm82_vm0, %v1283_v44, 0.0  ;;  %v1286_v58 = vmul.f32 %v4128_v0, %v356_v56  ;;  %v1301_v59 = vadd.f32 %v1300_v40, %v1299_v41  ;;  %v1309_v54 = vrot.slane %v1308_v25, 1 }
 0x363   :  { %v1320_v37 = vadd.f32 %v1319_v55, %v1318_v61  ;;  %v1312_v62 = vrot.slane %v1311_v34, 4  ;;  %v1222_v11 = vpop.f32.mrf.mxu0 }
 0x364   :  { %v1332_v30 = vsel %vm82_vm0, %v1286_v58, 0.0  ;;  %v1285_v63 = vmul.f32 %v1222_v11, %v356_v56  ;;  %v1302_v19 = vrot.slane %v1301_v59, 1  ;;  %v1310_v3 = vadd.f32 %v1309_v54, %v1308_v25 }
 0x365   :  { %v1321_v28 = vrot.slane %v1320_v37, 2  ;;  %v1313_v5 = vadd.f32 %v1312_v62, %v1311_v34  ;;  %v4131_v6 = vpop.f32.mrf.mxu0  ;;  %v1333_v7 = vrot.slane %v1332_v30, 4 }
 0x366   :  { %v1325_v53 = vsel %vm82_vm0, %v1285_v63, 0.0  ;;  %v1288_v9 = vmul.f32 %v4131_v6, %v356_v56  ;;  %v1303_v14 = vadd.f32 %v1302_v19, %v1301_v59 }
 0x367   :  { %v1314_v16 = vrot.slane %v1313_v5, 2  ;;  %v1326_v12 = vrot.slane %v1325_v53, 4  ;;  %v1232_v13 = vpop.f32.mrf.mxu0  ;;  %v1322_v29 = vadd.f32 %v1321_v28, %v1320_v37  ;;  %v1334_v21 = vadd.f32 %v1333_v7, %v1332_v30 }
 0x368   :  { %v1346_v32 = vsel %vm82_vm0, %v1288_v9, 0.0  ;;  %v1287_v57 = vmul.f32 %v1232_v13, %v356_v56  ;;  %v1435_v39 = vsel %vm1434_vm5, %v1310_v3, %v1303_v14 }
 0x369   :  { %v1315_v42 = vadd.f32 %v1314_v16, %v1313_v5  ;;  %v1327_v27 = vadd.f32 %v1326_v12, %v1325_v53  ;;  %v4134_v48 = vpop.f32.mrf.mxu0  ;;  %v1335_v10 = vrot.slane %v1334_v21, 2  ;;  %v1347_v17 = vrot.slane %v1346_v32, 4 }
 0x36a   :  { %v1339_v50 = vsel %vm82_vm0, %v1287_v57, 0.0  ;;  %v1290_v49 = vmul.f32 %v4134_v48, %v5014_v1  ;;  %v1323_v8 = vrot.slane %v1322_v29, 1 }
 0x36b   :  { %v1316_v18 = vrot.slane %v1315_v42, 1  ;;  %v1328_v23 = vrot.slane %v1327_v27, 2  ;;  %v1340_v24 = vrot.slane %v1339_v50, 4  ;;  %v1242_v26 = vpop.f32.mrf.mxu0  ;;  %v1348_v46 = vadd.f32 %v1347_v17, %v1346_v32 }
 0x36c   :  { %v1360_v56 = vsel %vm82_vm0, %v1290_v49, 0.0  ;;  %v1289_v47 = vmul.f32 %v1242_v26, %v5014_v1  ;;  %v1336_v2 = vadd.f32 %v1335_v10, %v1334_v21  ;;  %v1324_v25 = vadd.f32 %v1323_v8, %v1322_v29 }
 0x36d   :  { %v1317_v4 = vadd.f32 %v1316_v18, %v1315_v42  ;;  %v1329_v31 = vadd.f32 %v1328_v23, %v1327_v27  ;;  %v1341_v33 = vadd.f32 %v1340_v24, %v1339_v50  ;;  %v4137_v35 = vpop.f32.mrf.mxu0  ;;  %v1349_v36 = vrot.slane %v1348_v46, 2 }
 0x36e   :  { %v1353_v15 = vsel %vm82_vm0, %v1289_v47, 0.0  ;;  %v1292_v38 = vmul.f32 %v4137_v35, %v5014_v1  ;;  %v1361_v61 = vrot.slane %v1360_v56, 4  ;;  %v1337_v34 = vrot.slane %v1336_v2, 1 }
 0x36f   :  { %v1330_v41 = vrot.slane %v1329_v31, 1  ;;  %v1342_v43 = vrot.slane %v1341_v33, 2  ;;  %v1252_v44 = vpop.f32.mrf.mxu0  ;;  %v1437_v40 = vsel %vm1436_vm6, %v1317_v4, %v1435_v39  ;;  %v1350_v55 = vadd.f32 %v1349_v36, %v1348_v46 }
 0x370   :  { %v1354_v0 = vrot.slane %v1353_v15, 4  ;;  %v1374_v37 = vsel %vm82_vm0, %v1292_v38, 0.0  ;;  %v1291_v11 = vmul.f32 %v1252_v44, %v5014_v1  ;;  %v1362_v63 = vadd.f32 %v1361_v61, %v1360_v56 }
 0x371   :  { %v1331_v58 = vadd.f32 %v1330_v41, %v1329_v31  ;;  %v1343_v59 = vadd.f32 %v1342_v43, %v1341_v33  ;;  %v1439_v54 = vsel %vm1438_vm7, %v1324_v25, %v1437_v40  ;;  %v1351_v28 = vrot.slane %v1350_v55, 1 }
 0x372   :  { %v1355_v62 = vadd.f32 %v1354_v0, %v1353_v15  ;;  %v1375_v5 = vrot.slane %v1374_v37, 4  ;;  %v1367_v6 = vsel %vm82_vm0, %v1291_v11, 0.0  ;;  %v1338_v53 = vadd.f32 %v1337_v34, %v1336_v2 }
 0x373   :  { %v1344_v30 = vrot.slane %v1343_v59, 1  ;;  %v1441_v7 = vsel %vm1440_vm8, %v1331_v58, %v1439_v54  ;;  %v1368_v19 = vrot.slane %v1367_v6, 4  ;;  %v1363_v13 = vrot.slane %v1362_v63, 2 }
 0x374   :  { %v1356_v16 = vrot.slane %v1355_v62, 2  ;;  %v1443_v32 = vsel %vm1442_vm9, %v1338_v53, %v1441_v7  ;;  %v1352_v57 = vadd.f32 %v1351_v28, %v1350_v55  ;;  %v1376_v3 = vadd.f32 %v1375_v5, %v1374_v37 }
 0x375   :  { %v1345_v9 = vadd.f32 %v1344_v30, %v1343_v59  ;;  %v4140_v12 = vpop.f32.mrf.mxu0  ;;  %v1369_v29 = vadd.f32 %v1368_v19, %v1367_v6  ;;  %v1364_v18 = vadd.f32 %v1363_v13, %v1362_v63 }
 0x376   :  { %v1294_v21 = vmul.f32 %v4140_v12, %v5014_v1  ;;  %v1357_v50 = vadd.f32 %v1356_v16, %v1355_v62  ;;  %v1377_v26 = vrot.slane %v1376_v3, 2 }
 0x377   :  { %v1262_v42 = vpop.f32.mrf.mxu0  ;;  %v1445_v27 = vsel %vm1444_vm10, %v1345_v9, %v1443_v32  ;;  %v1370_v48 = vrot.slane %v1369_v29, 2  ;;  %v1365_v33 = vrot.slane %v1364_v18, 1 }
 0x378   :  { %v1388_v10 = vsel %vm82_vm0, %v1294_v21, 0.0  ;;  %v1293_v17 = vmul.f32 %v1262_v42, %v5014_v1  ;;  %v1447_v14 = vsel %vm1446_vm11, %v1352_v57, %v1445_v27  ;;  %v1358_v4 = vrot.slane %v1357_v50, 1 }
 0x379   :  { %v1389_v49 = vrot.slane %v1388_v10, 4  ;;  %v1371_v23 = vadd.f32 %v1370_v48, %v1369_v29  ;;  %4152 = vmatprep.mubr.msk.f32.mxu1 %vm82_vm0, %v1447_v14  ;;  %v1378_v38 = vadd.f32 %v1377_v26, %v1376_v3  ;;  %v1366_v55 = vadd.f32 %v1365_v33, %v1364_v18  ;;  %v3789_v3 = vld [vmem:[%s5648_s11] ss:$0 sm:$0xff] }
 0x37a   :  { %v1381_v24 = vsel %vm82_vm0, %v1293_v17, 0.0  ;;  %v1359_v44 = vadd.f32 %v1358_v4, %v1357_v50  ;;  %v1677_v4 = vld [vmem:[%s5653_s16 + $0x28] sm:$0xff] }
 0x37b   :  { %v1390_v8 = vadd.f32 %v1389_v49, %v1388_v10  ;;  %v1382_v46 = vrot.slane %v1381_v24, 4  ;;  %v1372_v35 = vrot.slane %v1371_v23, 1  ;;  %v1379_v58 = vrot.slane %v1378_v38, 1 }
 0x37c   :  { %v4143_v56 = vpop.f32.mrf.mxu0  ;;  %v1448_v30 = vsel %vm1434_vm5, %v1366_v55, %v1359_v44 }
 0x37d   :  { %v1296_v47 = vmul.f32 %v4143_v56, %v5014_v1  ;;  %v1383_v2 = vadd.f32 %v1382_v46, %v1381_v24  ;;  %v1391_v39 = vrot.slane %v1390_v8, 2  ;;  %v1373_v0 = vadd.f32 %v1372_v35, %v1371_v23  ;;  %v1580_v46 = vld [vmem:[%s5651_s14] sm:$0xff]  ;;  %v1679_v56 = vld [vmem:[%s5653_s16 + $0x38] sm:$0xff] }
 0x37e   :  { %v1272_v31 = vpop.f32.mrf.mxu0  ;;  %v1380_v5 = vadd.f32 %v1379_v58, %v1378_v38  ;;  %4166 = vmatprep.subr.mxu1 %v1679_v56  ;;  %v3792_v58 = vld [vmem:[%s5649_s12] ss:$0 sm:$0xff] }
 0x37f   :  { %v1402_v36 = vsel %vm82_vm0, %v1296_v47, 0.0  ;;  %v1295_v15 = vmul.f32 %v1272_v31, %v5014_v1  ;;  %v1384_v41 = vrot.slane %v1383_v2, 2  ;;  %v1392_v59 = vadd.f32 %v1391_v39, %v1390_v8  ;;  %v1581_v8 = vld [vmem:[%s5651_s14 + $0x8] sm:$0xff]  ;;  %v1678_v47 = vld [vmem:[%s5653_s16 + $0x30] sm:$0xff] }
 0x380   :  { %v1403_v43 = vrot.slane %v1402_v36, 4  ;;  %v1449_v63 = vsel %vm1436_vm6, %v1373_v0, %v1448_v30 }
 0x381   :  { %v1395_v61 = vsel %vm82_vm0, %v1295_v15, 0.0  ;;  %v1385_v25 = vadd.f32 %v1384_v41, %v1383_v2  ;;  %v1393_v6 = vrot.slane %v1392_v59, 1  ;;  %v1450_v53 = vsel %vm1438_vm7, %v1380_v5, %v1449_v63  ;;  %v1676_v2 = vld [vmem:[%s5653_s16 + $0x20] sm:$0xff]  ;;  %v1675_v5 = vld [vmem:[%s5653_s16 + $0x18] sm:$0xff] }
 0x382   :  { %v1404_v40 = vadd.f32 %v1403_v43, %v1402_v36  ;;  %v1396_v34 = vrot.slane %v1395_v61, 4 }
 0x383   :  { %v1386_v37 = vrot.slane %v1385_v25, 1  ;;  %v1394_v12 = vadd.f32 %v1393_v6, %v1392_v59  ;;  %v1674_v6 = vld [vmem:[%s5653_s16 + $0x10] sm:$0xff] }
 0x384   :  { %v1405_v62 = vrot.slane %v1404_v40, 2  ;;  %v1397_v11 = vadd.f32 %v1396_v34, %v1395_v61 }
 0x385   :  { %v1387_v54 = vadd.f32 %v1386_v37, %v1385_v25  ;;  %v3793_v37 = vld [vmem:[%s5650_s13] ss:$0 sm:$0xff] }
 0x386   :  { %v1406_v1 = vadd.f32 %v1405_v62, %v1404_v40  ;;  %v1398_v28 = vrot.slane %v1397_v11, 2 }
 0x387   :  { %v1451_v19 = vsel %vm1440_vm8, %v1387_v54, %v1450_v53  ;;  %v1672_v53 = vld [vmem:[%s5653_s16] sm:$0xff] }
 0x388   :  { %v1399_v7 = vadd.f32 %v1398_v28, %v1397_v11  ;;  %v1407_v9 = vrot.slane %v1406_v1, 1  ;;  %v1452_v21 = vsel %vm1442_vm9, %v1394_v12, %v1451_v19 }
 0x38a   :  { %v1400_v16 = vrot.slane %v1399_v7, 1  ;;  %v1408_v29 = vadd.f32 %v1407_v9, %v1406_v1  ;;  %v3794_v9 = vld [vmem:[%s5652_s15] ss:$0 sm:$0xff] }
 0x38c   :  { %v1401_v13 = vadd.f32 %v1400_v16, %v1399_v7  ;;  %v1673_v7 = vld [vmem:[%s5653_s16 + $0x8] sm:$0xff] }
 0x38e   :  { %v1453_v32 = vsel %vm1444_vm10, %v1401_v13, %v1452_v21 }
 0x38f   :  { %v1454_v57 = vsel %vm1446_vm11, %v1408_v29, %v1453_v32  ;;  %v3797_v32 = vld [vmem:[%s5654_s17] ss:$0 sm:$0xff] }
 0x390   :  { %4153 = vmatmul.mubr.msk.f32.vlgmr.msra.gmra.mxu1 %vm82_vm0, %v1454_v57 }
 0x391   :  { %4167 = vmatpush3.msra.mxu1 %v1679_v56  ;;  %v3802_v56 = vld [vmem:[%s5684_s0 + $0x20] sm:$0xff] }
 0x392   :  { %4168 = vmatprep.subr.mxu1 %v1678_v47 }
 0x393   :  { %4169 = vmatpush3.msra.mxu1 %v1678_v47  ;;  %v3816_v47 = vld [vmem:[%s5686_s8 + $0x20] sm:$0xff] }
 0x394   :  { %4170 = vmatprep.subr.mxu1 %v1677_v4 }
 0x395   :  { %4171 = vmatpush3.msra.mxu1 %v1677_v4  ;;  %v3812_v4 = vld [vmem:[%s5685_s3 + $0x38] sm:$0xff] }
 0x396   :  { %4172 = vmatprep.subr.mxu1 %v1676_v2 }
 0x397   :  { %4173 = vmatpush3.msra.mxu1 %v1676_v2  ;;  %v4499_v2 = vld [vmem:[%s5691_s6] sm:$0xf] }
 0x398   :  { %4174 = vmatprep.subr.mxu1 %v1675_v5 }
 0x399   :  { %4175 = vmatpush3.msra.mxu1 %v1675_v5  ;;  %v3811_v5 = vld [vmem:[%s5685_s3 + $0x30] sm:$0xff] }
 0x39a   :  { %4176 = vmatprep.subr.mxu1 %v1674_v6 }
 0x39b   :  { %4177 = vmatpush3.msra.mxu1 %v1674_v6  ;;  %v3810_v6 = vld [vmem:[%s5685_s3 + $0x28] sm:$0xff] }
 0x39c   :  { %4178 = vmatprep.subr.mxu1 %v1673_v7 }
 0x39d   :  { %4179 = vmatpush3.msra.mxu1 %v1673_v7  ;;  %v3809_v7 = vld [vmem:[%s5685_s3 + $0x20] sm:$0xff] }
 0x39e   :  { %4180 = vmatprep.subr.mxu1 %v1672_v53 }
 0x39f   :  { %4181 = vmatpush3.msra.mxu1 %v1672_v53  ;;  %v4500_v53 = vld [vmem:[%s5687_s29 + $0x18] sm:$0xff] }
 0x450   :  { %v4154_v42 = vpop.f32.mrf.mxu1 }
 0x451   :  { %v1531_v27 = vadd.f32 %v4154_v42, %v3789_v3 }
 0x452   :  { %v1525_v48 = vpop.f32.mrf.mxu1 }
 0x453   :  { %v1535_v10 = vadd.f32 %v1531_v27, %v4700_v22  ;;  %v1526_v17 = vadd.f32 %v3789_v3, %v1525_v48  ;;  %v1583_v22 = vld [vmem:[%s5651_s14 + $0x18] sm:$0xff] }
 0x454   :  { %4155 = vmatprep.subr.mxu0 %v1583_v22 }
 0x455   :  { %v1534_v50 = vadd.f32 %v1526_v17, %v4694_v20  ;;  %v1541_v49 = vsel %vm82_vm0, %v1535_v10, 0.0  ;;  %v1545_v24 = vmul.f32 %v1535_v10, %v1535_v10  ;;  %4156 = vmatpush3.msra.mxu0 %v1583_v22  ;;  %v1582_v20 = vld [vmem:[%s5651_s14 + $0x10] sm:$0xff] }
 0x456   :  { %1542 = vadd.xlane.f32.xlu1 %v1541_v49  ;;  %4157 = vmatprep.subr.mxu0 %v1582_v20  ;;  %v3804_v22 = vld [vmem:[%s5684_s0 + $0x30] sm:$0xff] }
 0x457   :  { %v1538_v14 = vsel %vm82_vm0, %v1534_v50, 0.0  ;;  %v1544_v18 = vmul.f32 %v1534_v50, %v1534_v50  ;;  %v1549_v26 = vsel %vm82_vm0, %v1545_v24, 0.0  ;;  %4158 = vmatpush3.msra.mxu0 %v1582_v20  ;;  %v3805_v24 = vld [vmem:[%s5684_s0 + $0x38] sm:$0xff]  ;;  %v3818_v20 = vld [vmem:[%s5686_s8 + $0x30] sm:$0xff] }
 0x458   :  { %1539 = vadd.xlane.f32.xlu0 %v1538_v14  ;;  %4159 = vmatprep.subr.mxu0 %v1581_v8 }
 0x459   :  { %v1546_v23 = vsel %vm82_vm0, %v1544_v18, 0.0  ;;  %4160 = vmatpush3.msra.mxu0 %v1581_v8  ;;  %v3803_v8 = vld [vmem:[%s5684_s0 + $0x28] sm:$0xff] }
 0x45a   :  { %4161 = vmatprep.subr.mxu0 %v1580_v46 }
 0x45b   :  { %4162 = vmatpush3.msra.mxu0 %v1580_v46  ;;  %v3817_v46 = vld [vmem:[%s5686_s8 + $0x28] sm:$0xff] }
 0x45c   :  { %1547 = vadd.xlane.f32.xlu0 %v1546_v23  ;;  %4185 = vmatprep.subr.mxu0 %v3805_v24 }
 0x460   :  { %1550 = vadd.xlane.f32.xlu0 %v1549_v26  ;;  %v3819_v26 = vld [vmem:[%s5686_s8 + $0x38] sm:$0xff] }
 0x461   :  { %4207 = vmatprep.subr.mxu1 %v3819_v26 }
 0x4df   :  { %v1543_v35 = vpop.xlane.xlu1 %1542 }
 0x4e0   :  { %v1553_v15 = vmul.f32 0.03125, %v1543_v35 }
 0x4e1   :  { %v1540_v31 = vpop.xlane.xlu0 %1539 }
 0x4e2   :  { %v1552_v33 = vmul.f32 0.03125, %v1540_v31  ;;  %v1557_v61 = vmul.f32 %v1553_v15, %v1553_v15  ;;  %v1561_v62 = vsub.f32 %v1535_v10, %v1553_v15 }
 0x4e4   :  { %v1556_v38 = vmul.f32 %v1552_v33, %v1552_v33  ;;  %v1560_v0 = vsub.f32 %v1534_v50, %v1552_v33 }
 0x4e5   :  { %v1548_v36 = vpop.xlane.xlu0 %1547 }
 0x4e6   :  { %v1554_v39 = vmul.f32 0.03125, %v1548_v36 }
 0x4e8   :  { %v1558_v41 = vsub.f32 %v1554_v39, %v1556_v38 }
 0x4e9   :  { %v1551_v43 = vpop.xlane.xlu0 %1550 }
 0x4ea   :  { %v1562_v44 = vadd.f32 1e-05, %v1558_v41  ;;  %v1555_v25 = vmul.f32 0.03125, %v1551_v43 }
 0x4ec   :  { %4415 = vrsqrt.f32 %v1562_v44  ;;  %v1559_v40 = vsub.f32 %v1555_v25, %v1557_v61 }
 0x4ee   :  { %v1563_v55 = vadd.f32 1e-05, %v1559_v40 }
 0x4f0   :  { %4417 = vrsqrt.f32 %v1563_v55 }
 0x4f9   :  { %v4416_v34 = vpop.eup %4415 }
 0x4fa   :  { %v1566_v59 = vmul.f32 %v4416_v34, %v1560_v0 }
 0x4fc   :  { %v1572_v11 = vmul.f32 %v3792_v58, %v1566_v59 }
 0x4fd   :  { %v4418_v30 = vpop.eup %4417 }
 0x4fe   :  { %v1567_v1 = vmul.f32 %v4418_v30, %v1561_v62  ;;  %v1578_v63 = vadd.f32 %v3793_v37, %v1572_v11 }
 0x500   :  { %v1573_v54 = vmul.f32 %v3792_v58, %v1567_v1  ;;  %4163 = vmatprep.mubr.msk.f32.mxu0 %vm82_vm0, %v1578_v63  ;;  %v3800_v58 = vld [vmem:[%s5655_s18] ss:$0 sm:$0xff] }
 0x502   :  { %v1579_v28 = vadd.f32 %v3793_v37, %v1573_v54  ;;  %v3801_v37 = vld [vmem:[%s5656_s19] ss:$0 sm:$0xff] }
 0x504   :  { %4164 = vmatmul.mubr.msk.f32.vlgmr.msra.gmra.mxu0 %vm82_vm0, %v1579_v28 }
 0x505   :  { %4186 = vmatpush3.msra.mxu0 %v3805_v24  ;;  %v3813_v24 = vld [vmem:[%s5690_s5 + $0x1] ss:$0 sm:$0xff]  ;;  %s5693_s5 = sld [smem:[#allocation15_spill]] }
 0x506   :  { %4187 = vmatprep.subr.mxu0 %v3804_v22 }
 0x507   :  { %4188 = vmatpush3.msra.mxu0 %v3804_v22 }
 0x508   :  { %4189 = vmatprep.subr.mxu0 %v3803_v8 }
 0x509   :  { %4190 = vmatpush3.msra.mxu0 %v3803_v8 }
 0x50a   :  { %4191 = vmatprep.subr.mxu0 %v3802_v56 }
 0x50b   :  { %4192 = vmatpush3.msra.mxu0 %v3802_v56 }
 0x50c   :  { %4196 = vmatprep.subr.mxu0 %v3812_v4 }
 0x5c4   :  { %v4165_v19 = vpop.f32.mrf.mxu0 }
 0x5c5   :  { %v1667_v16 = vadd.f32 %v4165_v19, %v3794_v9  ;;  %v4502_v19 = vld [vmem:[%s5687_s29 + $0x8] sm:$0xff] }
 0x5c6   :  { %v1661_v12 = vpop.f32.mrf.mxu0 }
 0x5c7   :  { %v1662_v13 = vadd.f32 %v3794_v9, %v1661_v12  ;;  %v1671_v21 = vmax.f32 %v1667_v16, 0.0  ;;  %v4501_v9 = vld [vmem:[%s5687_s29 + $0x10] sm:$0xff]  ;;  %v4503_v16 = vld [vmem:[%s5687_s29] sm:$0xff] }
 0x5c9   :  { %v1670_v29 = vmax.f32 %v1662_v13, 0.0  ;;  %v3806_v13 = vld [vmem:[%s5689_s25 + $0x1] ss:$0 sm:$0xff] }
 0x5cb   :  { %4182 = vmatprep.mubr.msk.f32.mxu1 %vm1685_vm12, %v1670_v29 }
 0x5cc   :  { %4183 = vmatmul.mubr.msk.f32.vlgmr.msra.gmra.mxu1 %vm1685_vm12, %v1671_v21 }
 0x5cd   :  { %4208 = vmatpush3.msra.mxu1 %v3819_v26 }
 0x5ce   :  { %4209 = vmatprep.subr.mxu1 %v3818_v20 }
 0x5cf   :  { %4210 = vmatpush3.msra.mxu1 %v3818_v20 }
 0x5d0   :  { %4211 = vmatprep.subr.mxu1 %v3817_v46 }
 0x5d1   :  { %4212 = vmatpush3.msra.mxu1 %v3817_v46 }
 0x5d2   :  { %4213 = vmatprep.subr.mxu1 %v3816_v47 }
 0x5d3   :  { %4214 = vmatpush3.msra.mxu1 %v3816_v47 }
 0x5d4   :  { %4250 = vmatprep.subr.msk.mxu1 %vm1132_vm3, %v4499_v2 }
 0x68c   :  { %v4184_v57 = vpop.f32.mrf.mxu1 }
 0x68d   :  { %v1764_v3 = vadd.f32 %v4184_v57, %v3797_v32 }
 0x68e   :  { %v1758_v42 = vpop.f32.mrf.mxu1 }
 0x68f   :  { %v5112_v27 = vadd.f32 %v1764_v3, %v1579_v28  ;;  %v1759_v48 = vadd.f32 %v3797_v32, %v1758_v42 }
 0x691   :  { %v1767_v10 = vadd.f32 %v1759_v48, %v1578_v63  ;;  %v1774_v17 = vsel %vm82_vm0, %v5112_v27, 0.0  ;;  %v1778_v18 = vmul.f32 %v5112_v27, %v5112_v27 }
 0x692   :  { %1775 = vadd.xlane.f32.xlu0 %v1774_v17 }
 0x693   :  { %v1771_v50 = vsel %vm82_vm0, %v1767_v10, 0.0  ;;  %v1777_v49 = vmul.f32 %v1767_v10, %v1767_v10  ;;  %v1782_v23 = vsel %vm82_vm0, %v1778_v18, 0.0 }
 0x695   :  { %v1779_v14 = vsel %vm82_vm0, %v1777_v49, 0.0 }
 0x696   :  { %1772 = vadd.xlane.f32.xlu0 %v1771_v50 }
 0x69a   :  { %1780 = vadd.xlane.f32.xlu0 %v1779_v14 }
 0x69e   :  { %1783 = vadd.xlane.f32.xlu0 %v1782_v23 }
 0x71b   :  { %v1776_v31 = vpop.xlane.xlu0 %1775 }
 0x71c   :  { %v1786_v15 = vmul.f32 0.03125, %v1776_v31 }
 0x71e   :  { %v1790_v61 = vmul.f32 %v1786_v15, %v1786_v15  ;;  %v1794_v62 = vsub.f32 %v5112_v27, %v1786_v15 }
 0x71f   :  { %v1773_v33 = vpop.xlane.xlu0 %1772 }
 0x720   :  { %v1785_v35 = vmul.f32 0.03125, %v1773_v33 }
 0x722   :  { %v1789_v38 = vmul.f32 %v1785_v35, %v1785_v35  ;;  %v1793_v0 = vsub.f32 %v1767_v10, %v1785_v35 }
 0x723   :  { %v1781_v36 = vpop.xlane.xlu0 %1780 }
 0x724   :  { %v1787_v39 = vmul.f32 0.03125, %v1781_v36 }
 0x726   :  { %v1791_v41 = vsub.f32 %v1787_v39, %v1789_v38 }
 0x727   :  { %v1784_v43 = vpop.xlane.xlu0 %1783 }
 0x728   :  { %v1795_v44 = vadd.f32 1e-05, %v1791_v41  ;;  %v1788_v25 = vmul.f32 0.03125, %v1784_v43 }
 0x72a   :  { %4419 = vrsqrt.f32 %v1795_v44  ;;  %v1792_v40 = vsub.f32 %v1788_v25, %v1790_v61 }
 0x72c   :  { %v1796_v55 = vadd.f32 1e-05, %v1792_v40 }
 0x72e   :  { %4421 = vrsqrt.f32 %v1796_v55 }
 0x737   :  { %v4420_v34 = vpop.eup %4419 }
 0x738   :  { %v1799_v59 = vmul.f32 %v4420_v34, %v1793_v0 }
 0x73a   :  { %v1805_v11 = vmul.f32 %v3800_v58, %v1799_v59 }
 0x73b   :  { %v4422_v30 = vpop.eup %4421 }
 0x73c   :  { %v1800_v1 = vmul.f32 %v4422_v30, %v1794_v62  ;;  %v5159_v63 = vadd.f32 %v3801_v37, %v1805_v11 }
 0x73e   :  { %v1806_v54 = vmul.f32 %v3800_v58, %v1800_v1  ;;  %4193 = vmatprep.mubr.msk.f32.mxu0 %vm82_vm0, %v5159_v63  ;;  %4215 = vmatprep.mubr.msk.f32.mxu1 %vm82_vm0, %v5159_v63 }
 0x740   :  { %v5165_v28 = vadd.f32 %v3801_v37, %v1806_v54 }
 0x742   :  { %4194 = vmatmul.mubr.msk.f32.vlgmr.msra.gmra.mxu0 %vm82_vm0, %v5165_v28  ;;  %4216 = vmatmul.mubr.msk.f32.vlgmr.msra.gmra.mxu1 %vm82_vm0, %v5165_v28 }
 0x743   :  { %4197 = vmatpush3.msra.mxu0 %v3812_v4  ;;  %4204 = vmatprep.mubr.msk.f32.mxu0 %vm82_vm0, %v5159_v63 }
 0x744   :  { %4198 = vmatprep.subr.mxu0 %v3811_v5  ;;  %4251 = vmatpush3.msk.msra.mxu1 %vm1132_vm3, %v4499_v2 }
 0x745   :  { %4199 = vmatpush3.msra.mxu0 %v3811_v5 }
 0x746   :  { %4200 = vmatprep.subr.mxu0 %v3810_v6 }
 0x747   :  { %4201 = vmatpush3.msra.mxu0 %v3810_v6 }
 0x748   :  { %4202 = vmatprep.subr.mxu0 %v3809_v7 }
 0x749   :  { %4203 = vmatpush3.msra.mxu0 %v3809_v7 }
 0x74a   :  { %4205 = vmatmul.mubr.msk.f32.vlgmr.msra.gmra.mxu0 %vm82_vm0, %v5165_v28  ;;  %4218 = vmatprep.subr.mxu0 %v4500_v53 }
 0x74b   :  { %4219 = vmatpush3.msra.mxu0 %v4500_v53 }
 0x74c   :  { %4220 = vmatprep.subr.mxu0 %v4501_v9 }
 0x74d   :  { %4221 = vmatpush3.msra.mxu0 %v4501_v9 }
 0x74e   :  { %4222 = vmatprep.subr.mxu0 %v4502_v19 }
 0x74f   :  { %4223 = vmatpush3.msra.mxu0 %v4502_v19 }
 0x750   :  { %4224 = vmatprep.subr.mxu0 %v4503_v16 }
 0x751   :  { %4225 = vmatpush3.msra.mxu0 %v4503_v16 }
 0x802   :  { %v4195_v12 = vpop.f32.mrf.mxu0 }
 0x803   :  { %v1901_v14 = vadd.f32 %v4195_v12, %v3806_v13 }
 0x804   :  { %v1895_v29 = vpop.f32.mrf.mxu0 }
 0x805   :  { %v1896_v21 = vadd.f32 %v3806_v13, %v1895_v29  ;;  %v2132_v4 = vrot.slane %v1901_v14, %v4740_v45  ;;  %v2125_v36 = vcombine.high %v1901_v14, %v1901_v14 }
 0x807   :  { %v2076_v32 = vcombine.high %v1896_v21, %v1896_v21  ;;  %v2083_v57 = vrot.slane %v1896_v21, %v4740_v45  ;;  %v2140_v15 = vcombine.high %v2132_v4, %v2132_v4  ;;  %v2148_v43 = vrot.slane %v2132_v4, %v4740_v45 }
 0x808   :  { %v2139_v25 = vrot.slane %v2125_v36, %v4740_v45 }
 0x809   :  { %v2090_v3 = vrot.slane %v2076_v32, %v4740_v45  ;;  %v2091_v42 = vcombine.high %v2083_v57, %v2083_v57  ;;  %v2099_v27 = vrot.slane %v2083_v57, %v4740_v45  ;;  %v2162_v40 = vrot.slane %v2140_v15, %v4740_v45 }
 0x80a   :  { %v4206_v48 = vpop.f32.mrf.mxu0  ;;  %v2170_v34 = vcombine.high %v2148_v43, %v2148_v43  ;;  %v2209_v58 = vrot.slane %v2148_v43, %v4745_v52  ;;  %v2141_v62 = vcombine.high %v2139_v25, %v2139_v25  ;;  %v2155_v54 = vrot.slane %v2139_v25, %v4740_v45 }
 0x80b   :  { %v2113_v17 = vrot.slane %v2091_v42, %v4740_v45  ;;  %v2121_v50 = vcombine.high %v2099_v27, %v2099_v27  ;;  %v2177_v49 = vrot.slane %v2099_v27, %v4745_v52  ;;  %v2092_v18 = vcombine.high %v2090_v3, %v2090_v3 }
 0x80c   :  { %v1980_v10 = vpop.f32.mrf.mxu0  ;;  %v2106_v23 = vrot.slane %v2090_v3, %v4740_v45  ;;  %v1986_v59 = vadd.f32 %v4206_v48, %v3813_v24  ;;  %v2172_v11 = vcombine.high %v2162_v40, %v2162_v40  ;;  %v2213_v30 = vrot.slane %v2162_v40, %v4745_v52 }
 0x80d   :  { %v2123_v26 = vcombine.high %v2113_v17, %v2113_v17  ;;  %v2181_v22 = vrot.slane %v2113_v17, %v4745_v52  ;;  %v2185_v20 = vrot.slane %v2121_v50, %v4745_v52  ;;  %v1981_v8 = vadd.f32 %v3813_v24, %v1980_v10 }
 0x80e   :  { %v2120_v2 = vrot.slane %v2092_v18, %v4740_v45  ;;  %v2122_v33 = vcombine.high %v2106_v23, %v2106_v23  ;;  %v2193_v35 = vrot.slane %v2106_v23, %v4745_v52  ;;  %v2217_v5 = vrot.slane %v2170_v34, %v4745_v52 }
 0x80f   :  { %v2254_v46 = vmul.f32 %v2177_v49, %v1981_v8  ;;  %v2255_v56 = vmul.f32 %v2181_v22, %v1981_v8  ;;  %v2256_v47 = vmul.f32 %v2185_v20, %v1981_v8  ;;  %v2189_v31 = vrot.slane %v2123_v26, %v4745_v52 }
 0x810   :  { %v2124_v38 = vcombine.high %v2120_v2, %v2120_v2  ;;  %v2197_v41 = vrot.slane %v2120_v2, %v4745_v52  ;;  %v2258_v61 = vmul.f32 %v2193_v35, %v1981_v8  ;;  %v2201_v44 = vrot.slane %v2122_v33, %v4745_v52 }
 0x811   :  { %4226 = vmatprep.mubr.msk.f32.mxu0 %vm82_vm0, %v2254_v46  ;;  %v2257_v39 = vmul.f32 %v2189_v31, %v1981_v8  ;;  %v2262_v6 = vmul.f32 %v2209_v58, %v1986_v59  ;;  %v2169_v7 = vrot.slane %v2141_v62, %v4740_v45  ;;  %v2263_v53 = vmul.f32 %v2213_v30, %v1986_v59 }
 0x812   :  { %4227 = vmatmul.mubr.msk.f32.vlgmr.msra.gmra.mxu0 %vm82_vm0, %v2255_v56  ;;  %v2259_v55 = vmul.f32 %v2197_v41, %v1981_v8  ;;  %v2205_v0 = vrot.slane %v2124_v38, %v4745_v52  ;;  %v2260_v37 = vmul.f32 %v2201_v44, %v1981_v8  ;;  %v2221_v9 = vrot.slane %v2172_v11, %v4745_v52 }
 0x813   :  { %4229 = vmatprep.mubr.msk.f32.mxu0 %vm82_vm0, %v2256_v47  ;;  %v2171_v19 = vcombine.high %v2155_v54, %v2155_v54  ;;  %v2225_v16 = vrot.slane %v2155_v54, %v4745_v52  ;;  %v2264_v12 = vmul.f32 %v2217_v5, %v1986_v59  ;;  %v2173_v13 = vcombine.high %v2169_v7, %v2169_v7 }
 0x814   :  { %v2261_v1 = vmul.f32 %v2205_v0, %v1981_v8  ;;  %v2265_v29 = vmul.f32 %v2221_v9, %v1986_v59  ;;  %v2229_v21 = vrot.slane %v2169_v7, %v4745_v52 }
 0x815   :  { %v2266_v32 = vmul.f32 %v2225_v16, %v1986_v59  ;;  %v2233_v57 = vrot.slane %v2171_v19, %v4745_v52  ;;  %v2237_v3 = vrot.slane %v2173_v13, %v4745_v52 }
 0x816   :  { %4230 = vmatmul.mubr.msk.f32.gmra.mxu0 %vm82_vm0, %v2257_v39  ;;  %v2267_v45 = vmul.f32 %v2229_v21, %v1986_v59 }
 0x817   :  { %4232 = vmatprep.mubr.msk.f32.mxu0 %vm82_vm0, %v2258_v61  ;;  %v2268_v42 = vmul.f32 %v2233_v57, %v1986_v59  ;;  %v2269_v27 = vmul.f32 %v2237_v3, %v1986_v59 }
 0x81a   :  { %4233 = vmatmul.mubr.msk.f32.gmra.mxu0 %vm82_vm0, %v2259_v55 }
 0x81b   :  { %4235 = vmatprep.mubr.msk.f32.mxu0 %vm82_vm0, %v2260_v37 }
 0x81e   :  { %4236 = vmatmul.mubr.msk.f32.gmra.mxu0 %vm82_vm0, %v2261_v1 }
 0x81f   :  { %4238 = vmatprep.mubr.msk.f32.mxu0 %vm82_vm0, %v2262_v6 }
 0x822   :  { %4239 = vmatmul.mubr.msk.f32.gmra.mxu0 %vm82_vm0, %v2263_v53 }
 0x823   :  { %4241 = vmatprep.mubr.msk.f32.mxu0 %vm82_vm0, %v2264_v12 }
 0x826   :  { %4242 = vmatmul.mubr.msk.f32.gmra.mxu0 %vm82_vm0, %v2265_v29 }
 0x827   :  { %4244 = vmatprep.mubr.msk.f32.mxu0 %vm82_vm0, %v2266_v32 }
 0x82a   :  { %4245 = vmatmul.mubr.msk.f32.gmra.mxu0 %vm82_vm0, %v2267_v45 }
 0x82b   :  { %4247 = vmatprep.mubr.msk.f32.mxu0 %vm82_vm0, %v2268_v42 }
 0x82e   :  { %4248 = vmatmul.mubr.msk.f32.gmra.mxu0 %vm82_vm0, %v2269_v27 }
 0x8d2   :  { %v4228_v48 = vpop.f32.mrf.mxu0 }
 0x8d3   :  { %v2464_v10 = vadd.f32 %v4228_v48, %v4796_v51 }
 0x8d4   :  { %v2384_v17 = vpop.f32.mrf.mxu0 }
 0x8d5   :  { %v2486_v50 = vsel %vm779_vm4, %v2464_v10, -inf  ;;  %v2463_v49 = vadd.f32 %v2384_v17, %v4796_v51 }
 0x8d6   :  { %v2487_v14 = vrot.slane %v2486_v50, 4  ;;  %v4231_v18 = vpop.f32.mrf.mxu0 }
 0x8d7   :  { %v2479_v52 = vsel %vm779_vm4, %v2463_v49, -inf  ;;  %v5252_v23 = vadd.f32 %v4231_v18, %v4796_v51 }
 0x8d8   :  { %v2488_v24 = vmax.f32 %v2486_v50, %v2487_v14  ;;  %v2480_v26 = vrot.slane %v2479_v52, 4  ;;  %v2394_v22 = vpop.f32.mrf.mxu0 }
 0x8d9   :  { %v2500_v20 = vsel %vm779_vm4, %v5252_v23, -inf  ;;  %v5257_v8 = vadd.f32 %v2394_v22, %v4796_v51 }
 0x8da   :  { %v2489_v46 = vrot.slane %v2488_v24, 2  ;;  %v2481_v56 = vmax.f32 %v2479_v52, %v2480_v26  ;;  %v2501_v47 = vrot.slane %v2500_v20, 4  ;;  %v4234_v4 = vpop.f32.mrf.mxu0 }
 0x8db   :  { %v2493_v2 = vsel %vm779_vm4, %v5257_v8, -inf  ;;  %v5262_v31 = vadd.f32 %v4234_v4, %v4796_v51 }
 0x8dc   :  { %v2490_v33 = vmax.f32 %v2488_v24, %v2489_v46  ;;  %v2482_v35 = vrot.slane %v2481_v56, 2  ;;  %v2502_v36 = vmax.f32 %v2500_v20, %v2501_v47  ;;  %v2494_v15 = vrot.slane %v2493_v2, 4  ;;  %v2404_v38 = vpop.f32.mrf.mxu0 }
 0x8dd   :  { %v2514_v39 = vsel %vm779_vm4, %v5262_v31, -inf  ;;  %v5267_v41 = vadd.f32 %v2404_v38, %v4796_v51 }
 0x8de   :  { %v2491_v43 = vrot.slane %v2490_v33, 1  ;;  %v2483_v61 = vmax.f32 %v2481_v56, %v2482_v35  ;;  %v2503_v44 = vrot.slane %v2502_v36, 2  ;;  %v2495_v25 = vmax.f32 %v2493_v2, %v2494_v15  ;;  %v4237_v40 = vpop.f32.mrf.mxu0 }
 0x8df   :  { %v2515_v55 = vrot.slane %v2514_v39, 4  ;;  %v2507_v0 = vsel %vm779_vm4, %v5267_v41, -inf  ;;  %v5272_v34 = vadd.f32 %v4237_v40, %v4796_v51 }
 0x8e0   :  { %v2492_v58 = vmax.f32 %v2490_v33, %v2491_v43  ;;  %v2484_v59 = vrot.slane %v2483_v61, 1  ;;  %v2504_v37 = vmax.f32 %v2502_v36, %v2503_v44  ;;  %v2496_v62 = vrot.slane %v2495_v25, 2  ;;  %v2414_v11 = vpop.f32.mrf.mxu0 }
 0x8e1   :  { %v2516_v30 = vmax.f32 %v2514_v39, %v2515_v55  ;;  %v2508_v1 = vrot.slane %v2507_v0, 4  ;;  %v2528_v54 = vsel %vm779_vm4, %v5272_v34, -inf  ;;  %v5277_v5 = vadd.f32 %v2414_v11, %v4796_v51 }
 0x8e2   :  { %v2592_v6 = vsub.f32 %v2464_v10, %v2492_v58  ;;  %v2485_v7 = vmax.f32 %v2483_v61, %v2484_v59  ;;  %v2505_v53 = vrot.slane %v2504_v37, 1  ;;  %v2497_v9 = vmax.f32 %v2495_v25, %v2496_v62  ;;  %v4240_v19 = vpop.f32.mrf.mxu0 }
 0x8e3   :  { %v2517_v16 = vrot.slane %v2516_v30, 2  ;;  %v2509_v12 = vmax.f32 %v2507_v0, %v2508_v1  ;;  %v2529_v13 = vrot.slane %v2528_v54, 4  ;;  %v2521_v29 = vsel %vm779_vm4, %v5277_v5, -inf }
 0x8e4   :  { %v2609_v21 = vmul.f32 1.442695, %v2592_v6  ;;  %v2591_v32 = vsub.f32 %v2463_v49, %v2485_v7  ;;  %v2506_v57 = vmax.f32 %v2504_v37, %v2505_v53  ;;  %v2498_v45 = vrot.slane %v2497_v9, 1  ;;  %v2424_v3 = vpop.f32.mrf.mxu0 }
 0x8e5   :  { %v2518_v42 = vmax.f32 %v2516_v30, %v2517_v16  ;;  %v2510_v27 = vrot.slane %v2509_v12, 2  ;;  %v2530_v51 = vmax.f32 %v2528_v54, %v2529_v13  ;;  %v2522_v48 = vrot.slane %v2521_v29, 4 }
 0x8e6   :  { %4423 = vpow2.f32 %v2609_v21  ;;  %v2607_v10 = vmul.f32 1.442695, %v2591_v32  ;;  %v2594_v17 = vsub.f32 %v5252_v23, %v2506_v57  ;;  %v2499_v50 = vmax.f32 %v2497_v9, %v2498_v45  ;;  %v4243_v26 = vpop.f32.mrf.mxu0 }
 0x8e7   :  { %v2519_v14 = vrot.slane %v2518_v42, 1  ;;  %v2511_v18 = vmax.f32 %v2509_v12, %v2510_v27  ;;  %v2531_v52 = vrot.slane %v2530_v51, 2  ;;  %v2523_v24 = vmax.f32 %v2521_v29, %v2522_v48 }
 0x8e8   :  { %4425 = vpow2.f32 %v2607_v10  ;;  %v2613_v22 = vmul.f32 1.442695, %v2594_v17  ;;  %v2593_v49 = vsub.f32 %v5257_v8, %v2499_v50  ;;  %v5284_v20 = vadd.f32 %v4240_v19, %v4833_v60  ;;  %v2434_v38 = vpop.f32.mrf.mxu0 }
 0x8e9   :  { %v2520_v46 = vmax.f32 %v2518_v42, %v2519_v14  ;;  %v2512_v56 = vrot.slane %v2511_v18, 1  ;;  %v2532_v47 = vmax.f32 %v2530_v51, %v2531_v52  ;;  %v2524_v4 = vrot.slane %v2523_v24, 2 }
 0x8ea   :  { %4427 = vpow2.f32 %v2613_v22  ;;  %v2611_v2 = vmul.f32 1.442695, %v2593_v49  ;;  %v2542_v23 = vsel %vm779_vm4, %v5284_v20, -inf  ;;  %v5289_v33 = vadd.f32 %v2424_v3, %v4833_v60  ;;  %v4246_v6 = vpop.f32.mrf.mxu0 }
 0x8eb   :  { %v2596_v35 = vsub.f32 %v5262_v31, %v2520_v46  ;;  %v2513_v36 = vmax.f32 %v2511_v18, %v2512_v56  ;;  %v2533_v15 = vrot.slane %v2532_v47, 1  ;;  %v2525_v8 = vmax.f32 %v2523_v24, %v2524_v4 }
 0x8ec   :  { %4429 = vpow2.f32 %v2611_v2  ;;  %v2543_v39 = vrot.slane %v2542_v23, 4  ;;  %v2535_v43 = vsel %vm779_vm4, %v5289_v33, -inf  ;;  %v5295_v61 = vadd.f32 %v4243_v26, %v4833_v60 }
 0x8ed   :  { %v2617_v44 = vmul.f32 1.442695, %v2596_v35  ;;  %v2595_v25 = vsub.f32 %v5267_v41, %v2513_v36  ;;  %v2534_v40 = vmax.f32 %v2532_v47, %v2533_v15  ;;  %v2526_v55 = vrot.slane %v2525_v8, 1 }
 0x8ee   :  { %v2544_v0 = vmax.f32 %v2542_v23, %v2543_v39  ;;  %v2536_v58 = vrot.slane %v2535_v43, 4  ;;  %v2556_v31 = vsel %vm779_vm4, %v5295_v61, -inf  ;;  %v5301_v59 = vadd.f32 %v2434_v38, %v4833_v60 }
 0x8ef   :  { %4431 = vpow2.f32 %v2617_v44  ;;  %v2615_v37 = vmul.f32 1.442695, %v2595_v25  ;;  %v2598_v62 = vsub.f32 %v5272_v34, %v2534_v40  ;;  %v2527_v11 = vmax.f32 %v2525_v8, %v2526_v55 }
 0x8f0   :  { %v2545_v30 = vrot.slane %v2544_v0, 2  ;;  %v2537_v1 = vmax.f32 %v2535_v43, %v2536_v58  ;;  %v2557_v54 = vrot.slane %v2556_v31, 4  ;;  %v2549_v41 = vsel %vm779_vm4, %v5301_v59, -inf }
 0x8f1   :  { %4433 = vpow2.f32 %v2615_v37  ;;  %v2621_v7 = vmul.f32 1.442695, %v2598_v62  ;;  %v2597_v53 = vsub.f32 %v5277_v5, %v2527_v11  ;;  %v2550_v9 = vrot.slane %v2549_v41, 4 }
 0x8f2   :  { %v2546_v19 = vmax.f32 %v2544_v0, %v2545_v30  ;;  %v2538_v16 = vrot.slane %v2537_v1, 2  ;;  %v2558_v12 = vmax.f32 %v2556_v31, %v2557_v54  ;;  %v5310_v21 = vadd.f32 %v4246_v6, %v4833_v60 }
 0x8f3   :  { %v5307_v13 = vpop.eup %4423  ;;  %4435 = vpow2.f32 %v2621_v7  ;;  %v2619_v34 = vmul.f32 1.442695, %v2597_v53  ;;  %v2551_v29 = vmax.f32 %v2549_v41, %v2550_v9 }
 0x8f4   :  { %v2646_v32 = vsel %vm779_vm4, %v5307_v13, 0.0  ;;  %v2547_v57 = vrot.slane %v2546_v19, 1  ;;  %v2539_v45 = vmax.f32 %v2537_v1, %v2538_v16  ;;  %v2559_v3 = vrot.slane %v2558_v12, 2 }
 0x8f5   :  { %v5314_v42 = vpop.eup %4425  ;;  %v2647_v5 = vrot.slane %v2646_v32, 4  ;;  %4437 = vpow2.f32 %v2619_v34  ;;  %v2552_v27 = vrot.slane %v2551_v29, 2  ;;  %v2570_v24 = vsel %vm779_vm4, %v5310_v21, -inf }
 0x8f6   :  { %v2639_v51 = vsel %vm779_vm4, %v5314_v42, 0.0  ;;  %v2548_v48 = vmax.f32 %v2546_v19, %v2547_v57  ;;  %v2540_v10 = vrot.slane %v2539_v45, 1  ;;  %v2560_v17 = vmax.f32 %v2558_v12, %v2559_v3 }
 0x8f7   :  { %v5318_v50 = vpop.eup %4427  ;;  %v2648_v14 = vadd.f32 %v2647_v5, %v2646_v32  ;;  %v2640_v18 = vrot.slane %v2639_v51, 4  ;;  %v2553_v52 = vmax.f32 %v2551_v29, %v2552_v27  ;;  %v2571_v44 = vrot.slane %v2570_v24, 4 }
 0x8f8   :  { %v2660_v26 = vsel %vm779_vm4, %v5318_v50, 0.0  ;;  %v2600_v22 = vsub.f32 %v5284_v20, %v2548_v48  ;;  %v2541_v49 = vmax.f32 %v2539_v45, %v2540_v10  ;;  %v2561_v46 = vrot.slane %v2560_v17, 1  ;;  %v2444_v20 = vpop.f32.mrf.mxu0 }
 0x8f9   :  { %v5325_v56 = vpop.eup %4429  ;;  %v2649_v47 = vrot.slane %v2648_v14, 2  ;;  %v2641_v4 = vadd.f32 %v2640_v18, %v2639_v51  ;;  %v2661_v2 = vrot.slane %v2660_v26, 4  ;;  %v2554_v23 = vrot.slane %v2553_v52, 1 }
 0x8fa   :  { %v2653_v35 = vsel %vm779_vm4, %v5325_v56, 0.0  ;;  %v2625_v36 = vmul.f32 1.442695, %v2600_v22  ;;  %v2599_v15 = vsub.f32 %v5289_v33, %v2541_v49  ;;  %v2562_v8 = vmax.f32 %v2560_v17, %v2561_v46  ;;  %v4249_v6 = vpop.f32.mrf.mxu0 }
 0x8fb   :  { %v2650_v38 = vadd.f32 %v2649_v47, %v2648_v14  ;;  %v2662_v39 = vadd.f32 %v2661_v2, %v2660_v26  ;;  %v2654_v43 = vrot.slane %v2653_v35, 4  ;;  %v2555_v0 = vmax.f32 %v2553_v52, %v2554_v23 }
 0x8fc   :  { %v5330_v25 = vpop.eup %4431  ;;  %4439 = vpow2.f32 %v2625_v36  ;;  %v2623_v40 = vmul.f32 1.442695, %v2599_v15  ;;  %v2602_v55 = vsub.f32 %v5295_v61, %v2562_v8  ;;  %v2642_v31 = vrot.slane %v2641_v4, 2  ;;  %v2454_v51 = vpop.f32.mrf.mxu0 }
 0x8fd   :  { %v2651_v58 = vrot.slane %v2650_v38, 1  ;;  %v2663_v37 = vrot.slane %v2662_v39, 2  ;;  %v2655_v62 = vadd.f32 %v2654_v43, %v2653_v35  ;;  %v2674_v33 = vsel %vm779_vm4, %v5330_v25, 0.0 }
 0x8fe   :  { %v5333_v11 = vpop.eup %4433  ;;  %4441 = vpow2.f32 %v2623_v40  ;;  %v2629_v30 = vmul.f32 1.442695, %v2602_v55  ;;  %v2601_v1 = vsub.f32 %v5301_v59, %v2555_v0  ;;  %v5339_v41 = vadd.f32 %v2444_v20, %v4833_v60 }
 0x8ff   :  { %v2656_v54 = vrot.slane %v2655_v62, 2  ;;  %v2675_v7 = vrot.slane %v2674_v33, 4  ;;  %v2667_v53 = vsel %vm779_vm4, %v5333_v11, 0.0  ;;  %v2652_v19 = vadd.f32 %v2651_v58, %v2650_v38 }
 0x900   :  { %v5341_v61 = vpop.eup %4435  ;;  %4443 = vpow2.f32 %v2629_v30  ;;  %v2627_v9 = vmul.f32 1.442695, %v2601_v1  ;;  %v2643_v16 = vadd.f32 %v2642_v31, %v2641_v4  ;;  %v5345_v12 = vadd.f32 %v2663_v37, %v2662_v39 }
 0x901   :  { %v2668_v34 = vrot.slane %v2667_v53, 4  ;;  %v2676_v59 = vadd.f32 %v2675_v7, %v2674_v33  ;;  %v2688_v32 = vsel %vm779_vm4, %v5341_v61, 0.0  ;;  %v2572_v57 = vmax.f32 %v2570_v24, %v2571_v44 }
 0x902   :  { %v5347_v29 = vpop.eup %4437  ;;  %4445 = vpow2.f32 %v2627_v9  ;;  %v5351_v45 = vadd.f32 %v2656_v54, %v2655_v62  ;;  %v2689_v5 = vrot.slane %v2688_v32, 4  ;;  %v2563_v14 = vsel %vm779_vm4, %v5339_v41, -inf }
 0x903   :  { %v2669_v3 = vadd.f32 %v2668_v34, %v2667_v53  ;;  %v2681_v27 = vsel %vm779_vm4, %v5347_v29, 0.0  ;;  %v2677_v48 = vrot.slane %v2676_v59, 2  ;;  %v2573_v17 = vrot.slane %v2572_v57, 2 }
 0x904   :  { %v2682_v10 = vrot.slane %v2681_v27, 4  ;;  %v2690_v52 = vadd.f32 %v2689_v5, %v2688_v32  ;;  %v2564_v26 = vrot.slane %v2563_v14, 4  ;;  %v5358_v22 = vadd.f32 %v4249_v6, %v4833_v60 }
 0x905   :  { %v2670_v18 = vrot.slane %v2669_v3, 2  ;;  %v2644_v24 = vrot.slane %v2643_v16, 1  ;;  %v5360_v49 = vadd.f32 %v2677_v48, %v2676_v59  ;;  %v2574_v46 = vmax.f32 %v2572_v57, %v2573_v17 }
 0x906   :  { %v5363_v47 = vadd.f32 %v2454_v51, %v4833_v60  ;;  %4447 = vrcp.f32 %v2652_v19  ;;  %v2683_v4 = vadd.f32 %v2682_v10, %v2681_v27  ;;  %v2565_v2 = vmax.f32 %v2563_v14, %v2564_v26 }
 0x907   :  { %v2584_v23 = vsel %vm779_vm4, %v5358_v22, -inf  ;;  %v2665_v35 = vrot.slane %v5345_v12, 1  ;;  %v2691_v36 = vrot.slane %v2690_v52, 2  ;;  %v2575_v15 = vrot.slane %v2574_v46, 1 }
 0x908   :  { %v2585_v8 = vrot.slane %v2584_v23, 4  ;;  %v2658_v39 = vrot.slane %v5351_v45, 1  ;;  %v2671_v43 = vadd.f32 %v2670_v18, %v2669_v3  ;;  %v2566_v44 = vrot.slane %v2565_v2, 2 }
 0x909   :  { %v5368_v38 = vpop.eup %4439  ;;  %v2577_v60 = vsel %vm779_vm4, %v5363_v47, -inf  ;;  %v2679_v20 = vrot.slane %v5360_v49, 1  ;;  %v2576_v55 = vmax.f32 %v2574_v46, %v2575_v15  ;;  %v2684_v31 = vrot.slane %v2683_v4, 2 }
 0x90a   :  { %v2702_v40 = vsel %vm779_vm4, %v5368_v38, 0.0  ;;  %v2586_v0 = vmax.f32 %v2584_v23, %v2585_v8  ;;  %v2567_v62 = vmax.f32 %v2565_v2, %v2566_v44  ;;  %v2578_v33 = vrot.slane %v2577_v60, 4 }
 0x90b   :  { %v5376_v58 = vpop.eup %4441  ;;  %v2703_v37 = vrot.slane %v2702_v40, 4  ;;  %v2692_v30 = vadd.f32 %v2691_v36, %v2690_v52  ;;  %v2604_v54 = vsub.f32 %v5310_v21, %v2576_v55  ;;  %v2645_v3 = vadd.f32 %v2644_v24, %v2643_v16 }
 0x90c   :  { %v2695_v1 = vsel %vm779_vm4, %v5376_v58, 0.0  ;;  %v2587_v6 = vrot.slane %v2586_v0, 2  ;;  %v2568_v19 = vrot.slane %v2567_v62, 1  ;;  %v2579_v34 = vmax.f32 %v2577_v60, %v2578_v33 }
 0x90d   :  { %v5381_v7 = vpop.eup %4443  ;;  %v2704_v53 = vadd.f32 %v2703_v37, %v2702_v40  ;;  %v2696_v9 = vrot.slane %v2695_v1, 4  ;;  %v2633_v32 = vmul.f32 1.442695, %v2604_v54  ;;  %v2685_v27 = vadd.f32 %v2684_v31, %v2683_v4 }
 0x90e   :  { %v2716_v59 = vsel %vm779_vm4, %v5381_v7, 0.0  ;;  %v2588_v57 = vmax.f32 %v2586_v0, %v2587_v6  ;;  %v2569_v10 = vmax.f32 %v2567_v62, %v2568_v19  ;;  %v2580_v14 = vrot.slane %v2579_v34, 2 }
 0x90f   :  { %v5385_v5 = vpop.eup %4445  ;;  %v2697_v51 = vadd.f32 %v2696_v9, %v2695_v1  ;;  %v2717_v48 = vrot.slane %v2716_v59, 4  ;;  %4449 = vpow2.f32 %v2633_v32  ;;  %v2705_v18 = vrot.slane %v2704_v53, 2 }
 0x910   :  { %v2709_v21 = vsel %vm779_vm4, %v5385_v5, 0.0  ;;  %v2589_v17 = vrot.slane %v2588_v57, 1  ;;  %v2603_v2 = vsub.f32 %v5339_v41, %v2569_v10  ;;  %v2581_v16 = vmax.f32 %v2579_v34, %v2580_v14 }
 0x911   :  { %v2698_v52 = vrot.slane %v2697_v51, 2  ;;  %v2718_v26 = vadd.f32 %v2717_v48, %v2716_v59  ;;  %v2710_v46 = vrot.slane %v2709_v21, 4  ;;  %4451 = vrcp.f32 %v2645_v3 }
 0x912   :  { %v2590_v23 = vmax.f32 %v2588_v57, %v2589_v17  ;;  %v2672_v24 = vrot.slane %v2671_v43, 1  ;;  %v2693_v4 = vrot.slane %v2692_v30, 1  ;;  %v2686_v44 = vrot.slane %v2685_v27, 1 }
 0x913   :  { %v2699_v36 = vadd.f32 %v2698_v52, %v2697_v51  ;;  %v2711_v15 = vadd.f32 %v2710_v46, %v2709_v21  ;;  %v4448_v8 = vpop.eup %4447  ;;  %v2631_v60 = vmul.f32 1.442695, %v2603_v2  ;;  %v2582_v55 = vrot.slane %v2581_v16, 1 }
 0x914   :  { %v2606_v40 = vsub.f32 %v5358_v22, %v2590_v23  ;;  %v2706_v0 = vadd.f32 %v2705_v18, %v2704_v53  ;;  %v2719_v31 = vrot.slane %v2718_v26, 2  ;;  %v2659_v62 = vadd.f32 %v2658_v39, %v5351_v45 }
 0x915   :  { %v2712_v37 = vrot.slane %v2711_v15, 2  ;;  %4453 = vpow2.f32 %v2631_v60  ;;  %v2583_v33 = vmax.f32 %v2581_v16, %v2582_v55  ;;  %v2666_v1 = vadd.f32 %v2665_v35, %v5345_v12 }
 0x916   :  { %v2637_v41 = vmul.f32 1.442695, %v2606_v40  ;;  %v2700_v54 = vrot.slane %v2699_v36, 1  ;;  %4455 = vrcp.f32 %v2659_v62  ;;  %v2673_v9 = vadd.f32 %v2672_v24, %v2671_v43 }
 0x917   :  { %v2713_v6 = vadd.f32 %v2712_v37, %v2711_v15  ;;  %v2605_v22 = vsub.f32 %v5363_v47, %v2583_v33  ;;  %v2680_v53 = vadd.f32 %v2679_v20, %v5360_v49  ;;  %v2687_v19 = vadd.f32 %v2686_v44, %v2685_v27 }
 0x918   :  { %4457 = vpow2.f32 %v2637_v41  ;;  %v2694_v39 = vadd.f32 %v2693_v4, %v2692_v30  ;;  %v2707_v59 = vrot.slane %v2706_v0, 1  ;;  %v2720_v32 = vadd.f32 %v2719_v31, %v2718_v26 }
 0x919   :  { %4459 = vrcp.f32 %v2666_v1  ;;  %v2714_v34 = vrot.slane %v2713_v6, 1  ;;  %v2635_v45 = vmul.f32 1.442695, %v2605_v22  ;;  %v2701_v57 = vadd.f32 %v2700_v54, %v2699_v36 }
 0x91a   :  { %4461 = vrcp.f32 %v2673_v9  ;;  %v2721_v43 = vrot.slane %v2720_v32, 1  ;;  %v2708_v3 = vadd.f32 %v2707_v59, %v2706_v0  ;;  %v2768_v51 = vmul.f32 %v4448_v8, %v5307_v13 }
 0x91b   :  { %4463 = vrcp.f32 %v2680_v53  ;;  %v2715_v47 = vadd.f32 %v2714_v34, %v2713_v6 }
 0x91c   :  { %4465 = vpow2.f32 %v2635_v45  ;;  %v5397_v12 = vpop.eup %4449  ;;  %v2722_v21 = vadd.f32 %v2721_v43, %v2720_v32 }
 0x91d   :  { %4467 = vrcp.f32 %v2687_v19  ;;  %v2730_v35 = vsel %vm779_vm4, %v5397_v12, 0.0 }
 0x91e   :  { %4469 = vrcp.f32 %v2694_v39  ;;  %v4452_v49 = vpop.eup %4451  ;;  %v2731_v20 = vrot.slane %v2730_v35, 4 }
 0x91f   :  { %4471 = vrcp.f32 %v2701_v57  ;;  %v2767_v30 = vmul.f32 %v4452_v49, %v5314_v42 }
 0x920   :  { %v2732_v27 = vadd.f32 %v2731_v20, %v2730_v35  ;;  %4473 = vrcp.f32 %v2715_v47 }
 0x921   :  { %4252 = vmatprep.mubr.msk.f32.mxu1 %vm779_vm4, %v2767_v30  ;;  %4475 = vrcp.f32 %v2708_v3  ;;  %v3857_v30 = vld [vmem:[%s5647_s10 + $0x28] sm:$0xff] }
 0x922   :  { %v5404_v48 = vpop.eup %4453  ;;  %v2733_v10 = vrot.slane %v2732_v27, 2  ;;  %4253 = vmatmul.mubr.msk.f32.vlgmr.msra.gmra.mxu1 %vm779_vm4, %v2768_v51  ;;  %4477 = vrcp.f32 %v2722_v21  ;;  %v4217_v51 = vpop.f32.mrf.mxu1 }
 0x923   :  { %v4456_v17 = vpop.eup %4455  ;;  %v2723_v14 = vsel %vm779_vm4, %v5404_v48, 0.0 }
 0x924   :  { %v2734_v42 = vadd.f32 %v2733_v10, %v2732_v27  ;;  %v2724_v52 = vrot.slane %v2723_v14, 4  ;;  %v2769_v13 = vmul.f32 %v4456_v17, %v5325_v56  ;;  %v3856_v27 = vld [vmem:[%s5647_s10 + $0x20] sm:$0xff] }
 0x925   :  { %v5409_v18 = vpop.eup %4457  ;;  %v3820_v10 = vld [vmem:[%s5646_s9 + $0x1] ss:$0 sm:$0xff] }
 0x926   :  { %v4460_v26 = vpop.eup %4459  ;;  %v2744_v46 = vsel %vm779_vm4, %v5409_v18, 0.0  ;;  %v2725_v23 = vadd.f32 %v2724_v52, %v2723_v14  ;;  %4255 = vmatprep.mubr.msk.f32.mxu1 %vm779_vm4, %v2769_v13  ;;  %v2735_v36 = vrot.slane %v2734_v42, 1 }
 0x927   :  { %v4462_v2 = vpop.eup %4461  ;;  %v2745_v16 = vrot.slane %v2744_v46, 4  ;;  %v2770_v24 = vmul.f32 %v4460_v26, %v5318_v50 }
 0x928   :  { %v4464_v4 = vpop.eup %4463  ;;  %v2771_v15 = vmul.f32 %v4462_v2, %v5333_v11  ;;  %v2726_v44 = vrot.slane %v2725_v23, 2  ;;  %v2736_v11 = vadd.f32 %v2735_v36, %v2734_v42 }
 0x929   :  { %v4466_v8 = vpop.eup %4465  ;;  %v2746_v60 = vadd.f32 %v2745_v16, %v2744_v46  ;;  %4256 = vmatmul.mubr.msk.f32.gmra.mxu1 %vm779_vm4, %v2770_v24  ;;  %v2772_v55 = vmul.f32 %v4464_v4, %v5330_v25 }
 0x92a   :  { %v4468_v56 = vpop.eup %4467  ;;  %v2737_v40 = vsel %vm779_vm4, %v4466_v8, 0.0  ;;  %4258 = vmatprep.mubr.msk.f32.mxu1 %vm779_vm4, %v2771_v15  ;;  %v2727_v31 = vadd.f32 %v2726_v44, %v2725_v23  ;;  %4479 = vrcp.f32 %v2736_v11 }
 0x92b   :  { %v4470_v0 = vpop.eup %4469  ;;  %v2747_v50 = vrot.slane %v2746_v60, 2  ;;  %v2738_v37 = vrot.slane %v2737_v40, 4  ;;  %v2773_v62 = vmul.f32 %v4468_v56, %v5347_v29 }
 0x92c   :  { %v4472_v41 = vpop.eup %4471  ;;  %v2728_v33 = vrot.slane %v2727_v31, 1  ;;  %v2774_v53 = vmul.f32 %v4470_v0, %v5341_v61 }
 0x92d   :  { %v2748_v1 = vadd.f32 %v2747_v50, %v2746_v60  ;;  %v2739_v54 = vadd.f32 %v2738_v37, %v2737_v40  ;;  %4259 = vmatmul.mubr.msk.f32.gmra.mxu1 %vm779_vm4, %v2772_v55  ;;  %v2775_v6 = vmul.f32 %v4472_v41, %v5376_v58  ;;  %v4474_v9 = vpop.eup %4473 }
 0x92e   :  { %4261 = vmatprep.mubr.msk.f32.mxu1 %vm779_vm4, %v2773_v62  ;;  %v2729_v19 = vadd.f32 %v2728_v33, %v2727_v31  ;;  %v4476_v34 = vpop.eup %4475  ;;  %v2777_v45 = vmul.f32 %v4474_v9, %v5385_v5 }
 0x92f   :  { %v2749_v22 = vrot.slane %v2748_v1, 1  ;;  %v2740_v25 = vrot.slane %v2739_v54, 2  ;;  %v2776_v58 = vmul.f32 %v4476_v34, %v5368_v38  ;;  %v4478_v32 = vpop.eup %4477 }
 0x930   :  { %4481 = vrcp.f32 %v2729_v19  ;;  %v2778_v61 = vmul.f32 %v4478_v32, %v5381_v7  ;;  %v3859_v7 = vld [vmem:[%s5647_s10 + $0x38] sm:$0xff] }
 0x931   :  { %v2741_v29 = vadd.f32 %v2740_v25, %v2739_v54  ;;  %4262 = vmatmul.mubr.msk.f32.gmra.mxu1 %vm779_vm4, %v2774_v53  ;;  %v2750_v39 = vadd.f32 %v2749_v22, %v2748_v1  ;;  %4276 = vmatprep.subr.mxu0 %v3859_v7  ;;  %v5462_v53 = vadd.f32 %v4217_v51, %v3820_v10 }
 0x932   :  { %4264 = vmatprep.mubr.msk.f32.mxu1 %vm779_vm4, %v2775_v6  ;;  %4277 = vmatpush3.msra.mxu0 %v3859_v7 }
 0x933   :  { %v2742_v59 = vrot.slane %v2741_v29, 1  ;;  %4483 = vrcp.f32 %v2750_v39 }
 0x935   :  { %4265 = vmatmul.mubr.msk.f32.gmra.mxu1 %vm779_vm4, %v2776_v58  ;;  %v2743_v57 = vadd.f32 %v2742_v59, %v2741_v29 }
 0x936   :  { %4267 = vmatprep.mubr.msk.f32.mxu1 %vm779_vm4, %v2777_v45 }
 0x937   :  { %4485 = vrcp.f32 %v2743_v57  ;;  %v4480_v35 = vpop.eup %4479 }
 0x938   :  { %v2780_v49 = vmul.f32 %v4480_v35, %v5397_v12  ;;  %v3858_v12 = vld [vmem:[%s5647_s10 + $0x30] sm:$0xff] }
 0x939   :  { %4268 = vmatmul.mubr.msk.f32.gmra.mxu1 %vm779_vm4, %v2778_v61  ;;  %4278 = vmatprep.subr.mxu0 %v3858_v12 }
 0x93a   :  { %4279 = vmatpush3.msra.mxu0 %v3858_v12 }
 0x93b   :  { %4280 = vmatprep.subr.mxu0 %v3857_v30 }
 0x93c   :  { %4281 = vmatpush3.msra.mxu0 %v3857_v30 }
 0x93d   :  { %v4482_v47 = vpop.eup %4481  ;;  %4282 = vmatprep.subr.mxu0 %v3856_v27 }
 0x93e   :  { %v2779_v5 = vmul.f32 %v4482_v47, %v5404_v48  ;;  %4283 = vmatpush3.msra.mxu0 %v3856_v27  ;;  %v2065_v48 = vpop.f32.mrf.mxu1 }
 0x93f   :  { %v2066_v21 = vadd.f32 %v3820_v10, %v2065_v48 }
 0x940   :  { %4270 = vmatprep.mubr.msk.f32.mxu1 %vm779_vm4, %v2779_v5  ;;  %v4484_v38 = vpop.eup %4483 }
 0x941   :  { %4271 = vmatmul.mubr.msk.f32.gmra.mxu1 %vm779_vm4, %v2780_v49  ;;  %v2782_v3 = vmul.f32 %v4484_v38, %v5409_v18 }
 0x944   :  { %v4486_v43 = vpop.eup %4485 }
 0x945   :  { %v2781_v20 = vmul.f32 %v4486_v43, %v4466_v8 }
 0x947   :  { %4273 = vmatprep.mubr.msk.f32.mxu1 %vm779_vm4, %v2781_v20 }
 0x948   :  { %4274 = vmatmul.mubr.msk.f32.gmra.mxu1 %vm779_vm4, %v2782_v3 }
 0x9e2   :  { %v4254_v17 = vpop.f32.mrf.mxu1 }
 0x9e3   :  { %v2977_v14 = vmul.f32 %v4254_v17, %v2066_v21 }
 0x9e4   :  { %v2897_v18 = vpop.f32.mrf.mxu1 }
 0x9e5   :  { %v2999_v42 = vsel %vm82_vm0, %v2977_v14, 0.0  ;;  %v2976_v52 = vmul.f32 %v2897_v18, %v2066_v21 }
 0x9e6   :  { %v3000_v13 = vrot.slane %v2999_v42, 4 }
 0x9e7   :  { %v2992_v26 = vsel %vm82_vm0, %v2976_v52, 0.0 }
 0x9e8   :  { %v3001_v46 = vadd.f32 %v3000_v13, %v2999_v42  ;;  %v2993_v2 = vrot.slane %v2992_v26, 4 }
 0x9e9   :  { %v4257_v23 = vpop.f32.mrf.mxu1 }
 0x9ea   :  { %v2979_v16 = vmul.f32 %v4257_v23, %v2066_v21  ;;  %v3002_v24 = vrot.slane %v3001_v46, 2  ;;  %v2994_v4 = vadd.f32 %v2993_v2, %v2992_v26 }
 0x9eb   :  { %v2907_v36 = vpop.f32.mrf.mxu1 }
 0x9ec   :  { %v3013_v15 = vsel %vm82_vm0, %v2979_v16, 0.0  ;;  %v2978_v8 = vmul.f32 %v2907_v36, %v2066_v21  ;;  %v3003_v44 = vadd.f32 %v3002_v24, %v3001_v46  ;;  %v2995_v60 = vrot.slane %v2994_v4, 2 }
 0x9ed   :  { %v3014_v56 = vrot.slane %v3013_v15, 4  ;;  %v4260_v40 = vpop.f32.mrf.mxu1 }
 0x9ee   :  { %v3006_v55 = vsel %vm82_vm0, %v2978_v8, 0.0  ;;  %v2981_v0 = vmul.f32 %v4260_v40, %v2066_v21  ;;  %v2996_v31 = vadd.f32 %v2995_v60, %v2994_v4  ;;  %v3004_v33 = vrot.slane %v3003_v44, 1 }
 0x9ef   :  { %v3015_v50 = vadd.f32 %v3014_v56, %v3013_v15  ;;  %v3007_v37 = vrot.slane %v3006_v55, 4  ;;  %v2917_v62 = vpop.f32.mrf.mxu1 }
 0x9f0   :  { %v3027_v41 = vsel %vm82_vm0, %v2981_v0, 0.0  ;;  %v2980_v11 = vmul.f32 %v2917_v62, %v2066_v21  ;;  %v2997_v19 = vrot.slane %v2996_v31, 1  ;;  %v3005_v57 = vadd.f32 %v3004_v33, %v3003_v44 }
 0x9f1   :  { %v3016_v1 = vrot.slane %v3015_v50, 2  ;;  %v3008_v54 = vadd.f32 %v3007_v37, %v3006_v55  ;;  %v4263_v6 = vpop.f32.mrf.mxu1  ;;  %v3028_v9 = vrot.slane %v3027_v41, 4 }
 0x9f2   :  { %v3020_v22 = vsel %vm82_vm0, %v2980_v11, 0.0  ;;  %v2983_v25 = vmul.f32 %v4263_v6, %v2066_v21  ;;  %v2998_v20 = vadd.f32 %v2997_v19, %v2996_v31 }
 0x9f3   :  { %v3009_v34 = vrot.slane %v3008_v54, 2  ;;  %v3021_v29 = vrot.slane %v3020_v22, 4  ;;  %v2927_v45 = vpop.f32.mrf.mxu1  ;;  %v3017_v39 = vadd.f32 %v3016_v1, %v3015_v50  ;;  %v3029_v59 = vadd.f32 %v3028_v9, %v3027_v41 }
 0x9f4   :  { %v3041_v58 = vsel %vm82_vm0, %v2983_v25, 0.0  ;;  %v2982_v32 = vmul.f32 %v2927_v45, %v2066_v21  ;;  %v3130_v46 = vsel %vm1434_vm5, %v3005_v57, %v2998_v20 }
 0x9f5   :  { %v3010_v61 = vadd.f32 %v3009_v34, %v3008_v54  ;;  %v3022_v35 = vadd.f32 %v3021_v29, %v3020_v22  ;;  %v4266_v47 = vpop.f32.mrf.mxu1  ;;  %v3030_v5 = vrot.slane %v3029_v59, 2  ;;  %v3042_v49 = vrot.slane %v3041_v58, 4 }
 0x9f6   :  { %v3034_v38 = vsel %vm82_vm0, %v2982_v32, 0.0  ;;  %v2985_v43 = vmul.f32 %v4266_v47, %v5462_v53  ;;  %v3018_v27 = vrot.slane %v3017_v39, 1 }
 0x9f7   :  { %v3011_v3 = vrot.slane %v3010_v61, 1  ;;  %v3023_v7 = vrot.slane %v3022_v35, 2  ;;  %v3035_v12 = vrot.slane %v3034_v38, 4  ;;  %v2937_v30 = vpop.f32.mrf.mxu1  ;;  %v3043_v51 = vadd.f32 %v3042_v49, %v3041_v58 }
 0x9f8   :  { %v3055_v48 = vsel %vm82_vm0, %v2985_v43, 0.0  ;;  %v2984_v10 = vmul.f32 %v2937_v30, %v5462_v53  ;;  %v3031_v17 = vadd.f32 %v3030_v5, %v3029_v59  ;;  %v3019_v4 = vadd.f32 %v3018_v27, %v3017_v39 }
 0x9f9   :  { %v3012_v21 = vadd.f32 %v3011_v3, %v3010_v61  ;;  %v3024_v14 = vadd.f32 %v3023_v7, %v3022_v35  ;;  %v3036_v18 = vadd.f32 %v3035_v12, %v3034_v38  ;;  %v4269_v42 = vpop.f32.mrf.mxu1  ;;  %v3044_v52 = vrot.slane %v3043_v51, 2 }
 0x9fa   :  { %v3048_v13 = vsel %vm82_vm0, %v2984_v10, 0.0  ;;  %v2987_v26 = vmul.f32 %v4269_v42, %v5462_v53  ;;  %v3056_v16 = vrot.slane %v3055_v48, 4  ;;  %v3032_v44 = vrot.slane %v3031_v17, 1 }
 0x9fb   :  { %v3025_v2 = vrot.slane %v3024_v14, 1  ;;  %v3037_v23 = vrot.slane %v3036_v18, 2  ;;  %v2947_v24 = vpop.f32.mrf.mxu1  ;;  %v3131_v36 = vsel %vm1436_vm6, %v3012_v21, %v3130_v46  ;;  %v3045_v15 = vadd.f32 %v3044_v52, %v3043_v51 }
 0x9fc   :  { %v3049_v8 = vrot.slane %v3048_v13, 4  ;;  %v3069_v40 = vsel %vm82_vm0, %v2987_v26, 0.0  ;;  %v2986_v0 = vmul.f32 %v2947_v24, %v5462_v53  ;;  %v3057_v50 = vadd.f32 %v3056_v16, %v3055_v48 }
 0x9fd   :  { %v3026_v60 = vadd.f32 %v3025_v2, %v3024_v14  ;;  %v3038_v56 = vadd.f32 %v3037_v23, %v3036_v18  ;;  %v3132_v37 = vsel %vm1438_vm7, %v3019_v4, %v3131_v36  ;;  %v3046_v62 = vrot.slane %v3045_v15, 1 }
 0x9fe   :  { %v3050_v55 = vadd.f32 %v3049_v8, %v3048_v13  ;;  %v3070_v41 = vrot.slane %v3069_v40, 4  ;;  %v3062_v11 = vsel %vm82_vm0, %v2986_v0, 0.0  ;;  %v3033_v1 = vadd.f32 %v3032_v44, %v3031_v17 }
 0x9ff   :  { %v3039_v31 = vrot.slane %v3038_v56, 1  ;;  %v3133_v33 = vsel %vm1440_vm8, %v3026_v60, %v3132_v37  ;;  %v3063_v6 = vrot.slane %v3062_v11, 4  ;;  %v3058_v25 = vrot.slane %v3057_v50, 2 }
 0xa00   :  { %v3051_v9 = vrot.slane %v3050_v55, 2  ;;  %v3134_v29 = vsel %vm1442_vm9, %v3033_v1, %v3133_v33  ;;  %v3047_v45 = vadd.f32 %v3046_v62, %v3045_v15  ;;  %v3071_v39 = vadd.f32 %v3070_v41, %v3069_v40 }
 0xa01   :  { %v3040_v54 = vadd.f32 %v3039_v31, %v3038_v56  ;;  %v4272_v22 = vpop.f32.mrf.mxu1  ;;  %v3064_v19 = vadd.f32 %v3063_v6, %v3062_v11  ;;  %v3059_v49 = vadd.f32 %v3058_v25, %v3057_v50 }
 0xa02   :  { %v2989_v34 = vmul.f32 %v4272_v22, %v5462_v53  ;;  %v3052_v35 = vadd.f32 %v3051_v9, %v3050_v55  ;;  %v3072_v20 = vrot.slane %v3071_v39, 2 }
 0xa03   :  { %v2957_v59 = vpop.f32.mrf.mxu1  ;;  %v3135_v58 = vsel %vm1444_vm10, %v3040_v54, %v3134_v29  ;;  %v3065_v32 = vrot.slane %v3064_v19, 2  ;;  %v3060_v10 = vrot.slane %v3059_v49, 1 }
 0xa04   :  { %v3083_v57 = vsel %vm82_vm0, %v2989_v34, 0.0  ;;  %v2988_v61 = vmul.f32 %v2957_v59, %v5462_v53  ;;  %v3136_v5 = vsel %vm1446_vm11, %v3047_v45, %v3135_v58  ;;  %v3053_v27 = vrot.slane %v3052_v35, 1 }
 0xa05   :  { %v3084_v47 = vrot.slane %v3083_v57, 4  ;;  %v3066_v38 = vadd.f32 %v3065_v32, %v3064_v19  ;;  %4284 = vmatprep.mubr.msk.f32.mxu0 %vm82_vm0, %v3136_v5  ;;  %v3073_v18 = vadd.f32 %v3072_v20, %v3071_v39  ;;  %v3061_v16 = vadd.f32 %v3060_v10, %v3059_v49  ;;  %v3860_v19 = vld [vmem:[%s5648_s11 + $0x1] ss:$0 sm:$0xff]  ;;  %v3866_v49 = vld [vmem:[%s5651_s14 + $0x28] sm:$0xff]  ;;  %v3878_v20 = vld [vmem:[%s5653_s16 + $0x70] sm:$0xff] }
 0xa06   :  { %v3076_v43 = vsel %vm82_vm0, %v2988_v61, 0.0  ;;  %v3054_v46 = vadd.f32 %v3053_v27, %v3052_v35 }
 0xa07   :  { %v3085_v3 = vadd.f32 %v3084_v47, %v3083_v57  ;;  %v3077_v7 = vrot.slane %v3076_v43, 4  ;;  %v3067_v21 = vrot.slane %v3066_v38, 1  ;;  %v3074_v36 = vrot.slane %v3073_v18, 1 }
 0xa08   :  { %v4275_v12 = vpop.f32.mrf.mxu1  ;;  %v3137_v56 = vsel %vm1434_vm5, %v3061_v16, %v3054_v46 }
 0xa09   :  { %v2991_v30 = vmul.f32 %v4275_v12, %v5462_v53  ;;  %v3078_v51 = vadd.f32 %v3077_v7, %v3076_v43  ;;  %v3086_v42 = vrot.slane %v3085_v3, 2  ;;  %v3068_v24 = vadd.f32 %v3067_v21, %v3066_v38  ;;  %v3865_v38 = vld [vmem:[%s5651_s14 + $0x20] sm:$0xff]  ;;  %v3879_v43 = vld [vmem:[%s5653_s16 + $0x78] sm:$0xff] }
 0xa0a   :  { %v2967_v48 = vpop.f32.mrf.mxu1  ;;  %v3075_v31 = vadd.f32 %v3074_v36, %v3073_v18  ;;  %4298 = vmatprep.subr.mxu0 %v3879_v43  ;;  %v3876_v7 = vld [vmem:[%s5653_s16 + $0x60] sm:$0xff] }
 0xa0b   :  { %v3097_v17 = vsel %vm82_vm0, %v2991_v30, 0.0  ;;  %v2990_v14 = vmul.f32 %v2967_v48, %v5462_v53  ;;  %v3079_v52 = vrot.slane %v3078_v51, 2  ;;  %v3087_v15 = vadd.f32 %v3086_v42, %v3085_v3  ;;  %v3877_v3 = vld [vmem:[%s5653_s16 + $0x68] sm:$0xff] }
 0xa0c   :  { %v3098_v13 = vrot.slane %v3097_v17, 4  ;;  %v3138_v40 = vsel %vm1436_vm6, %v3068_v24, %v3137_v56  ;;  %v3863_v24 = vld [vmem:[%s5649_s12 + $0x1] ss:$0 sm:$0xff] }
 0xa0d   :  { %v3090_v26 = vsel %vm82_vm0, %v2990_v14, 0.0  ;;  %v3080_v2 = vadd.f32 %v3079_v52, %v3078_v51  ;;  %v3088_v50 = vrot.slane %v3087_v15, 1  ;;  %v3139_v62 = vsel %vm1438_vm7, %v3075_v31, %v3138_v40  ;;  %v3874_v40 = vld [vmem:[%s5653_s16 + $0x50] sm:$0xff]  ;;  %v3869_v31 = vld [vmem:[%s5652_s15 + $0x1] ss:$0 sm:$0xff] }
 0xa0e   :  { %v3099_v23 = vadd.f32 %v3098_v13, %v3097_v17  ;;  %v3091_v4 = vrot.slane %v3090_v26, 4 }
 0xa0f   :  { %v3081_v8 = vrot.slane %v3080_v2, 1  ;;  %v3089_v1 = vadd.f32 %v3088_v50, %v3087_v15 }
 0xa10   :  { %v3100_v44 = vrot.slane %v3099_v23, 2  ;;  %v3092_v60 = vadd.f32 %v3091_v4, %v3090_v26 }
 0xa11   :  { %v3082_v55 = vadd.f32 %v3081_v8, %v3080_v2  ;;  %v3864_v8 = vld [vmem:[%s5650_s13 + $0x1] ss:$0 sm:$0xff] }
 0xa12   :  { %v3101_v53 = vadd.f32 %v3100_v44, %v3099_v23  ;;  %v3093_v0 = vrot.slane %v3092_v60, 2 }
 0xa13   :  { %v3140_v11 = vsel %vm1440_vm8, %v3082_v55, %v3139_v62  ;;  %v3873_v55 = vld [vmem:[%s5653_s16 + $0x48] sm:$0xff] }
 0xa14   :  { %v3094_v37 = vadd.f32 %v3093_v0, %v3092_v60  ;;  %v3102_v41 = vrot.slane %v3101_v53, 1  ;;  %v3141_v9 = vsel %vm1442_vm9, %v3089_v1, %v3140_v11  ;;  %v3872_v0 = vld [vmem:[%s5653_s16 + $0x40] sm:$0xff] }
 0xa15   :  { %v3880_v1 = vld [vmem:[%s5654_s17 + $0x1] ss:$0 sm:$0xff] }
 0xa16   :  { %v3095_v33 = vrot.slane %v3094_v37, 1  ;;  %v3103_v6 = vadd.f32 %v3102_v41, %v3101_v53  ;;  %v3875_v53 = vld [vmem:[%s5653_s16 + $0x58] sm:$0xff]  ;;  %s4533_s16 = smov [#allocation2]  }
 0xa17   :  { %s3739_s27 = sshll.u32 %s4533_s16, 4  ;;  %s3740_s27 = int_to_ptr.vmem [resolvable:$true] %s3739_s27 }
 0xa18   :  { %v3096_v54 = vadd.f32 %v3095_v33, %v3094_v37  ;;  %p4511_p1 = scmp.lt.s32.totalorder %s3740_s27, %s3740_s27 }
 0xa1a   :  { %v3142_v22 = vsel %vm1444_vm10, %v3096_v54, %v3141_v9  ;;  %v4504_v54 = vld [vmem:[%s5688_s28] sm:$0xff] }
 0xa1b   :  { %v3143_v25 = vsel %vm1446_vm11, %v3103_v6, %v3142_v22  ;;  %v3530_v6 = vsel %vm3529_vm13, %v4504_v54, 0.0 }
 0xa1c   :  { %4285 = vmatmul.mubr.msk.f32.vlgmr.msra.gmra.mxu0 %vm82_vm0, %v3143_v25 }
 0xa1d   :  { %4299 = vmatpush3.msra.mxu0 %v3879_v43 }
 0xa1e   :  { %4300 = vmatprep.subr.mxu0 %v3878_v20 }
 0xa1f   :  { %4301 = vmatpush3.msra.mxu0 %v3878_v20 }
 0xa20   :  { %4302 = vmatprep.subr.mxu0 %v3877_v3 }
 0xa21   :  { %4303 = vmatpush3.msra.mxu0 %v3877_v3 }
 0xa22   :  { %4304 = vmatprep.subr.mxu0 %v3876_v7 }
 0xa23   :  { %4305 = vmatpush3.msra.mxu0 %v3876_v7 }
 0xa24   :  { %4306 = vmatprep.subr.mxu0 %v3875_v53 }
 0xa25   :  { %4307 = vmatpush3.msra.mxu0 %v3875_v53  ;;  %v3883_v53 = vld [vmem:[%s5655_s18 + $0x1] ss:$0 sm:$0xff] }
 0xa26   :  { %4308 = vmatprep.subr.mxu0 %v3874_v40 }
 0xa27   :  { %4309 = vmatpush3.msra.mxu0 %v3874_v40 }
 0xa28   :  { %4310 = vmatprep.subr.mxu0 %v3873_v55 }
 0xa29   :  { %4311 = vmatpush3.msra.mxu0 %v3873_v55 }
 0xa2a   :  { %4312 = vmatprep.subr.mxu0 %v3872_v0 }
 0xa2b   :  { %4313 = vmatpush3.msra.mxu0 %v3872_v0 }
 0xadc   :  { %v4286_v34 = vpop.f32.mrf.mxu0 }
 0xadd   :  { %v3220_v29 = vadd.f32 %v4286_v34, %v3860_v19 }
 0xade   :  { %v3214_v45 = vpop.f32.mrf.mxu0 }
 0xadf   :  { %v3224_v39 = vadd.f32 %v3220_v29, %v5165_v28  ;;  %v3215_v59 = vadd.f32 %v3860_v19, %v3214_v45  ;;  %v3868_v28 = vld [vmem:[%s5651_s14 + $0x38] sm:$0xff]  ;;  %v3531_v19 = vrot.slane %v3530_v6, 4  ;;  %v4505_v45 = vld [vmem:[%s5688_s28 + $0x8] sm:$0xff] }
 0xae0   :  { %4287 = vmatprep.subr.mxu1 %v3868_v28 }
 0xae1   :  { %v3223_v58 = vadd.f32 %v3215_v59, %v5159_v63  ;;  %v3230_v32 = vsel %vm82_vm0, %v3224_v39, 0.0  ;;  %v3234_v57 = vmul.f32 %v3224_v39, %v3224_v39  ;;  %4288 = vmatpush3.msra.mxu1 %v3868_v28  ;;  %v3867_v63 = vld [vmem:[%s5651_s14 + $0x30] sm:$0xff] }
 0xae2   :  { %3231 = vadd.xlane.f32.xlu0 %v3230_v32  ;;  %4289 = vmatprep.subr.mxu1 %v3867_v63 }
 0xae3   :  { %v3238_v61 = vsel %vm82_vm0, %v3234_v57, 0.0  ;;  %v3227_v35 = vsel %vm82_vm0, %v3223_v58, 0.0  ;;  %v3233_v47 = vmul.f32 %v3223_v58, %v3223_v58  ;;  %4290 = vmatpush3.msra.mxu1 %v3867_v63  ;;  %v3532_v57 = vadd.f32 %v3531_v19, %v3530_v6 }
 0xae4   :  { %3239 = vadd.xlane.f32.xlu1 %v3238_v61  ;;  %4291 = vmatprep.subr.mxu1 %v3866_v49 }
 0xae5   :  { %v3235_v5 = vsel %vm82_vm0, %v3233_v47, 0.0  ;;  %4292 = vmatpush3.msra.mxu1 %v3866_v49  ;;  %v3533_v49 = vrot.slane %v3532_v57, 2 }
 0xae6   :  { %3228 = vadd.xlane.f32.xlu0 %v3227_v35  ;;  %4293 = vmatprep.subr.mxu1 %v3865_v38 }
 0xae7   :  { %4294 = vmatpush3.msra.mxu1 %v3865_v38  ;;  %v3534_v38 = vadd.f32 %v3533_v49, %v3532_v57 }
 0xae9   :  { %v3535_v20 = vrot.slane %v3534_v38, 1 }
 0xaea   :  { %3236 = vadd.xlane.f32.xlu0 %v3235_v5 }
 0xaeb   :  { %v3536_v7 = vadd.f32 %v3535_v20, %v3534_v38  ;;  %v3650_v38 = vld [vmem:[%s5659_s22 + $0x18] sm:$0xff]  ;;  %v3649_v20 = vld [vmem:[%s5659_s22 + $0x10] sm:$0xff] }
 0xb6b   :  { %v3232_v12 = vpop.xlane.xlu0 %3231 }
 0xb6c   :  { %v3242_v30 = vmul.f32 0.03125, %v3232_v12 }
 0xb6d   :  { %v3240_v27 = vpop.xlane.xlu1 %3239 }
 0xb6e   :  { %v3246_v51 = vmul.f32 %v3242_v30, %v3242_v30  ;;  %v3244_v48 = vmul.f32 0.03125, %v3240_v27  ;;  %v3250_v2 = vsub.f32 %v3224_v39, %v3242_v30  ;;  %v3537_v39 = vsel %vm3529_vm13, %v4505_v45, 0.0 }
 0xb6f   :  { %v3229_v10 = vpop.xlane.xlu0 %3228  ;;  %v3538_v61 = vrot.slane %v3537_v39, 4  ;;  %v3544_v30 = vmax.f32 %v3536_v7, 1e-06  ;;  %v3647_v7 = vld [vmem:[%s5659_s22] sm:$0xff] }
 0xb70   :  { %v3248_v21 = vsub.f32 %v3244_v48, %v3246_v51  ;;  %v3241_v17 = vmul.f32 0.03125, %v3229_v10  ;;  %v4531_v48 = vmov 0.0   ;;  %v3563_v10 = vld [vmem:[%s5657_s20 + $0x18] sm:$0xff] }
 0xb71   :  { %v3539_v28 = vadd.f32 %v3538_v61, %v3537_v39  ;;  %4317 = vmatprep.subr.mxu1 %v4531_v48 }
 0xb72   :  { %v3252_v14 = vadd.f32 1e-05, %v3248_v21  ;;  %v3245_v42 = vmul.f32 %v3241_v17, %v3241_v17  ;;  %v3249_v16 = vsub.f32 %v3223_v58, %v3241_v17  ;;  %v3562_v21 = vld [vmem:[%s5657_s20 + $0x10] sm:$0xff]  ;;  %v3561_v17 = vld [vmem:[%s5657_s20 + $0x8] sm:$0xff] }
 0xb73   :  { %v3237_v18 = vpop.xlane.xlu0 %3236  ;;  %v3540_v43 = vrot.slane %v3539_v28, 2 }
 0xb74   :  { %v3243_v52 = vmul.f32 0.03125, %v3237_v18  ;;  %4487 = vrsqrt.f32 %v3252_v14  ;;  %v3560_v14 = vld [vmem:[%s5657_s20] sm:$0xff] }
 0xb75   :  { %v3541_v3 = vadd.f32 %v3540_v43, %v3539_v28 }
 0xb76   :  { %v3247_v13 = vsub.f32 %v3243_v52, %v3245_v42 }
 0xb77   :  { %v3542_v12 = vrot.slane %v3541_v3, 1 }
 0xb78   :  { %v3251_v26 = vadd.f32 1e-05, %v3247_v13 }
 0xb79   :  { %v3543_v27 = vadd.f32 %v3542_v12, %v3541_v3  ;;  %v3648_v3 = vld [vmem:[%s5659_s22 + $0x8] sm:$0xff]  ;;  %v3885_v12 = vld [vmem:[%s5692_s26] ss:$0 sm:$0xff]  ;;  %s4506_s22 = scalar_lea.vmem %s3740_s27, 32 }
 0xb7a   :  { %4489 = vrsqrt.f32 %v3251_v26  ;;  %p4507_p0 = scmp.ne.s32.totalorder %s3740_s27, %s4506_s22  ;;  %p4512_p2 = scmp.lt.s32.totalorder %s4506_s22, %s4506_s22 }
 0xb7b   :  { %v3545_v51 = vmax.f32 %v3543_v27, 1e-06 }
 0xb7c   :  { %p4513_p3 = por %p4512_p2, %p4511_p1 }
 0xb7e   :  { %p4514_p4 = pnand %p4513_p3, %p4507_p0 }
 0xb81   :  { %v4488_v46 = vpop.eup %4487 }
 0xb82   :  { %v3256_v23 = vmul.f32 %v4488_v46, %v3250_v2 }
 0xb84   :  { %v3262_v15 = vmul.f32 %v3863_v24, %v3256_v23 }
 0xb86   :  { %v3268_v56 = vadd.f32 %v3864_v8, %v3262_v15 }
 0xb87   :  { %v4490_v4 = vpop.eup %4489 }
 0xb88   :  { %v3255_v36 = vmul.f32 %v4490_v4, %v3249_v16 }
 0xb8a   :  { %v3261_v44 = vmul.f32 %v3863_v24, %v3255_v36 }
 0xb8c   :  { %v3267_v60 = vadd.f32 %v3864_v8, %v3261_v44 }
 0xb8e   :  { %4295 = vmatprep.mubr.msk.f32.mxu1 %vm82_vm0, %v3267_v60 }
 0xb8f   :  { %4296 = vmatmul.mubr.msk.f32.vlgmr.msra.gmra.mxu1 %vm82_vm0, %v3268_v56 }
 0xb90   :  { %4318 = vmatpush3.msra.mxu1 %v3563_v10  ;;  %4325 = vmatprep.mubr.msk.f32.mxu1 %vm4532_vm14, %v4531_v48 }
 0xb91   :  { %4319 = vmatprep.subr.mxu1 %v4531_v48 }
 0xb92   :  { %4320 = vmatpush3.msra.mxu1 %v3562_v21  ;;  %v3887_v21 = vld [vmem:[%s5693_s5] ss:$0 sm:$0xff] }
 0xb93   :  { %4321 = vmatprep.subr.mxu1 %v4531_v48 }
 0xb94   :  { %4322 = vmatpush3.msra.mxu1 %v3561_v17 }
 0xb95   :  { %4323 = vmatprep.subr.mxu1 %v4531_v48 }
 0xb96   :  { %4324 = vmatpush3.msra.mxu1 %v3560_v14 }
 0xb97   :  { %4328 = vmatprep.subr.mxu1 %v4531_v48 }
 0xc4f   :  { %v4297_v50 = vpop.f32.mrf.mxu1 }
 0xc50   :  { %v3357_v37 = vadd.f32 %v4297_v50, %v3869_v31  ;;  %v3884_v50 = vld [vmem:[%s5656_s19 + $0x1] ss:$0 sm:$0xff] }
 0xc51   :  { %v3351_v62 = vpop.f32.mrf.mxu1 }
 0xc52   :  { %v3352_v41 = vadd.f32 %v3869_v31, %v3351_v62  ;;  %v3361_v33 = vmax.f32 %v3357_v37, 0.0 }
 0xc54   :  { %v3360_v11 = vmax.f32 %v3352_v41, 0.0 }
 0xc56   :  { %4314 = vmatprep.mubr.msk.f32.mxu0 %vm1685_vm12, %v3360_v11 }
 0xc57   :  { %4315 = vmatmul.mubr.msk.f32.vlgmr.msra.gmra.mxu0 %vm1685_vm12, %v3361_v33 }
 0xd17   :  { %v4316_v9 = vpop.f32.mrf.mxu0 }
 0xd18   :  { %v3454_v22 = vadd.f32 %v4316_v9, %v3880_v1 }
 0xd19   :  { %v3448_v25 = vpop.f32.mrf.mxu0 }
 0xd1a   :  { %v5562_v34 = vadd.f32 %v3454_v22, %v3268_v56  ;;  %v3449_v29 = vadd.f32 %v3880_v1, %v3448_v25 }
 0xd1c   :  { %v5567_v59 = vadd.f32 %v3449_v29, %v3267_v60  ;;  %v3464_v58 = vsel %vm82_vm0, %v5562_v34, 0.0  ;;  %v3468_v32 = vmul.f32 %v5562_v34, %v5562_v34 }
 0xd1d   :  { %3465 = vadd.xlane.f32.xlu1 %v3464_v58 }
 0xd1e   :  { %v3461_v35 = vsel %vm82_vm0, %v5567_v59, 0.0  ;;  %v3467_v47 = vmul.f32 %v5567_v59, %v5567_v59  ;;  %v3472_v5 = vsel %vm82_vm0, %v3468_v32, 0.0 }
 0xd1f   :  { %3462 = vadd.xlane.f32.xlu0 %v3461_v35 }
 0xd20   :  { %v3469_v63 = vsel %vm82_vm0, %v3467_v47, 0.0 }
 0xd21   :  { %3473 = vadd.xlane.f32.xlu1 %v3472_v5 }
 0xd23   :  { %3470 = vadd.xlane.f32.xlu0 %v3469_v63 }
 0xd32   :  { %3510 = vperm.xlu1 %4345, %v4505_v45  }
 0xd36   :  { %3548 = vperm.xlu1 %4345, %v3544_v30  }
 0xd39   :  { %3505 = vperm.xlu0 %4346, %v4504_v54  }
 0xd3a   :  { %3553 = vperm.xlu1 %4345, %v3545_v51  }
 0xda6   :  { %v3466_v18 = vpop.xlane.xlu1 %3465 }
 0xda7   :  { %v3476_v42 = vmul.f32 0.03125, %v3466_v18 }
 0xda8   :  { %v3463_v52 = vpop.xlane.xlu0 %3462 }
 0xda9   :  { %v3475_v13 = vmul.f32 0.03125, %v3463_v52  ;;  %v3480_v46 = vmul.f32 %v3476_v42, %v3476_v42  ;;  %v3484_v60 = vsub.f32 %v5562_v34, %v3476_v42 }
 0xdaa   :  { %v3474_v26 = vpop.xlane.xlu1 %3473 }
 0xdab   :  { %v3478_v2 = vmul.f32 0.03125, %v3474_v26  ;;  %v3479_v16 = vmul.f32 %v3475_v13, %v3475_v13  ;;  %v3483_v40 = vsub.f32 %v5567_v59, %v3475_v13 }
 0xdac   :  { %v3471_v23 = vpop.xlane.xlu0 %3470 }
 0xdad   :  { %v3482_v24 = vsub.f32 %v3478_v2, %v3480_v46  ;;  %v3477_v4 = vmul.f32 0.03125, %v3471_v23 }
 0xdae   :  { %v3511_v44 = vpop.permute.xlu1 %3510 }
 0xdaf   :  { %v3486_v36 = vadd.f32 1e-05, %v3482_v24  ;;  %v3481_v15 = vsub.f32 %v3477_v4, %v3479_v16 }
 0xdb1   :  { %4491 = vrsqrt.f32 %v3486_v36  ;;  %v3485_v8 = vadd.f32 1e-05, %v3481_v15 }
 0xdb2   :  { %v3549_v0 = vpop.permute.xlu1 %3548 }
 0xdb3   :  { %4493 = vrsqrt.f32 %v3485_v8 }
 0xdb4   :  { %v3506_v33 = vpop.permute.xlu0 %3505  ;;  %4495 = vrcp.f32 %v3549_v0 }
 0xdb6   :  { %v3554_v54 = vpop.permute.xlu1 %3553 }
 0xdb7   :  { %4497 = vrcp.f32 %v3554_v54 }
 0xdbe   :  { %v4492_v56 = vpop.eup %4491 }
 0xdbf   :  { %v3490_v55 = vmul.f32 %v4492_v56, %v3484_v60 }
 0xdc0   :  { %v4494_v31 = vpop.eup %4493 }
 0xdc1   :  { %v3496_v37 = vmul.f32 %v3883_v53, %v3490_v55  ;;  %v3489_v62 = vmul.f32 %v4494_v31, %v3483_v40  ;;  %v4496_v47 = vpop.eup %4495 }
 0xdc3   :  { %v3502_v41 = vadd.f32 %v3884_v50, %v3496_v37  ;;  %v3495_v11 = vmul.f32 %v3883_v53, %v3489_v62 }
 0xdc4   :  { %v4498_v28 = vpop.eup %4497 }
 0xdc5   :  { %v3514_v1 = vmul.f32 %v3511_v44, %v3502_v41  ;;  %v3501_v6 = vadd.f32 %v3884_v50, %v3495_v11 }
 0xdc7   :  { %v3522_v9 = vsel %vm82_vm0, %v3514_v1, 0.0  ;;  %v3513_v22 = vmul.f32 %v3506_v33, %v3501_v6 }
 0xdc8   :  { %v3523_v25 = vrot.slane %v3522_v9, 4 }
 0xdc9   :  { %v3515_v19 = vsel %vm82_vm0, %v3513_v22, 0.0 }
 0xdca   :  { %v3524_v34 = vadd.f32 %v3523_v25, %v3522_v9  ;;  %v3516_v29 = vrot.slane %v3515_v19, 4 }
 0xdcc   :  { %v3525_v45 = vrot.slane %v3524_v34, 2  ;;  %v3517_v39 = vadd.f32 %v3516_v29, %v3515_v19 }
 0xdce   :  { %v3526_v59 = vadd.f32 %v3525_v45, %v3524_v34  ;;  %v3518_v58 = vrot.slane %v3517_v39, 2 }
 0xdd0   :  { %v3527_v32 = vrot.slane %v3526_v59, 1  ;;  %v3519_v57 = vadd.f32 %v3518_v58, %v3517_v39 }
 0xdd2   :  { %v3528_v61 = vadd.f32 %v3527_v32, %v3526_v59  ;;  %v3520_v35 = vrot.slane %v3519_v57, 1 }
 0xdd4   :  { %v3521_v5 = vadd.f32 %v3520_v35, %v3519_v57  ;;  %v3559_v49 = vmul.f32 %v4498_v28, %v3528_v61 }
 0xdd6   :  { %v3557_v63 = vmul.f32 %v4496_v47, %v3521_v5 }
 0xdd8   :  { %v3573_v43 = vsel %vm1434_vm5, %v3559_v49, %v3557_v63 }
 0xdd9   :  { %4326 = vmatmul.mubr.msk.f32.vlgmr.msra.gmra.mxu1 %vm82_vm0, %v3573_v43 }
 0xdda   :  { %4329 = vmatpush3.msra.mxu1 %v3650_v38  ;;  %4336 = vmatprep.mubr.msk.f32.mxu1 %vm4532_vm14, %v4531_v48 }
 0xddb   :  { %4330 = vmatprep.subr.mxu1 %v4531_v48 }
 0xddc   :  { %4331 = vmatpush3.msra.mxu1 %v3649_v20 }
 0xddd   :  { %4332 = vmatprep.subr.mxu1 %v4531_v48 }
 0xdde   :  { %4333 = vmatpush3.msra.mxu1 %v3648_v3 }
 0xddf   :  { %4334 = vmatprep.subr.mxu1 %v4531_v48 }
 0xde0   :  { %4335 = vmatpush3.msra.mxu1 %v3647_v7 }
 0xe99   :  { %v3642_v30 = vpop.f32.mrf.mxu1 }
 0xe9a   :  { %v3643_v27 = vadd.f32 %v3885_v12, %v3642_v30 }
 0xe9b   :  { %v4327_v51 = vpop.f32.mrf.mxu1 }
 0xe9c   :  { %v3646_v10 = vmax.f32 %v3643_v27, 0.0 }
 0xe9e   :  { %4337 = vmatmul.mubr.msk.f32.vlgmr.msra.gmra.mxu1 %vm82_vm0, %v3646_v10 }
 0xf5e   :  { %v3727_v17 = vpop.f32.mrf.mxu1 }
 0xf5f   :  { %v3728_v48 = vadd.f32 %v3887_v21, %v3727_v17 }
 0xf60   :  { %v4338_v14 = vpop.f32.mrf.mxu1 }
 0xf61   :  { %3732 = vst.msk [vmem:[#allocation2] sm:$0x3] %vm3731_vm15, %v3728_v48 }
 0xf62   :  { %4517 = shalt.err (!%p4514_p4)
}
 0xf63   :  { %s5694_s17 = sld [smem:[#allocation16_spill]] }
 0xf69   :  { %3742 = dma.vmem_to_hbm [thread:$0]  %s3740_s27, 32, %s5694_s17, [#allocation3]  }
 0xf6a   :  { %4526 = dma.done.wait [#allocation3], 32  }
 0xf6b   :  { %4527 = vsyncadd [#allocation3], 4294967264 }
 0xf6c   :  { %3746 = vsyncpa [#allocation3], 1 }

</bundles_post_ra>
